<compile_context>
chip_gen: v7x
topology: tpu7x:2x2x1
jax: 0.10.0
libtpu: 0.0.40
codegen_flags: <defaults>
</compile_context>

<pallas_src>
import jax
import jax.numpy as jnp
import numpy as np
from jax.experimental import pallas as pl
from jax.experimental.pallas import tpu as pltpu

# Model hyper-parameters (mirroring the PyTorch script's globals).
D_MODEL = 64
INPUT_DIM = 512
N_HEADS = 8
BATCH = 1
SEQ = 10


def _mha_kernel(q_ref, k_ref,
                wqv_ref, bqv_ref,
                wk_ref, bk_ref,
                wp_ref, bp_ref,
                wo_ref, bo_ref,
                out_ref):
    """All heads computed in one kernel invocation (single grid step)."""
    H, d, _ = wp_ref.shape
    Hd = H * d
    inv_sqrt_d = jnp.float32(1.0 / float(np.sqrt(d)))

    q_in = q_ref[...]            # [T, D_in]
    k_in = k_ref[...]            # [T, D_in]

    # Fused Q|V projection (both come from the query input): [T, 2*H*d].
    qv_all = jnp.dot(q_in, wqv_ref[...],
                     preferred_element_type=jnp.float32) + bqv_ref[...]
    # K projection (comes from the key input): [T, H*d].
    k_all = jnp.dot(k_in, wk_ref[...],
                    preferred_element_type=jnp.float32) + bk_ref[...]

    # Per-head scaled dot-product attention, statically unrolled (tiny [T,T]).
    ctx_parts = []
    for h in range(H):
        lo = h * d
        Qh = qv_all[:, lo:lo + d]                 # [T, d]
        Vh = qv_all[:, Hd + lo:Hd + lo + d]       # [T, d]
        Kh = k_all[:, lo:lo + d]                  # [T, d]

        s = jnp.dot(Qh, Kh.T, preferred_element_type=jnp.float32) * inv_sqrt_d
        s = s - jnp.max(s, axis=-1, keepdims=True)
        p = jnp.exp(s)
        alphas = p * pl.reciprocal(jnp.sum(p, axis=-1, keepdims=True),
                                   approx=True)

        ctx = jnp.dot(alphas, Vh, preferred_element_type=jnp.float32)   # [T, d]
        # Per-head value projection (proj_values=True).
        ctx = jnp.dot(ctx, wp_ref[h],
                      preferred_element_type=jnp.float32) + bp_ref[h]
        ctx_parts.append(ctx)

    # Concat over heads -> lane-dense [T, H*d], then one output-linear matmul.
    ctx_all = jnp.concatenate(ctx_parts, axis=-1)
    out_ref[...] = (jnp.dot(ctx_all, wo_ref[...],
                            preferred_element_type=jnp.float32) + bo_ref[...])


def multi_head_attention(query, key, params):
    """query, key: [B, T, INPUT_DIM] float32. Returns [B, T, D_MODEL]."""
    B, T, Din = query.shape
    H, _, d = params["wq"].shape
    Hd = H * d

    q2d = query.reshape(B * T, Din)
    k2d = key.reshape(B * T, Din)

    # Weight layout plumbing (constant w.r.t. inputs):
    # per-head [H, Din, d] -> head-major column blocks [Din, H*d].
    wq_all = params["wq"].transpose(1, 0, 2).reshape(Din, Hd)
    wv_all = params["wv"].transpose(1, 0, 2).reshape(Din, Hd)
    wk_all = params["wk"].transpose(1, 0, 2).reshape(Din, Hd)
    wqv = jnp.concatenate([wq_all, wv_all], axis=1)            # [Din, 2*H*d]
    bqv = jnp.concatenate([params["bq"].reshape(Hd),
                           params["bv"].reshape(Hd)]).reshape(1, 2 * Hd)
    bk_all = params["bk"].reshape(1, Hd)

    wp = params["wp"]                                          # [H, d, d]
    bp = params["bp"].reshape(H, 1, d)
    wo = params["wo"]                                          # [H*d, d]
    bo = params["bo"].reshape(1, d)

    def full(shape):
        return pl.BlockSpec(shape, lambda i, _s=shape: (0,) * len(_s))

    out2d = pl.pallas_call(
        _mha_kernel,
        out_shape=jax.ShapeDtypeStruct((B * T, d), jnp.float32),
        grid=(1,),
        in_specs=[
            full((B * T, Din)),        # query rows
            full((B * T, Din)),        # key rows
            full((Din, 2 * Hd)),       # fused Wq|Wv
            full((1, 2 * Hd)),         # fused bq|bv
            full((Din, Hd)),           # Wk (all heads)
            full((1, Hd)),             # bk (all heads)
            full((H, d, d)),           # per-head proj_value weights
            full((H, 1, d)),           # per-head proj_value bias
            full((Hd, d)),             # output linear weight
            full((1, d)),              # output linear bias
        ],
        out_specs=full((B * T, d)),
        compiler_params=pltpu.CompilerParams(
            dimension_semantics=("arbitrary",)),
    )(q2d, k2d, wqv, bqv, wk_all, bk_all, wp, bp, wo, bo)

    return out2d.reshape(B, T, d)


def _init_params(rng):
    """Deterministic parameter init (PyTorch-Linear-style uniform bounds)."""
    def linear(key, fan_in, shape_w, shape_b):
        kw, kb = jax.random.split(key)
        bound = 1.0 / np.sqrt(fan_in)
        w = jax.random.uniform(kw, shape_w, jnp.float32, -bound, bound)
        b = jax.random.uniform(kb, shape_b, jnp.float32, -bound, bound)
        return w, b

    keys = jax.random.split(rng, 6)
    wq, bq = linear(keys[0], INPUT_DIM, (N_HEADS, INPUT_DIM, D_MODEL), (N_HEADS, D_MODEL))
    wk, bk = linear(keys[1], INPUT_DIM, (N_HEADS, INPUT_DIM, D_MODEL), (N_HEADS, D_MODEL))
    wv, bv = linear(keys[2], INPUT_DIM, (N_HEADS, INPUT_DIM, D_MODEL), (N_HEADS, D_MODEL))
    wp, bp = linear(keys[3], D_MODEL, (N_HEADS, D_MODEL, D_MODEL), (N_HEADS, D_MODEL))
    wo, bo = linear(keys[4], N_HEADS * D_MODEL, (N_HEADS * D_MODEL, D_MODEL), (D_MODEL,))
    return dict(wq=wq, bq=bq, wk=wk, bk=bk, wv=wv, bv=bv,
                wp=wp, bp=bp, wo=wo, bo=bo)


def _reference(query, key, p):
    """Pure-JAX reference mirroring the PyTorch forward (mask=None)."""
    outs = []
    for h in range(N_HEADS):
        Q = query @ p["wq"][h] + p["bq"][h]
        K = key @ p["wk"][h] + p["bk"][h]
        V = query @ p["wv"][h] + p["bv"][h]
        scores = (Q @ jnp.swapaxes(K, -2, -1)) / jnp.sqrt(jnp.float32(D_MODEL))
        alphas = jax.nn.softmax(scores, axis=-1)
        ctx = alphas @ V
        ctx = ctx @ p["wp"][h] + p["bp"][h]
        outs.append(ctx)
    concat = jnp.concatenate(outs, axis=-1)
    return concat @ p["wo"] + p["bo"]


if __name__ == "__main__":
    root = jax.random.PRNGKey(0)
    k_q, k_k, k_p = jax.random.split(root, 3)

    query = jax.random.normal(k_q, (BATCH, SEQ, INPUT_DIM), jnp.float32)
    key = jax.random.normal(k_k, (BATCH, SEQ, INPUT_DIM), jnp.float32)
    params = _init_params(k_p)

    out = multi_head_attention(query, key, params)
    out = jax.block_until_ready(out)

    ref = _reference(query, key, params)
    # Slightly looser tolerance than before to accommodate the approx (EUP)
    # reciprocal in the softmax denominator; still a tight f32 check.
    np.testing.assert_allclose(np.asarray(out), np.asarray(ref), rtol=1e-3, atol=1e-3)

    print("KERNEL_OK")
</pallas_src>

<mosaic_0001>
module attributes {stable_mosaic.version = 11 : i64} {
  func.func @_mha_kernel(%arg0: i32, %arg1: memref<10x512xf32, #tpu.memory_space<vmem>>, %arg2: memref<10x512xf32, #tpu.memory_space<vmem>>, %arg3: memref<512x1024xf32, #tpu.memory_space<vmem>>, %arg4: memref<1x1024xf32, #tpu.memory_space<vmem>>, %arg5: memref<512x512xf32, #tpu.memory_space<vmem>>, %arg6: memref<1x512xf32, #tpu.memory_space<vmem>>, %arg7: memref<8x64x64xf32, #tpu.memory_space<vmem>>, %arg8: memref<8x1x64xf32, #tpu.memory_space<vmem>>, %arg9: memref<512x64xf32, #tpu.memory_space<vmem>>, %arg10: memref<1x64xf32, #tpu.memory_space<vmem>>, %arg11: memref<10x64xf32, #tpu.memory_space<vmem>>) attributes {dimension_semantics = [#tpu.dimension_semantics<arbitrary>], iteration_bounds = array<i64: 1>, scalar_prefetch = 0 : i64, scratch_operands = 0 : i64, tpu.core_type = #tpu.core_type<tc>, window_params = [{pipeline_mode = #tpu.pipeline_mode<synchronous>, transform_indices = @transform_0, window_bounds = array<i64: 10, 512>}, {pipeline_mode = #tpu.pipeline_mode<synchronous>, transform_indices = @transform_1, window_bounds = array<i64: 10, 512>}, {pipeline_mode = #tpu.pipeline_mode<synchronous>, transform_indices = @transform_2, window_bounds = array<i64: 512, 1024>}, {pipeline_mode = #tpu.pipeline_mode<synchronous>, transform_indices = @transform_3, window_bounds = array<i64: 1, 1024>}, {pipeline_mode = #tpu.pipeline_mode<synchronous>, transform_indices = @transform_4, window_bounds = array<i64: 512, 512>}, {pipeline_mode = #tpu.pipeline_mode<synchronous>, transform_indices = @transform_5, window_bounds = array<i64: 1, 512>}, {pipeline_mode = #tpu.pipeline_mode<synchronous>, transform_indices = @transform_6, window_bounds = array<i64: 8, 64, 64>}, {pipeline_mode = #tpu.pipeline_mode<synchronous>, transform_indices = @transform_7, window_bounds = array<i64: 8, 1, 64>}, {pipeline_mode = #tpu.pipeline_mode<synchronous>, transform_indices = @transform_8, window_bounds = array<i64: 512, 64>}, {pipeline_mode = #tpu.pipeline_mode<synchronous>, transform_indices = @transform_9, window_bounds = array<i64: 1, 64>}, {pipeline_mode = #tpu.pipeline_mode<synchronous>, transform_indices = @transform_10, window_bounds = array<i64: 10, 64>}]} {
    %c0 = arith.constant 0 : index
    %c0_0 = arith.constant 0 : index
    %0 = vector.load %arg1[%c0, %c0_0] : memref<10x512xf32, #tpu.memory_space<vmem>>, vector<10x512xf32>
    %c0_1 = arith.constant 0 : index
    %c0_2 = arith.constant 0 : index
    %1 = vector.load %arg2[%c0_1, %c0_2] : memref<10x512xf32, #tpu.memory_space<vmem>>, vector<10x512xf32>
    %c0_3 = arith.constant 0 : index
    %c0_4 = arith.constant 0 : index
    %2 = vector.load %arg3[%c0_3, %c0_4] : memref<512x1024xf32, #tpu.memory_space<vmem>>, vector<512x1024xf32>
    %cst = arith.constant dense<0.000000e+00> : vector<10x1024xf32>
    %3 = tpu.matmul %0, %2, %cst {dimension_numbers = #tpu.dot_dimension_numbers<[1], [0], [0], [1], [0, 0, 1, 1], [], []>} : vector<10x512xf32>, vector<512x1024xf32>, vector<10x1024xf32> -> vector<10x1024xf32>
    %c0_5 = arith.constant 0 : index
    %c0_6 = arith.constant 0 : index
    %4 = vector.load %arg4[%c0_5, %c0_6] : memref<1x1024xf32, #tpu.memory_space<vmem>>, vector<1x1024xf32>
    %5 = vector.broadcast %4 : vector<1x1024xf32> to vector<10x1024xf32>
    %6 = arith.addf %3, %5 : vector<10x1024xf32>
    %c0_7 = arith.constant 0 : index
    %c0_8 = arith.constant 0 : index
    %7 = vector.load %arg5[%c0_7, %c0_8] : memref<512x512xf32, #tpu.memory_space<vmem>>, vector<512x512xf32>
    %cst_9 = arith.constant dense<0.000000e+00> : vector<10x512xf32>
    %8 = tpu.matmul %1, %7, %cst_9 {dimension_numbers = #tpu.dot_dimension_numbers<[1], [0], [0], [1], [0, 0, 1, 1], [], []>} : vector<10x512xf32>, vector<512x512xf32>, vector<10x512xf32> -> vector<10x512xf32>
    %c0_10 = arith.constant 0 : index
    %c0_11 = arith.constant 0 : index
    %9 = vector.load %arg6[%c0_10, %c0_11] : memref<1x512xf32, #tpu.memory_space<vmem>>, vector<1x512xf32>
    %10 = vector.broadcast %9 : vector<1x512xf32> to vector<10x512xf32>
    %11 = arith.addf %8, %10 : vector<10x512xf32>
    %12 = vector.extract_strided_slice %6 {offsets = [0, 0], sizes = [10, 64], strides = [1, 1]} : vector<10x1024xf32> to vector<10x64xf32>
    %13 = vector.extract_strided_slice %6 {offsets = [0, 512], sizes = [10, 64], strides = [1, 1]} : vector<10x1024xf32> to vector<10x64xf32>
    %14 = vector.extract_strided_slice %11 {offsets = [0, 0], sizes = [10, 64], strides = [1, 1]} : vector<10x512xf32> to vector<10x64xf32>
    %15 = tpu.transpose %14, [1, 0] : vector<10x64xf32> -> vector<64x10xf32>
    %cst_12 = arith.constant dense<0.000000e+00> : vector<10x10xf32>
    %16 = tpu.matmul %12, %15, %cst_12 {dimension_numbers = #tpu.dot_dimension_numbers<[1], [0], [0], [1], [0, 0, 1, 1], [], []>} : vector<10x64xf32>, vector<64x10xf32>, vector<10x10xf32> -> vector<10x10xf32>
    %cst_13 = arith.constant 1.250000e-01 : f32
    %17 = vector.broadcast %cst_13 : f32 to vector<10x10xf32>
    %18 = arith.mulf %16, %17 : vector<10x10xf32>
    %cst_14 = arith.constant dense<0xFF800000> : vector<10xf32>
    %19 = vector.multi_reduction <maximumf>, %18, %cst_14 [1] : vector<10x10xf32> to vector<10xf32>
    %20 = vector.shape_cast %19 : vector<10xf32> to vector<10x1xf32>
    %21 = vector.broadcast %20 : vector<10x1xf32> to vector<10x10xf32>
    %22 = arith.subf %18, %21 : vector<10x10xf32>
    %23 = math.exp %22 : vector<10x10xf32>
    %cst_15 = arith.constant dense<0.000000e+00> : vector<10xf32>
    %24 = vector.multi_reduction <add>, %23, %cst_15 [1] : vector<10x10xf32> to vector<10xf32>
    %25 = vector.shape_cast %24 : vector<10xf32> to vector<10x1xf32>
    %26 = tpu.reciprocal %25 {approx = true} : vector<10x1xf32> -> vector<10x1xf32>
    %27 = vector.broadcast %26 : vector<10x1xf32> to vector<10x10xf32>
    %28 = arith.mulf %23, %27 : vector<10x10xf32>
    %cst_16 = arith.constant dense<0.000000e+00> : vector<10x64xf32>
    %29 = tpu.matmul %28, %13, %cst_16 {dimension_numbers = #tpu.dot_dimension_numbers<[1], [0], [0], [1], [0, 0, 1, 1], [], []>} : vector<10x10xf32>, vector<10x64xf32>, vector<10x64xf32> -> vector<10x64xf32>
    %c0_17 = arith.constant 0 : index
    %c0_18 = arith.constant 0 : index
    %c0_19 = arith.constant 0 : index
    %30 = vector.load %arg7[%c0_17, %c0_18, %c0_19] : memref<8x64x64xf32, #tpu.memory_space<vmem>>, vector<1x64x64xf32>
    %31 = vector.shape_cast %30 : vector<1x64x64xf32> to vector<64x64xf32>
    %cst_20 = arith.constant dense<0.000000e+00> : vector<10x64xf32>
    %32 = tpu.matmul %29, %31, %cst_20 {dimension_numbers = #tpu.dot_dimension_numbers<[1], [0], [0], [1], [0, 0, 1, 1], [], []>} : vector<10x64xf32>, vector<64x64xf32>, vector<10x64xf32> -> vector<10x64xf32>
    %c0_21 = arith.constant 0 : index
    %c0_22 = arith.constant 0 : index
    %c0_23 = arith.constant 0 : index
    %33 = vector.load %arg8[%c0_21, %c0_22, %c0_23] : memref<8x1x64xf32, #tpu.memory_space<vmem>>, vector<1x1x64xf32>
    %34 = vector.shape_cast %33 : vector<1x1x64xf32> to vector<1x64xf32>
    %35 = vector.broadcast %34 : vector<1x64xf32> to vector<10x64xf32>
    %36 = arith.addf %32, %35 : vector<10x64xf32>
    %37 = vector.extract_strided_slice %6 {offsets = [0, 64], sizes = [10, 64], strides = [1, 1]} : vector<10x1024xf32> to vector<10x64xf32>
    %38 = vector.extract_strided_slice %6 {offsets = [0, 576], sizes = [10, 64], strides = [1, 1]} : vector<10x1024xf32> to vector<10x64xf32>
    %39 = vector.extract_strided_slice %11 {offsets = [0, 64], sizes = [10, 64], strides = [1, 1]} : vector<10x512xf32> to vector<10x64xf32>
    %40 = tpu.transpose %39, [1, 0] : vector<10x64xf32> -> vector<64x10xf32>
    %cst_24 = arith.constant dense<0.000000e+00> : vector<10x10xf32>
    %41 = tpu.matmul %37, %40, %cst_24 {dimension_numbers = #tpu.dot_dimension_numbers<[1], [0], [0], [1], [0, 0, 1, 1], [], []>} : vector<10x64xf32>, vector<64x10xf32>, vector<10x10xf32> -> vector<10x10xf32>
    %cst_25 = arith.constant 1.250000e-01 : f32
    %42 = vector.broadcast %cst_25 : f32 to vector<10x10xf32>
    %43 = arith.mulf %41, %42 : vector<10x10xf32>
    %cst_26 = arith.constant dense<0xFF800000> : vector<10xf32>
    %44 = vector.multi_reduction <maximumf>, %43, %cst_26 [1] : vector<10x10xf32> to vector<10xf32>
    %45 = vector.shape_cast %44 : vector<10xf32> to vector<10x1xf32>
    %46 = vector.broadcast %45 : vector<10x1xf32> to vector<10x10xf32>
    %47 = arith.subf %43, %46 : vector<10x10xf32>
    %48 = math.exp %47 : vector<10x10xf32>
    %cst_27 = arith.constant dense<0.000000e+00> : vector<10xf32>
    %49 = vector.multi_reduction <add>, %48, %cst_27 [1] : vector<10x10xf32> to vector<10xf32>
    %50 = vector.shape_cast %49 : vector<10xf32> to vector<10x1xf32>
    %51 = tpu.reciprocal %50 {approx = true} : vector<10x1xf32> -> vector<10x1xf32>
    %52 = vector.broadcast %51 : vector<10x1xf32> to vector<10x10xf32>
    %53 = arith.mulf %48, %52 : vector<10x10xf32>
    %cst_28 = arith.constant dense<0.000000e+00> : vector<10x64xf32>
    %54 = tpu.matmul %53, %38, %cst_28 {dimension_numbers = #tpu.dot_dimension_numbers<[1], [0], [0], [1], [0, 0, 1, 1], [], []>} : vector<10x10xf32>, vector<10x64xf32>, vector<10x64xf32> -> vector<10x64xf32>
    %c1 = arith.constant 1 : index
    %c0_29 = arith.constant 0 : index
    %c0_30 = arith.constant 0 : index
    %55 = vector.load %arg7[%c1, %c0_29, %c0_30] : memref<8x64x64xf32, #tpu.memory_space<vmem>>, vector<1x64x64xf32>
    %56 = vector.shape_cast %55 : vector<1x64x64xf32> to vector<64x64xf32>
    %cst_31 = arith.constant dense<0.000000e+00> : vector<10x64xf32>
    %57 = tpu.matmul %54, %56, %cst_31 {dimension_numbers = #tpu.dot_dimension_numbers<[1], [0], [0], [1], [0, 0, 1, 1], [], []>} : vector<10x64xf32>, vector<64x64xf32>, vector<10x64xf32> -> vector<10x64xf32>
    %c1_32 = arith.constant 1 : index
    %c0_33 = arith.constant 0 : index
    %c0_34 = arith.constant 0 : index
    %58 = vector.load %arg8[%c1_32, %c0_33, %c0_34] : memref<8x1x64xf32, #tpu.memory_space<vmem>>, vector<1x1x64xf32>
    %59 = vector.shape_cast %58 : vector<1x1x64xf32> to vector<1x64xf32>
    %60 = vector.broadcast %59 : vector<1x64xf32> to vector<10x64xf32>
    %61 = arith.addf %57, %60 : vector<10x64xf32>
    %62 = vector.extract_strided_slice %6 {offsets = [0, 128], sizes = [10, 64], strides = [1, 1]} : vector<10x1024xf32> to vector<10x64xf32>
    %63 = vector.extract_strided_slice %6 {offsets = [0, 640], sizes = [10, 64], strides = [1, 1]} : vector<10x1024xf32> to vector<10x64xf32>
    %64 = vector.extract_strided_slice %11 {offsets = [0, 128], sizes = [10, 64], strides = [1, 1]} : vector<10x512xf32> to vector<10x64xf32>
    %65 = tpu.transpose %64, [1, 0] : vector<10x64xf32> -> vector<64x10xf32>
    %cst_35 = arith.constant dense<0.000000e+00> : vector<10x10xf32>
    %66 = tpu.matmul %62, %65, %cst_35 {dimension_numbers = #tpu.dot_dimension_numbers<[1], [0], [0], [1], [0, 0, 1, 1], [], []>} : vector<10x64xf32>, vector<64x10xf32>, vector<10x10xf32> -> vector<10x10xf32>
    %cst_36 = arith.constant 1.250000e-01 : f32
    %67 = vector.broadcast %cst_36 : f32 to vector<10x10xf32>
    %68 = arith.mulf %66, %67 : vector<10x10xf32>
    %cst_37 = arith.constant dense<0xFF800000> : vector<10xf32>
    %69 = vector.multi_reduction <maximumf>, %68, %cst_37 [1] : vector<10x10xf32> to vector<10xf32>
    %70 = vector.shape_cast %69 : vector<10xf32> to vector<10x1xf32>
    %71 = vector.broadcast %70 : vector<10x1xf32> to vector<10x10xf32>
    %72 = arith.subf %68, %71 : vector<10x10xf32>
    %73 = math.exp %72 : vector<10x10xf32>
    %cst_38 = arith.constant dense<0.000000e+00> : vector<10xf32>
    %74 = vector.multi_reduction <add>, %73, %cst_38 [1] : vector<10x10xf32> to vector<10xf32>
    %75 = vector.shape_cast %74 : vector<10xf32> to vector<10x1xf32>
    %76 = tpu.reciprocal %75 {approx = true} : vector<10x1xf32> -> vector<10x1xf32>
    %77 = vector.broadcast %76 : vector<10x1xf32> to vector<10x10xf32>
    %78 = arith.mulf %73, %77 : vector<10x10xf32>
    %cst_39 = arith.constant dense<0.000000e+00> : vector<10x64xf32>
    %79 = tpu.matmul %78, %63, %cst_39 {dimension_numbers = #tpu.dot_dimension_numbers<[1], [0], [0], [1], [0, 0, 1, 1], [], []>} : vector<10x10xf32>, vector<10x64xf32>, vector<10x64xf32> -> vector<10x64xf32>
    %c2 = arith.constant 2 : index
    %c0_40 = arith.constant 0 : index
    %c0_41 = arith.constant 0 : index
    %80 = vector.load %arg7[%c2, %c0_40, %c0_41] : memref<8x64x64xf32, #tpu.memory_space<vmem>>, vector<1x64x64xf32>
    %81 = vector.shape_cast %80 : vector<1x64x64xf32> to vector<64x64xf32>
    %cst_42 = arith.constant dense<0.000000e+00> : vector<10x64xf32>
    %82 = tpu.matmul %79, %81, %cst_42 {dimension_numbers = #tpu.dot_dimension_numbers<[1], [0], [0], [1], [0, 0, 1, 1], [], []>} : vector<10x64xf32>, vector<64x64xf32>, vector<10x64xf32> -> vector<10x64xf32>
    %c2_43 = arith.constant 2 : index
    %c0_44 = arith.constant 0 : index
    %c0_45 = arith.constant 0 : index
    %83 = vector.load %arg8[%c2_43, %c0_44, %c0_45] : memref<8x1x64xf32, #tpu.memory_space<vmem>>, vector<1x1x64xf32>
    %84 = vector.shape_cast %83 : vector<1x1x64xf32> to vector<1x64xf32>
    %85 = vector.broadcast %84 : vector<1x64xf32> to vector<10x64xf32>
    %86 = arith.addf %82, %85 : vector<10x64xf32>
    %87 = vector.extract_strided_slice %6 {offsets = [0, 192], sizes = [10, 64], strides = [1, 1]} : vector<10x1024xf32> to vector<10x64xf32>
    %88 = vector.extract_strided_slice %6 {offsets = [0, 704], sizes = [10, 64], strides = [1, 1]} : vector<10x1024xf32> to vector<10x64xf32>
    %89 = vector.extract_strided_slice %11 {offsets = [0, 192], sizes = [10, 64], strides = [1, 1]} : vector<10x512xf32> to vector<10x64xf32>
    %90 = tpu.transpose %89, [1, 0] : vector<10x64xf32> -> vector<64x10xf32>
    %cst_46 = arith.constant dense<0.000000e+00> : vector<10x10xf32>
    %91 = tpu.matmul %87, %90, %cst_46 {dimension_numbers = #tpu.dot_dimension_numbers<[1], [0], [0], [1], [0, 0, 1, 1], [], []>} : vector<10x64xf32>, vector<64x10xf32>, vector<10x10xf32> -> vector<10x10xf32>
    %cst_47 = arith.constant 1.250000e-01 : f32
    %92 = vector.broadcast %cst_47 : f32 to vector<10x10xf32>
    %93 = arith.mulf %91, %92 : vector<10x10xf32>
    %cst_48 = arith.constant dense<0xFF800000> : vector<10xf32>
    %94 = vector.multi_reduction <maximumf>, %93, %cst_48 [1] : vector<10x10xf32> to vector<10xf32>
    %95 = vector.shape_cast %94 : vector<10xf32> to vector<10x1xf32>
    %96 = vector.broadcast %95 : vector<10x1xf32> to vector<10x10xf32>
    %97 = arith.subf %93, %96 : vector<10x10xf32>
    %98 = math.exp %97 : vector<10x10xf32>
    %cst_49 = arith.constant dense<0.000000e+00> : vector<10xf32>
    %99 = vector.multi_reduction <add>, %98, %cst_49 [1] : vector<10x10xf32> to vector<10xf32>
    %100 = vector.shape_cast %99 : vector<10xf32> to vector<10x1xf32>
    %101 = tpu.reciprocal %100 {approx = true} : vector<10x1xf32> -> vector<10x1xf32>
    %102 = vector.broadcast %101 : vector<10x1xf32> to vector<10x10xf32>
    %103 = arith.mulf %98, %102 : vector<10x10xf32>
    %cst_50 = arith.constant dense<0.000000e+00> : vector<10x64xf32>
    %104 = tpu.matmul %103, %88, %cst_50 {dimension_numbers = #tpu.dot_dimension_numbers<[1], [0], [0], [1], [0, 0, 1, 1], [], []>} : vector<10x10xf32>, vector<10x64xf32>, vector<10x64xf32> -> vector<10x64xf32>
    %c3 = arith.constant 3 : index
    %c0_51 = arith.constant 0 : index
    %c0_52 = arith.constant 0 : index
    %105 = vector.load %arg7[%c3, %c0_51, %c0_52] : memref<8x64x64xf32, #tpu.memory_space<vmem>>, vector<1x64x64xf32>
    %106 = vector.shape_cast %105 : vector<1x64x64xf32> to vector<64x64xf32>
    %cst_53 = arith.constant dense<0.000000e+00> : vector<10x64xf32>
    %107 = tpu.matmul %104, %106, %cst_53 {dimension_numbers = #tpu.dot_dimension_numbers<[1], [0], [0], [1], [0, 0, 1, 1], [], []>} : vector<10x64xf32>, vector<64x64xf32>, vector<10x64xf32> -> vector<10x64xf32>
    %c3_54 = arith.constant 3 : index
    %c0_55 = arith.constant 0 : index
    %c0_56 = arith.constant 0 : index
    %108 = vector.load %arg8[%c3_54, %c0_55, %c0_56] : memref<8x1x64xf32, #tpu.memory_space<vmem>>, vector<1x1x64xf32>
    %109 = vector.shape_cast %108 : vector<1x1x64xf32> to vector<1x64xf32>
    %110 = vector.broadcast %109 : vector<1x64xf32> to vector<10x64xf32>
    %111 = arith.addf %107, %110 : vector<10x64xf32>
    %112 = vector.extract_strided_slice %6 {offsets = [0, 256], sizes = [10, 64], strides = [1, 1]} : vector<10x1024xf32> to vector<10x64xf32>
    %113 = vector.extract_strided_slice %6 {offsets = [0, 768], sizes = [10, 64], strides = [1, 1]} : vector<10x1024xf32> to vector<10x64xf32>
    %114 = vector.extract_strided_slice %11 {offsets = [0, 256], sizes = [10, 64], strides = [1, 1]} : vector<10x512xf32> to vector<10x64xf32>
    %115 = tpu.transpose %114, [1, 0] : vector<10x64xf32> -> vector<64x10xf32>
    %cst_57 = arith.constant dense<0.000000e+00> : vector<10x10xf32>
    %116 = tpu.matmul %112, %115, %cst_57 {dimension_numbers = #tpu.dot_dimension_numbers<[1], [0], [0], [1], [0, 0, 1, 1], [], []>} : vector<10x64xf32>, vector<64x10xf32>, vector<10x10xf32> -> vector<10x10xf32>
    %cst_58 = arith.constant 1.250000e-01 : f32
    %117 = vector.broadcast %cst_58 : f32 to vector<10x10xf32>
    %118 = arith.mulf %116, %117 : vector<10x10xf32>
    %cst_59 = arith.constant dense<0xFF800000> : vector<10xf32>
    %119 = vector.multi_reduction <maximumf>, %118, %cst_59 [1] : vector<10x10xf32> to vector<10xf32>
    %120 = vector.shape_cast %119 : vector<10xf32> to vector<10x1xf32>
    %121 = vector.broadcast %120 : vector<10x1xf32> to vector<10x10xf32>
    %122 = arith.subf %118, %121 : vector<10x10xf32>
    %123 = math.exp %122 : vector<10x10xf32>
    %cst_60 = arith.constant dense<0.000000e+00> : vector<10xf32>
    %124 = vector.multi_reduction <add>, %123, %cst_60 [1] : vector<10x10xf32> to vector<10xf32>
    %125 = vector.shape_cast %124 : vector<10xf32> to vector<10x1xf32>
    %126 = tpu.reciprocal %125 {approx = true} : vector<10x1xf32> -> vector<10x1xf32>
    %127 = vector.broadcast %126 : vector<10x1xf32> to vector<10x10xf32>
    %128 = arith.mulf %123, %127 : vector<10x10xf32>
    %cst_61 = arith.constant dense<0.000000e+00> : vector<10x64xf32>
    %129 = tpu.matmul %128, %113, %cst_61 {dimension_numbers = #tpu.dot_dimension_numbers<[1], [0], [0], [1], [0, 0, 1, 1], [], []>} : vector<10x10xf32>, vector<10x64xf32>, vector<10x64xf32> -> vector<10x64xf32>
    %c4 = arith.constant 4 : index
    %c0_62 = arith.constant 0 : index
    %c0_63 = arith.constant 0 : index
    %130 = vector.load %arg7[%c4, %c0_62, %c0_63] : memref<8x64x64xf32, #tpu.memory_space<vmem>>, vector<1x64x64xf32>
    %131 = vector.shape_cast %130 : vector<1x64x64xf32> to vector<64x64xf32>
    %cst_64 = arith.constant dense<0.000000e+00> : vector<10x64xf32>
    %132 = tpu.matmul %129, %131, %cst_64 {dimension_numbers = #tpu.dot_dimension_numbers<[1], [0], [0], [1], [0, 0, 1, 1], [], []>} : vector<10x64xf32>, vector<64x64xf32>, vector<10x64xf32> -> vector<10x64xf32>
    %c4_65 = arith.constant 4 : index
    %c0_66 = arith.constant 0 : index
    %c0_67 = arith.constant 0 : index
    %133 = vector.load %arg8[%c4_65, %c0_66, %c0_67] : memref<8x1x64xf32, #tpu.memory_space<vmem>>, vector<1x1x64xf32>
    %134 = vector.shape_cast %133 : vector<1x1x64xf32> to vector<1x64xf32>
    %135 = vector.broadcast %134 : vector<1x64xf32> to vector<10x64xf32>
    %136 = arith.addf %132, %135 : vector<10x64xf32>
    %137 = vector.extract_strided_slice %6 {offsets = [0, 320], sizes = [10, 64], strides = [1, 1]} : vector<10x1024xf32> to vector<10x64xf32>
    %138 = vector.extract_strided_slice %6 {offsets = [0, 832], sizes = [10, 64], strides = [1, 1]} : vector<10x1024xf32> to vector<10x64xf32>
    %139 = vector.extract_strided_slice %11 {offsets = [0, 320], sizes = [10, 64], strides = [1, 1]} : vector<10x512xf32> to vector<10x64xf32>
    %140 = tpu.transpose %139, [1, 0] : vector<10x64xf32> -> vector<64x10xf32>
    %cst_68 = arith.constant dense<0.000000e+00> : vector<10x10xf32>
    %141 = tpu.matmul %137, %140, %cst_68 {dimension_numbers = #tpu.dot_dimension_numbers<[1], [0], [0], [1], [0, 0, 1, 1], [], []>} : vector<10x64xf32>, vector<64x10xf32>, vector<10x10xf32> -> vector<10x10xf32>
    %cst_69 = arith.constant 1.250000e-01 : f32
    %142 = vector.broadcast %cst_69 : f32 to vector<10x10xf32>
    %143 = arith.mulf %141, %142 : vector<10x10xf32>
    %cst_70 = arith.constant dense<0xFF800000> : vector<10xf32>
    %144 = vector.multi_reduction <maximumf>, %143, %cst_70 [1] : vector<10x10xf32> to vector<10xf32>
    %145 = vector.shape_cast %144 : vector<10xf32> to vector<10x1xf32>
    %146 = vector.broadcast %145 : vector<10x1xf32> to vector<10x10xf32>
    %147 = arith.subf %143, %146 : vector<10x10xf32>
    %148 = math.exp %147 : vector<10x10xf32>
    %cst_71 = arith.constant dense<0.000000e+00> : vector<10xf32>
    %149 = vector.multi_reduction <add>, %148, %cst_71 [1] : vector<10x10xf32> to vector<10xf32>
    %150 = vector.shape_cast %149 : vector<10xf32> to vector<10x1xf32>
    %151 = tpu.reciprocal %150 {approx = true} : vector<10x1xf32> -> vector<10x1xf32>
    %152 = vector.broadcast %151 : vector<10x1xf32> to vector<10x10xf32>
    %153 = arith.mulf %148, %152 : vector<10x10xf32>
    %cst_72 = arith.constant dense<0.000000e+00> : vector<10x64xf32>
    %154 = tpu.matmul %153, %138, %cst_72 {dimension_numbers = #tpu.dot_dimension_numbers<[1], [0], [0], [1], [0, 0, 1, 1], [], []>} : vector<10x10xf32>, vector<10x64xf32>, vector<10x64xf32> -> vector<10x64xf32>
    %c5 = arith.constant 5 : index
    %c0_73 = arith.constant 0 : index
    %c0_74 = arith.constant 0 : index
    %155 = vector.load %arg7[%c5, %c0_73, %c0_74] : memref<8x64x64xf32, #tpu.memory_space<vmem>>, vector<1x64x64xf32>
    %156 = vector.shape_cast %155 : vector<1x64x64xf32> to vector<64x64xf32>
    %cst_75 = arith.constant dense<0.000000e+00> : vector<10x64xf32>
    %157 = tpu.matmul %154, %156, %cst_75 {dimension_numbers = #tpu.dot_dimension_numbers<[1], [0], [0], [1], [0, 0, 1, 1], [], []>} : vector<10x64xf32>, vector<64x64xf32>, vector<10x64xf32> -> vector<10x64xf32>
    %c5_76 = arith.constant 5 : index
    %c0_77 = arith.constant 0 : index
    %c0_78 = arith.constant 0 : index
    %158 = vector.load %arg8[%c5_76, %c0_77, %c0_78] : memref<8x1x64xf32, #tpu.memory_space<vmem>>, vector<1x1x64xf32>
    %159 = vector.shape_cast %158 : vector<1x1x64xf32> to vector<1x64xf32>
    %160 = vector.broadcast %159 : vector<1x64xf32> to vector<10x64xf32>
    %161 = arith.addf %157, %160 : vector<10x64xf32>
    %162 = vector.extract_strided_slice %6 {offsets = [0, 384], sizes = [10, 64], strides = [1, 1]} : vector<10x1024xf32> to vector<10x64xf32>
    %163 = vector.extract_strided_slice %6 {offsets = [0, 896], sizes = [10, 64], strides = [1, 1]} : vector<10x1024xf32> to vector<10x64xf32>
    %164 = vector.extract_strided_slice %11 {offsets = [0, 384], sizes = [10, 64], strides = [1, 1]} : vector<10x512xf32> to vector<10x64xf32>
    %165 = tpu.transpose %164, [1, 0] : vector<10x64xf32> -> vector<64x10xf32>
    %cst_79 = arith.constant dense<0.000000e+00> : vector<10x10xf32>
    %166 = tpu.matmul %162, %165, %cst_79 {dimension_numbers = #tpu.dot_dimension_numbers<[1], [0], [0], [1], [0, 0, 1, 1], [], []>} : vector<10x64xf32>, vector<64x10xf32>, vector<10x10xf32> -> vector<10x10xf32>
    %cst_80 = arith.constant 1.250000e-01 : f32
    %167 = vector.broadcast %cst_80 : f32 to vector<10x10xf32>
    %168 = arith.mulf %166, %167 : vector<10x10xf32>
    %cst_81 = arith.constant dense<0xFF800000> : vector<10xf32>
    %169 = vector.multi_reduction <maximumf>, %168, %cst_81 [1] : vector<10x10xf32> to vector<10xf32>
    %170 = vector.shape_cast %169 : vector<10xf32> to vector<10x1xf32>
    %171 = vector.broadcast %170 : vector<10x1xf32> to vector<10x10xf32>
    %172 = arith.subf %168, %171 : vector<10x10xf32>
    %173 = math.exp %172 : vector<10x10xf32>
    %cst_82 = arith.constant dense<0.000000e+00> : vector<10xf32>
    %174 = vector.multi_reduction <add>, %173, %cst_82 [1] : vector<10x10xf32> to vector<10xf32>
    %175 = vector.shape_cast %174 : vector<10xf32> to vector<10x1xf32>
    %176 = tpu.reciprocal %175 {approx = true} : vector<10x1xf32> -> vector<10x1xf32>
    %177 = vector.broadcast %176 : vector<10x1xf32> to vector<10x10xf32>
    %178 = arith.mulf %173, %177 : vector<10x10xf32>
    %cst_83 = arith.constant dense<0.000000e+00> : vector<10x64xf32>
    %179 = tpu.matmul %178, %163, %cst_83 {dimension_numbers = #tpu.dot_dimension_numbers<[1], [0], [0], [1], [0, 0, 1, 1], [], []>} : vector<10x10xf32>, vector<10x64xf32>, vector<10x64xf32> -> vector<10x64xf32>
    %c6 = arith.constant 6 : index
    %c0_84 = arith.constant 0 : index
    %c0_85 = arith.constant 0 : index
    %180 = vector.load %arg7[%c6, %c0_84, %c0_85] : memref<8x64x64xf32, #tpu.memory_space<vmem>>, vector<1x64x64xf32>
    %181 = vector.shape_cast %180 : vector<1x64x64xf32> to vector<64x64xf32>
    %cst_86 = arith.constant dense<0.000000e+00> : vector<10x64xf32>
    %182 = tpu.matmul %179, %181, %cst_86 {dimension_numbers = #tpu.dot_dimension_numbers<[1], [0], [0], [1], [0, 0, 1, 1], [], []>} : vector<10x64xf32>, vector<64x64xf32>, vector<10x64xf32> -> vector<10x64xf32>
    %c6_87 = arith.constant 6 : index
    %c0_88 = arith.constant 0 : index
    %c0_89 = arith.constant 0 : index
    %183 = vector.load %arg8[%c6_87, %c0_88, %c0_89] : memref<8x1x64xf32, #tpu.memory_space<vmem>>, vector<1x1x64xf32>
    %184 = vector.shape_cast %183 : vector<1x1x64xf32> to vector<1x64xf32>
    %185 = vector.broadcast %184 : vector<1x64xf32> to vector<10x64xf32>
    %186 = arith.addf %182, %185 : vector<10x64xf32>
    %187 = vector.extract_strided_slice %6 {offsets = [0, 448], sizes = [10, 64], strides = [1, 1]} : vector<10x1024xf32> to vector<10x64xf32>
    %188 = vector.extract_strided_slice %6 {offsets = [0, 960], sizes = [10, 64], strides = [1, 1]} : vector<10x1024xf32> to vector<10x64xf32>
    %189 = vector.extract_strided_slice %11 {offsets = [0, 448], sizes = [10, 64], strides = [1, 1]} : vector<10x512xf32> to vector<10x64xf32>
    %190 = tpu.transpose %189, [1, 0] : vector<10x64xf32> -> vector<64x10xf32>
    %cst_90 = arith.constant dense<0.000000e+00> : vector<10x10xf32>
    %191 = tpu.matmul %187, %190, %cst_90 {dimension_numbers = #tpu.dot_dimension_numbers<[1], [0], [0], [1], [0, 0, 1, 1], [], []>} : vector<10x64xf32>, vector<64x10xf32>, vector<10x10xf32> -> vector<10x10xf32>
    %cst_91 = arith.constant 1.250000e-01 : f32
    %192 = vector.broadcast %cst_91 : f32 to vector<10x10xf32>
    %193 = arith.mulf %191, %192 : vector<10x10xf32>
    %cst_92 = arith.constant dense<0xFF800000> : vector<10xf32>
    %194 = vector.multi_reduction <maximumf>, %193, %cst_92 [1] : vector<10x10xf32> to vector<10xf32>
    %195 = vector.shape_cast %194 : vector<10xf32> to vector<10x1xf32>
    %196 = vector.broadcast %195 : vector<10x1xf32> to vector<10x10xf32>
    %197 = arith.subf %193, %196 : vector<10x10xf32>
    %198 = math.exp %197 : vector<10x10xf32>
    %cst_93 = arith.constant dense<0.000000e+00> : vector<10xf32>
    %199 = vector.multi_reduction <add>, %198, %cst_93 [1] : vector<10x10xf32> to vector<10xf32>
    %200 = vector.shape_cast %199 : vector<10xf32> to vector<10x1xf32>
    %201 = tpu.reciprocal %200 {approx = true} : vector<10x1xf32> -> vector<10x1xf32>
    %202 = vector.broadcast %201 : vector<10x1xf32> to vector<10x10xf32>
    %203 = arith.mulf %198, %202 : vector<10x10xf32>
    %cst_94 = arith.constant dense<0.000000e+00> : vector<10x64xf32>
    %204 = tpu.matmul %203, %188, %cst_94 {dimension_numbers = #tpu.dot_dimension_numbers<[1], [0], [0], [1], [0, 0, 1, 1], [], []>} : vector<10x10xf32>, vector<10x64xf32>, vector<10x64xf32> -> vector<10x64xf32>
    %c7 = arith.constant 7 : index
    %c0_95 = arith.constant 0 : index
    %c0_96 = arith.constant 0 : index
    %205 = vector.load %arg7[%c7, %c0_95, %c0_96] : memref<8x64x64xf32, #tpu.memory_space<vmem>>, vector<1x64x64xf32>
    %206 = vector.shape_cast %205 : vector<1x64x64xf32> to vector<64x64xf32>
    %cst_97 = arith.constant dense<0.000000e+00> : vector<10x64xf32>
    %207 = tpu.matmul %204, %206, %cst_97 {dimension_numbers = #tpu.dot_dimension_numbers<[1], [0], [0], [1], [0, 0, 1, 1], [], []>} : vector<10x64xf32>, vector<64x64xf32>, vector<10x64xf32> -> vector<10x64xf32>
    %c7_98 = arith.constant 7 : index
    %c0_99 = arith.constant 0 : index
    %c0_100 = arith.constant 0 : index
    %208 = vector.load %arg8[%c7_98, %c0_99, %c0_100] : memref<8x1x64xf32, #tpu.memory_space<vmem>>, vector<1x1x64xf32>
    %209 = vector.shape_cast %208 : vector<1x1x64xf32> to vector<1x64xf32>
    %210 = vector.broadcast %209 : vector<1x64xf32> to vector<10x64xf32>
    %211 = arith.addf %207, %210 : vector<10x64xf32>
    %212 = tpu.concatenate %36, %61, %86, %111, %136, %161, %186, %211 in 1 : vector<10x64xf32>, vector<10x64xf32>, vector<10x64xf32>, vector<10x64xf32>, vector<10x64xf32>, vector<10x64xf32>, vector<10x64xf32>, vector<10x64xf32> -> vector<10x512xf32>
    %c0_101 = arith.constant 0 : index
    %c0_102 = arith.constant 0 : index
    %213 = vector.load %arg9[%c0_101, %c0_102] : memref<512x64xf32, #tpu.memory_space<vmem>>, vector<512x64xf32>
    %cst_103 = arith.constant dense<0.000000e+00> : vector<10x64xf32>
    %214 = tpu.matmul %212, %213, %cst_103 {dimension_numbers = #tpu.dot_dimension_numbers<[1], [0], [0], [1], [0, 0, 1, 1], [], []>} : vector<10x512xf32>, vector<512x64xf32>, vector<10x64xf32> -> vector<10x64xf32>
    %c0_104 = arith.constant 0 : index
    %c0_105 = arith.constant 0 : index
    %215 = vector.load %arg10[%c0_104, %c0_105] : memref<1x64xf32, #tpu.memory_space<vmem>>, vector<1x64xf32>
    %216 = vector.broadcast %215 : vector<1x64xf32> to vector<10x64xf32>
    %217 = arith.addf %214, %216 : vector<10x64xf32>
    %c0_106 = arith.constant 0 : index
    %c0_107 = arith.constant 0 : index
    %218 = vector.load %arg11[%c0_106, %c0_107] : memref<10x64xf32, #tpu.memory_space<vmem>>, vector<10x64xf32>
    tpu.vector_store %arg11[%c0_106, %c0_107], %217 {strides = array<i32>} : memref<10x64xf32, #tpu.memory_space<vmem>>, vector<10x64xf32>,
    return
  }
  func.func @transform_0(%arg0: i32) -> (i32, i32) {
    %c0_i32 = arith.constant 0 : i32
    %c0_i32_0 = arith.constant 0 : i32
    %c0_i32_1 = arith.constant 0 : i32
    return %c0_i32, %c0_i32_0 : i32, i32
  }
  func.func @transform_1(%arg0: i32) -> (i32, i32) {
    %c0_i32 = arith.constant 0 : i32
    %c0_i32_0 = arith.constant 0 : i32
    %c0_i32_1 = arith.constant 0 : i32
    return %c0_i32, %c0_i32_0 : i32, i32
  }
  func.func @transform_2(%arg0: i32) -> (i32, i32) {
    %c0_i32 = arith.constant 0 : i32
    %c0_i32_0 = arith.constant 0 : i32
    %c0_i32_1 = arith.constant 0 : i32
    return %c0_i32, %c0_i32_0 : i32, i32
  }
  func.func @transform_3(%arg0: i32) -> (i32, i32) {
    %c0_i32 = arith.constant 0 : i32
    %c0_i32_0 = arith.constant 0 : i32
    %c0_i32_1 = arith.constant 0 : i32
    return %c0_i32, %c0_i32_0 : i32, i32
  }
  func.func @transform_4(%arg0: i32) -> (i32, i32) {
    %c0_i32 = arith.constant 0 : i32
    %c0_i32_0 = arith.constant 0 : i32
    %c0_i32_1 = arith.constant 0 : i32
    return %c0_i32, %c0_i32_0 : i32, i32
  }
  func.func @transform_5(%arg0: i32) -> (i32, i32) {
    %c0_i32 = arith.constant 0 : i32
    %c0_i32_0 = arith.constant 0 : i32
    %c0_i32_1 = arith.constant 0 : i32
    return %c0_i32, %c0_i32_0 : i32, i32
  }
  func.func @transform_6(%arg0: i32) -> (i32, i32, i32) {
    %c0_i32 = arith.constant 0 : i32
    %c0_i32_0 = arith.constant 0 : i32
    %c0_i32_1 = arith.constant 0 : i32
    %c0_i32_2 = arith.constant 0 : i32
    return %c0_i32, %c0_i32_0, %c0_i32_1 : i32, i32, i32
  }
  func.func @transform_7(%arg0: i32) -> (i32, i32, i32) {
    %c0_i32 = arith.constant 0 : i32
    %c0_i32_0 = arith.constant 0 : i32
    %c0_i32_1 = arith.constant 0 : i32
    %c0_i32_2 = arith.constant 0 : i32
    return %c0_i32, %c0_i32_0, %c0_i32_1 : i32, i32, i32
  }
  func.func @transform_8(%arg0: i32) -> (i32, i32) {
    %c0_i32 = arith.constant 0 : i32
    %c0_i32_0 = arith.constant 0 : i32
    %c0_i32_1 = arith.constant 0 : i32
    return %c0_i32, %c0_i32_0 : i32, i32
  }
  func.func @transform_9(%arg0: i32) -> (i32, i32) {
    %c0_i32 = arith.constant 0 : i32
    %c0_i32_0 = arith.constant 0 : i32
    %c0_i32_1 = arith.constant 0 : i32
    return %c0_i32, %c0_i32_0 : i32, i32
  }
  func.func @transform_10(%arg0: i32) -> (i32, i32) {
    %c0_i32 = arith.constant 0 : i32
    %c0_i32_0 = arith.constant 0 : i32
    %c0_i32_1 = arith.constant 0 : i32
    return %c0_i32, %c0_i32_0 : i32, i32
  }
}

</mosaic_0001>

<bundles_post_ra>
// kernel: tpu_custom_call.1
= control target key start
LH: loop header
LB: loop body
LE: loop exit
PB: predicated region body
PF: predicated region fallthrough
CT: control target
= control target key end

     0   :  { %15 = vsyncpa [#allocation3], 0  ;;  %s7568_s0 = inlined_call_operand.hbm [shape: f32[10,512], index: 0, kind: input, shape index: {}]   ;;  %s7569_s1 = inlined_call_operand.hbm [shape: f32[10,512], index: 1, kind: input, shape index: {}]   ;;  %s7570_s2 = inlined_call_operand.hbm [shape: f32[512,1024], index: 2, kind: input, shape index: {}]   ;;  %s7571_s3 = inlined_call_operand.hbm [shape: f32[1,1024], index: 3, kind: input, shape index: {}]   ;;  %s7572_s4 = inlined_call_operand.hbm [shape: f32[512,512], index: 4, kind: input, shape index: {}]   ;;  %s7573_s5 = inlined_call_operand.hbm [shape: f32[1,512], index: 5, kind: input, shape index: {}]   ;;  %s7574_s6 = inlined_call_operand.hbm [shape: f32[8,64,64], index: 6, kind: input, shape index: {}]   ;;  %s7575_s7 = inlined_call_operand.hbm [shape: f32[8,1,64], index: 7, kind: input, shape index: {}]   ;;  %s7576_s8 = inlined_call_operand.vmem [shape: f32[512,64], index: 8, kind: input, shape index: {}]   ;;  %s7577_s9 = inlined_call_operand.hbm [shape: f32[1,64], index: 9, kind: input, shape index: {}]   ;;  %s7578_s10 = inlined_call_operand.hbm [shape: f32[10,64], index: 10, kind: output, shape index: {}]  }
   0x1   :  { %16 = vsyncpa [#allocation6], 0 }
   0x2   :  { %17 = vsyncpa [#allocation9], 0 }
   0x3   :  { %18 = vsyncpa [#allocation12], 0 }
   0x4   :  { %19 = vsyncpa [#allocation15], 0 }
   0x5   :  { %20 = vsyncpa [#allocation4], 0  ;;  %s6648_s13 = smov [#allocation5]   ;;  %s6649_s15 = smov [#allocation8]  }
   0x6   :  { %s38_s14 = sshll.u32 %s6648_s13, 4  ;;  %s63_s16 = sshll.u32 %s6649_s15, 4  ;;  %s39_s14 = int_to_ptr.vmem [resolvable:$true] %s38_s14  ;;  %s64_s16 = int_to_ptr.vmem [resolvable:$true] %s63_s16 }
   0x7   :  { %s6416_s19 = scalar_lea.hbm %s7569_s1, 1024 }
   0x8   :  { %p6417_p0 = scmp.ne.s32.totalorder %s7569_s1, %s6416_s19  ;;  %p6420_p1 = scmp.lt.u32.totalorder %s6416_s19, %s7569_s1 }
   0xa   :  { %p6422_p2 = pnand %p6420_p1, %p6417_p0 }
   0xc   :  { %6425 = shalt.err (!%p6422_p2)
}
   0xd   :  { %s6426_s24 = scalar_lea.vmem %s39_s14, 1024  ;;  %p6431_p4 = scmp.lt.s32.totalorder %s39_s14, %s39_s14 }
   0xe   :  { %p6427_p3 = scmp.ne.s32.totalorder %s39_s14, %s6426_s24  ;;  %p6432_p5 = scmp.lt.s32.totalorder %s6426_s24, %s6426_s24 }
  0x10   :  { %p6433_p6 = por %p6432_p5, %p6431_p4 }
  0x12   :  { %p6434_p7 = pnand %p6433_p6, %p6427_p3 }
  0x14   :  { %6437 = shalt.err (!%p6434_p7)
}
  0x15   :  { %s6650_s25 = smov 512   ;;  %s6651_s26 = smov 32  }
  0x16   :  { %44 = dma.hbm_to_vmem [thread:$0]  %s7569_s1, 1024, %s39_s14, [#allocation6], %s6650_s25, %s6650_s25, %s6651_s26  }
  0x17   :  { %s6438_s11 = scalar_lea.hbm %s7571_s3, 128 }
  0x18   :  { %p6439_p8 = scmp.ne.s32.totalorder %s7571_s3, %s6438_s11  ;;  %p6442_p9 = scmp.lt.u32.totalorder %s6438_s11, %s7571_s3 }
  0x1a   :  { %p6444_p10 = pnand %p6442_p9, %p6439_p8 }
  0x1c   :  { %6447 = shalt.err (!%p6444_p10)
}
  0x1d   :  { %s6448_s18 = scalar_lea.vmem %s64_s16, 128  ;;  %p6453_p12 = scmp.lt.s32.totalorder %s64_s16, %s64_s16 }
  0x1e   :  { %p6449_p11 = scmp.ne.s32.totalorder %s64_s16, %s6448_s18  ;;  %p6454_p13 = scmp.lt.s32.totalorder %s6448_s18, %s6448_s18 }
  0x20   :  { %p6455_p0 = por %p6454_p13, %p6453_p12 }
  0x22   :  { %p6456_p1 = pnand %p6455_p0, %p6449_p11 }
  0x24   :  { %6459 = shalt.err (!%p6456_p1)
}
  0x25   :  { %66 = dma.hbm_to_vmem [thread:$0]  %s7571_s3, 128, %s64_s16, [#allocation9]  }
  0x26   :  { %s6652_s19 = smov [#allocation11]   ;;  %s6653_s21 = smov [#allocation14]  }
  0x27   :  { %s85_s20 = sshll.u32 %s6652_s19, 4  ;;  %s106_s22 = sshll.u32 %s6653_s21, 4  ;;  %s86_s20 = int_to_ptr.vmem [resolvable:$true] %s85_s20  ;;  %s6749_s22 = int_to_ptr.vmem [resolvable:$true] %s106_s22 }
  0x28   :  { %s6460_s27 = scalar_lea.hbm %s7573_s5, 64 }
  0x29   :  { %p6461_p2 = scmp.ne.s32.totalorder %s7573_s5, %s6460_s27  ;;  %p6464_p3 = scmp.lt.u32.totalorder %s6460_s27, %s7573_s5 }
  0x2b   :  { %p6466_p4 = pnand %p6464_p3, %p6461_p2 }
  0x2d   :  { %6469 = shalt.err (!%p6466_p4)
}
  0x2e   :  { %s6470_s3 = scalar_lea.vmem %s86_s20, 64  ;;  %p6475_p6 = scmp.lt.s32.totalorder %s86_s20, %s86_s20 }
  0x2f   :  { %p6471_p5 = scmp.ne.s32.totalorder %s86_s20, %s6470_s3  ;;  %p6476_p7 = scmp.lt.s32.totalorder %s6470_s3, %s6470_s3 }
  0x31   :  { %p6477_p8 = por %p6476_p7, %p6475_p6 }
  0x33   :  { %p6478_p9 = pnand %p6477_p8, %p6471_p5 }
  0x35   :  { %6481 = shalt.err (!%p6478_p9)
}
  0x36   :  { %88 = dma.hbm_to_vmem [thread:$0]  %s7573_s5, 64, %s86_s20, [#allocation12]  }
  0x37   :  { %s6482_s17 = scalar_lea.hbm %s7575_s7, 128 }
  0x38   :  { %p6483_p10 = scmp.ne.s32.totalorder %s7575_s7, %s6482_s17  ;;  %p6486_p11 = scmp.lt.u32.totalorder %s6482_s17, %s7575_s7 }
  0x3a   :  { %p6488_p12 = pnand %p6486_p11, %p6483_p10 }
  0x3c   :  { %6491 = shalt.err (!%p6488_p12)
}
  0x3d   :  { %s6492_s21 = scalar_lea.vmem %s6749_s22, 128  ;;  %p6497_p0 = scmp.lt.s32.totalorder %s6749_s22, %s6749_s22 }
  0x3e   :  { %p6493_p13 = scmp.ne.s32.totalorder %s6749_s22, %s6492_s21  ;;  %p6498_p1 = scmp.lt.s32.totalorder %s6492_s21, %s6492_s21 }
  0x40   :  { %p6499_p2 = por %p6498_p1, %p6497_p0 }
  0x42   :  { %p6500_p3 = pnand %p6499_p2, %p6493_p13 }
  0x44   :  { %6503 = shalt.err (!%p6500_p3)
}
  0x45   :  { %s6654_s5 = smov 16   ;;  %s6655_s20 = smov 1  }
  0x46   :  { %112 = dma.hbm_to_vmem [thread:$0]  %s7575_s7, 128, %s6749_s22, [#allocation15], %s6654_s5, %s6654_s5, %s6655_s20  }
  0x47   :  { %s6656_s27 = smov [#allocation2]   ;;  %s6657_s29 = smov [#allocation7]  }
  0x48   :  { %s26_s28 = sshll.u32 %s6656_s27, 4  ;;  %s50_s30 = sshll.u32 %s6657_s29, 4  ;;  %s27_s28 = int_to_ptr.vmem [resolvable:$true] %s26_s28  ;;  %s6780_s30 = int_to_ptr.vmem [resolvable:$true] %s50_s30 }
  0x49   :  { %s6504_s16 = scalar_lea.hbm %s7568_s0, 1024 }
  0x4a   :  { %p6505_p4 = scmp.ne.s32.totalorder %s7568_s0, %s6504_s16  ;;  %p6508_p5 = scmp.lt.u32.totalorder %s6504_s16, %s7568_s0 }
  0x4c   :  { %p6510_p6 = pnand %p6508_p5, %p6505_p4 }
  0x4e   :  { %6513 = shalt.err (!%p6510_p6)
}
  0x4f   :  { %s6514_s7 = scalar_lea.vmem %s27_s28, 1024  ;;  %p6519_p8 = scmp.lt.s32.totalorder %s27_s28, %s27_s28 }
  0x50   :  { %p6515_p7 = scmp.ne.s32.totalorder %s27_s28, %s6514_s7  ;;  %p6520_p9 = scmp.lt.s32.totalorder %s6514_s7, %s6514_s7 }
  0x52   :  { %p6521_p10 = por %p6520_p9, %p6519_p8 }
  0x54   :  { %p6522_p11 = pnand %p6521_p10, %p6515_p7 }
  0x56   :  { %6525 = shalt.err (!%p6522_p11)
}
  0x57   :  { %32 = dma.hbm_to_vmem [thread:$0]  %s7568_s0, 1024, %s27_s28, [#allocation3], %s6650_s25, %s6650_s25, %s6651_s26  }
  0x58   :  { %s6526_s19 = scalar_lea.hbm %s7570_s2, 65536 }
  0x59   :  { %p6527_p12 = scmp.ne.s32.totalorder %s7570_s2, %s6526_s19  ;;  %p6530_p13 = scmp.lt.u32.totalorder %s6526_s19, %s7570_s2 }
  0x5b   :  { %p6532_p0 = pnand %p6530_p13, %p6527_p12 }
  0x5d   :  { %6535 = shalt.err (!%p6532_p0)
}
  0x5e   :  { %s6536_s24 = scalar_lea.vmem %s6780_s30, 65536  ;;  %p6541_p2 = scmp.lt.s32.totalorder %s6780_s30, %s6780_s30 }
  0x5f   :  { %p6537_p1 = scmp.ne.s32.totalorder %s6780_s30, %s6536_s24  ;;  %p6542_p3 = scmp.lt.s32.totalorder %s6536_s24, %s6536_s24 }
  0x61   :  { %p6543_p4 = por %p6542_p3, %p6541_p2 }
  0x63   :  { %p6544_p5 = pnand %p6543_p4, %p6537_p1 }
  0x65   :  { %6547 = shalt.err (!%p6544_p5)
}
  0x66   :  { %s6658_s0 = smov 1024   ;;  %s6659_s27 = smov 64  }
  0x67   :  { %56 = dma.hbm_to_vmem [thread:$0]  %s7570_s2, 65536, %s6780_s30, [#allocation6], %s6658_s0, %s6658_s0, %s6659_s27  }
  0x68   :  { %s6660_s11 = smov [#allocation10]   ;;  %s6661_s16 = smov [#allocation13]  }
  0x69   :  { %s72_s3 = sshll.u32 %s6660_s11, 4  ;;  %s94_s12 = sshll.u32 %s6661_s16, 4  ;;  %s73_s3 = int_to_ptr.vmem [resolvable:$true] %s72_s3  ;;  %s6815_s12 = int_to_ptr.vmem [resolvable:$true] %s94_s12 }
  0x6a   :  { %s6548_s17 = scalar_lea.hbm %s7572_s4, 32768 }
  0x6b   :  { %p6549_p6 = scmp.ne.s32.totalorder %s7572_s4, %s6548_s17  ;;  %p6552_p7 = scmp.lt.u32.totalorder %s6548_s17, %s7572_s4 }
  0x6d   :  { %p6554_p8 = pnand %p6552_p7, %p6549_p6 }
  0x6f   :  { %6557 = shalt.err (!%p6554_p8)
}
  0x70   :  { %s6558_s2 = scalar_lea.vmem %s73_s3, 32768  ;;  %p6563_p10 = scmp.lt.s32.totalorder %s73_s3, %s73_s3 }
  0x71   :  { %p6559_p9 = scmp.ne.s32.totalorder %s73_s3, %s6558_s2  ;;  %p6564_p11 = scmp.lt.s32.totalorder %s6558_s2, %s6558_s2 }
  0x73   :  { %p6565_p12 = por %p6564_p11, %p6563_p10 }
  0x75   :  { %p6566_p13 = pnand %p6565_p12, %p6559_p9 }
  0x77   :  { %6569 = shalt.err (!%p6566_p13)
}
  0x78   :  { %78 = dma.hbm_to_vmem [thread:$0]  %s7572_s4, 32768, %s73_s3, [#allocation9], %s6650_s25, %s6650_s25, %s6651_s26  }
  0x79   :  { %s6570_s5 = scalar_lea.hbm %s7574_s6, 8192 }
  0x7a   :  { %p6571_p0 = scmp.ne.s32.totalorder %s7574_s6, %s6570_s5  ;;  %p6574_p1 = scmp.lt.u32.totalorder %s6570_s5, %s7574_s6 }
  0x7c   :  { %p6576_p2 = pnand %p6574_p1, %p6571_p0 }
  0x7e   :  { %6579 = shalt.err (!%p6576_p2)
}
  0x7f   :  { %s6580_s28 = scalar_lea.vmem %s6815_s12, 8192  ;;  %p6585_p4 = scmp.lt.s32.totalorder %s6815_s12, %s6815_s12 }
  0x80   :  { %p6581_p3 = scmp.ne.s32.totalorder %s6815_s12, %s6580_s28  ;;  %p6586_p5 = scmp.lt.s32.totalorder %s6580_s28, %s6580_s28 }
  0x82   :  { %p6587_p6 = por %p6586_p5, %p6585_p4 }
  0x84   :  { %p6588_p7 = pnand %p6587_p6, %p6581_p3 }
  0x86   :  { %6591 = shalt.err (!%p6588_p7)
}
  0x87   :  { %s6662_s4 = smov 128   ;;  %s6663_s25 = smov 8  }
  0x88   :  { %100 = dma.hbm_to_vmem [thread:$0]  %s7574_s6, 8192, %s6815_s12, [#allocation12], %s6662_s4, %s6662_s4, %s6663_s25  }
  0x89   :  { %s6664_s11 = smov [#allocation16]   ;;  %s6592_s15 = scalar_lea.hbm %s7577_s9, 16 }
  0x8a   :  { %s121_s3 = sshll.u32 %s6664_s11, 4  ;;  %p6593_p8 = scmp.ne.s32.totalorder %s7577_s9, %s6592_s15  ;;  %s122_s3 = int_to_ptr.vmem [resolvable:$true] %s121_s3 }
  0x8b   :  { %p6596_p9 = scmp.lt.u32.totalorder %s6592_s15, %s7577_s9 }
  0x8d   :  { %p6598_p10 = pnand %p6596_p9, %p6593_p8 }
  0x8f   :  { %6601 = shalt.err (!%p6598_p10)
}
  0x90   :  { %s6602_s1 = scalar_lea.vmem %s122_s3, 16  ;;  %s6606_s6 = scalar_lea.vmem %s122_s3, 32 }
  0x91   :  { %p6603_p11 = scmp.ne.s32.totalorder %s122_s3, %s6602_s1  ;;  %p6607_p12 = scmp.lt.s32.totalorder %s122_s3, %s122_s3 }
  0x92   :  { %p6608_p13 = scmp.lt.s32.totalorder %s6606_s6, %s6602_s1 }
  0x94   :  { %p6609_p0 = por %p6608_p13, %p6607_p12 }
  0x96   :  { %p6610_p1 = pnand %p6609_p0, %p6603_p11 }
  0x98   :  { %6613 = shalt.err (!%p6610_p1)
}
  0x99   :  { %124 = dma.hbm_to_vmem [thread:$0]  %s7577_s9, 16, %s122_s3, [#allocation15]  }
  0x9a   :  { %6636 = dma.done.wait [#allocation3], 1024  }
  0x9b   :  { %6637 = vsyncadd [#allocation3], 4294966272 }
  0x9c   :  { %6638 = dma.done.wait [#allocation6], 66560  }
  0x9d   :  { %6639 = vsyncadd [#allocation6], 4294900736 }
  0x9e   :  { %6640 = dma.done.wait [#allocation9], 32896  }
  0x9f   :  { %6641 = vsyncadd [#allocation9], 4294934400 }
  0xa0   :  { %6642 = dma.done.wait [#allocation12], 8256  }
  0xa1   :  { %6643 = vsyncadd [#allocation12], 4294959040 }
  0xa2   :  { %6644 = dma.done.wait [#allocation15], 144  }
  0xa3   :  { %6645 = vsyncadd [#allocation15], 4294967152  ;;  %v169_v0 = vld [vmem:[#allocation7 + $0x8] sm:$0xff]  ;;  %v168_v2 = vld [vmem:[#allocation7] sm:$0xff]  ;;  %vm1924_vm0 = vcmask 523264   ;;  %vm2044_vm1 = vcmask 1041408  }
  0xa4   :  { %v177_v1 = vld [vmem:[#allocation7 + $0x48] sm:$0xff]  ;;  %v176_v4 = vld [vmem:[#allocation7 + $0x40] sm:$0xff]  ;;  %vm6987_vm2 = vmpackc.low %vm1924_vm0, %vm1924_vm0  ;;  %vm6665_vm3 = vmmov 1   ;;  %vm2018_vm5 = vcmask 74752   ;;  %vm2014_vm6 = vcmask 80896   ;;  %vm4568_vm7 = vcmask 517120  }
  0xa5   :  { %v5156_v3 = vpack.c.bf16 %v177_v1, %v169_v0  ;;  %v185_v5 = vld [vmem:[#allocation7 + $0x88] sm:$0xff]  ;;  %v5158_v7 = vpack.c.bf16 %v176_v4, %v168_v2  ;;  %v184_v9 = vld [vmem:[#allocation7 + $0x80] sm:$0xff]  ;;  %vm6995_vm4 = vmpackc.low %vm2044_vm1, %vm6665_vm3 }
  0xa6   :  { %v193_v6 = vld [vmem:[#allocation7 + $0xc8] sm:$0xff]  ;;  %v192_v10 = vld [vmem:[#allocation7 + $0xc0] sm:$0xff] }
  0xa7   :  { %v5160_v8 = vpack.c.bf16 %v193_v6, %v185_v5  ;;  %v201_v11 = vld [vmem:[#allocation7 + $0x108] sm:$0xff]  ;;  %5157 = vmatprep.subr.bf16.mxu0 %v5156_v3  ;;  %v5162_v13 = vpack.c.bf16 %v192_v10, %v184_v9  ;;  %v200_v15 = vld [vmem:[#allocation7 + $0x100] sm:$0xff] }
  0xa8   :  { %v209_v12 = vld [vmem:[#allocation7 + $0x148] sm:$0xff]  ;;  %5159 = vmatpush1.bf16.msra.mxu0 %v5158_v7  ;;  %v208_v16 = vld [vmem:[#allocation7 + $0x140] sm:$0xff] }
  0xa9   :  { %5161 = vmatprep.subr.bf16.mxu0 %v5160_v8  ;;  %v5164_v14 = vpack.c.bf16 %v209_v12, %v201_v11  ;;  %v217_v17 = vld [vmem:[#allocation7 + $0x188] sm:$0xff]  ;;  %v5166_v19 = vpack.c.bf16 %v208_v16, %v200_v15  ;;  %v216_v21 = vld [vmem:[#allocation7 + $0x180] sm:$0xff] }
  0xaa   :  { %v225_v18 = vld [vmem:[#allocation7 + $0x1c8] sm:$0xff]  ;;  %v224_v22 = vld [vmem:[#allocation7 + $0x1c0] sm:$0xff] }
  0xab   :  { %v5168_v20 = vpack.c.bf16 %v225_v18, %v217_v17  ;;  %v233_v23 = vld [vmem:[#allocation7 + $0x208] sm:$0xff]  ;;  %v5170_v25 = vpack.c.bf16 %v224_v22, %v216_v21  ;;  %v232_v27 = vld [vmem:[#allocation7 + $0x200] sm:$0xff] }
  0xac   :  { %5163 = vmatpush1.bf16.msra.mxu0 %v5162_v13  ;;  %v241_v24 = vld [vmem:[#allocation7 + $0x248] sm:$0xff]  ;;  %v240_v28 = vld [vmem:[#allocation7 + $0x240] sm:$0xff] }
  0xad   :  { %5165 = vmatprep.subr.bf16.mxu0 %v5164_v14  ;;  %v5172_v26 = vpack.c.bf16 %v241_v24, %v233_v23  ;;  %v249_v29 = vld [vmem:[#allocation7 + $0x288] sm:$0xff]  ;;  %v5174_v31 = vpack.c.bf16 %v240_v28, %v232_v27  ;;  %v248_v33 = vld [vmem:[#allocation7 + $0x280] sm:$0xff] }
  0xae   :  { %v257_v30 = vld [vmem:[#allocation7 + $0x2c8] sm:$0xff]  ;;  %v256_v34 = vld [vmem:[#allocation7 + $0x2c0] sm:$0xff] }
  0xaf   :  { %v5176_v32 = vpack.c.bf16 %v257_v30, %v249_v29  ;;  %v265_v35 = vld [vmem:[#allocation7 + $0x308] sm:$0xff]  ;;  %v5178_v37 = vpack.c.bf16 %v256_v34, %v248_v33  ;;  %v264_v39 = vld [vmem:[#allocation7 + $0x300] sm:$0xff] }
  0xb0   :  { %5167 = vmatpush1.bf16.msra.mxu0 %v5166_v19  ;;  %v273_v36 = vld [vmem:[#allocation7 + $0x348] sm:$0xff]  ;;  %v272_v40 = vld [vmem:[#allocation7 + $0x340] sm:$0xff] }
  0xb1   :  { %5169 = vmatprep.subr.bf16.mxu0 %v5168_v20  ;;  %v5180_v38 = vpack.c.bf16 %v273_v36, %v265_v35  ;;  %v6864_v41 = vld [vmem:[#allocation2 + $0x8] sm:$0xff]  ;;  %v5182_v44 = vpack.c.bf16 %v272_v40, %v264_v39  ;;  %v280_v46 = vld [vmem:[#allocation7 + $0x380] sm:$0xff] }
  0xb2   :  { %v281_v42 = vld [vmem:[#allocation7 + $0x388] sm:$0xff]  ;;  %786 = vmatprep.mubr.f32.mxu0 %v6864_v41  ;;  %940 = vmatprep.mubr.f32.mxu1 %v6864_v41  ;;  %v288_v47 = vld [vmem:[#allocation7 + $0x3c0] sm:$0xff] }
  0xb3   :  { %v289_v43 = vld [vmem:[#allocation7 + $0x3c8] sm:$0xff]  ;;  %v5186_v50 = vpack.c.bf16 %v288_v47, %v280_v46  ;;  %v296_v52 = vld [vmem:[#allocation7 + $0x400] sm:$0xff] }
  0xb4   :  { %5171 = vmatpush1.bf16.msra.mxu0 %v5170_v25  ;;  %v5184_v45 = vpack.c.bf16 %v289_v43, %v281_v42  ;;  %v297_v48 = vld [vmem:[#allocation7 + $0x408] sm:$0xff]  ;;  %v304_v53 = vld [vmem:[#allocation7 + $0x440] sm:$0xff] }
  0xb5   :  { %5173 = vmatprep.subr.bf16.mxu0 %v5172_v26  ;;  %v305_v49 = vld [vmem:[#allocation7 + $0x448] sm:$0xff]  ;;  %v5190_v56 = vpack.c.bf16 %v304_v53, %v296_v52  ;;  %v312_v58 = vld [vmem:[#allocation7 + $0x480] sm:$0xff] }
  0xb6   :  { %v5188_v51 = vpack.c.bf16 %v305_v49, %v297_v48  ;;  %v313_v54 = vld [vmem:[#allocation7 + $0x488] sm:$0xff]  ;;  %v320_v59 = vld [vmem:[#allocation7 + $0x4c0] sm:$0xff] }
  0xb7   :  { %v321_v55 = vld [vmem:[#allocation7 + $0x4c8] sm:$0xff]  ;;  %v5194_v62 = vpack.c.bf16 %v320_v59, %v312_v58  ;;  %v328_v0 = vld [vmem:[#allocation7 + $0x500] sm:$0xff] }
  0xb8   :  { %5175 = vmatpush1.bf16.msra.mxu0 %v5174_v31  ;;  %v5192_v57 = vpack.c.bf16 %v321_v55, %v313_v54  ;;  %v329_v60 = vld [vmem:[#allocation7 + $0x508] sm:$0xff]  ;;  %v336_v1 = vld [vmem:[#allocation7 + $0x540] sm:$0xff]  ;;  %v6876_v54 = vld [vmem:[#allocation2 + $0x18] sm:$0xff] }
  0xb9   :  { %5177 = vmatprep.subr.bf16.mxu0 %v5176_v32  ;;  %v337_v61 = vld [vmem:[#allocation7 + $0x548] sm:$0xff]  ;;  %v5198_v4 = vpack.c.bf16 %v336_v1, %v328_v0  ;;  %v344_v6 = vld [vmem:[#allocation7 + $0x580] sm:$0xff] }
  0xba   :  { %v5196_v63 = vpack.c.bf16 %v337_v61, %v329_v60  ;;  %v345_v2 = vld [vmem:[#allocation7 + $0x588] sm:$0xff]  ;;  %v352_v7 = vld [vmem:[#allocation7 + $0x5c0] sm:$0xff] }
  0xbb   :  { %v353_v3 = vld [vmem:[#allocation7 + $0x5c8] sm:$0xff]  ;;  %v5202_v10 = vpack.c.bf16 %v352_v7, %v344_v6  ;;  %v360_v12 = vld [vmem:[#allocation7 + $0x600] sm:$0xff] }
  0xbc   :  { %5179 = vmatpush1.bf16.msra.mxu0 %v5178_v37  ;;  %v5200_v5 = vpack.c.bf16 %v353_v3, %v345_v2  ;;  %v361_v8 = vld [vmem:[#allocation7 + $0x608] sm:$0xff]  ;;  %v368_v13 = vld [vmem:[#allocation7 + $0x640] sm:$0xff] }
  0xbd   :  { %5181 = vmatprep.subr.bf16.mxu0 %v5180_v38  ;;  %v369_v9 = vld [vmem:[#allocation7 + $0x648] sm:$0xff]  ;;  %v5206_v16 = vpack.c.bf16 %v368_v13, %v360_v12  ;;  %v376_v18 = vld [vmem:[#allocation7 + $0x680] sm:$0xff] }
  0xbe   :  { %v5204_v11 = vpack.c.bf16 %v369_v9, %v361_v8  ;;  %v377_v14 = vld [vmem:[#allocation7 + $0x688] sm:$0xff]  ;;  %v384_v19 = vld [vmem:[#allocation7 + $0x6c0] sm:$0xff] }
  0xbf   :  { %v385_v15 = vld [vmem:[#allocation7 + $0x6c8] sm:$0xff]  ;;  %v5210_v22 = vpack.c.bf16 %v384_v19, %v376_v18  ;;  %v392_v24 = vld [vmem:[#allocation7 + $0x700] sm:$0xff] }
  0xc0   :  { %5183 = vmatpush1.bf16.msra.mxu0 %v5182_v44  ;;  %v5208_v17 = vpack.c.bf16 %v385_v15, %v377_v14  ;;  %v393_v20 = vld [vmem:[#allocation7 + $0x708] sm:$0xff]  ;;  %v400_v25 = vld [vmem:[#allocation7 + $0x740] sm:$0xff] }
  0xc1   :  { %5185 = vmatprep.subr.bf16.mxu0 %v5184_v45  ;;  %v401_v21 = vld [vmem:[#allocation7 + $0x748] sm:$0xff]  ;;  %v5214_v28 = vpack.c.bf16 %v400_v25, %v392_v24  ;;  %v408_v30 = vld [vmem:[#allocation7 + $0x780] sm:$0xff] }
  0xc2   :  { %v5212_v23 = vpack.c.bf16 %v401_v21, %v393_v20  ;;  %v409_v26 = vld [vmem:[#allocation7 + $0x788] sm:$0xff]  ;;  %v416_v31 = vld [vmem:[#allocation7 + $0x7c0] sm:$0xff] }
  0xc3   :  { %v417_v27 = vld [vmem:[#allocation7 + $0x7c8] sm:$0xff]  ;;  %v5218_v34 = vpack.c.bf16 %v416_v31, %v408_v30  ;;  %v424_v36 = vld [vmem:[#allocation7 + $0x800] sm:$0xff] }
  0xc4   :  { %5187 = vmatpush1.bf16.msra.mxu0 %v5186_v50  ;;  %v5216_v29 = vpack.c.bf16 %v417_v27, %v409_v26  ;;  %v425_v32 = vld [vmem:[#allocation7 + $0x808] sm:$0xff]  ;;  %v432_v37 = vld [vmem:[#allocation7 + $0x840] sm:$0xff] }
  0xc5   :  { %5189 = vmatprep.subr.bf16.mxu0 %v5188_v51  ;;  %v433_v33 = vld [vmem:[#allocation7 + $0x848] sm:$0xff]  ;;  %v6868_v40 = vld [vmem:[#allocation2] sm:$0xff]  ;;  %v5222_v42 = vpack.c.bf16 %v432_v37, %v424_v36 }
  0xc6   :  { %v5220_v35 = vpack.c.bf16 %v433_v33, %v425_v32  ;;  %v441_v38 = vld [vmem:[#allocation7 + $0x888] sm:$0xff]  ;;  %v440_v44 = vld [vmem:[#allocation7 + $0x880] sm:$0xff] }
  0xc7   :  { %v449_v39 = vld [vmem:[#allocation7 + $0x8c8] sm:$0xff]  ;;  %v448_v45 = vld [vmem:[#allocation7 + $0x8c0] sm:$0xff] }
  0xc8   :  { %5191 = vmatpush1.bf16.msra.mxu0 %v5190_v56  ;;  %v5224_v43 = vpack.c.bf16 %v449_v39, %v441_v38  ;;  %v6870_v46 = vld [vmem:[#allocation2 + $0x28] sm:$0x3]  ;;  %v5226_v49 = vpack.c.bf16 %v448_v45, %v440_v44  ;;  %v6874_v50 = vld [vmem:[#allocation2 + $0x20] sm:$0x3] }
  0xc9   :  { %5193 = vmatprep.subr.bf16.mxu0 %v5192_v57  ;;  %v457_v47 = vld [vmem:[#allocation7 + $0x908] sm:$0xff]  ;;  %v456_v52 = vld [vmem:[#allocation7 + $0x900] sm:$0xff] }
  0xca   :  { %v465_v48 = vld [vmem:[#allocation7 + $0x948] sm:$0xff]  ;;  %v464_v53 = vld [vmem:[#allocation7 + $0x940] sm:$0xff] }
  0xcb   :  { %v5228_v51 = vpack.c.bf16 %v465_v48, %v457_v47  ;;  %v473_v55 = vld [vmem:[#allocation7 + $0x988] sm:$0xff]  ;;  %v5230_v57 = vpack.c.bf16 %v464_v53, %v456_v52  ;;  %v472_v59 = vld [vmem:[#allocation7 + $0x980] sm:$0xff] }
  0xcc   :  { %5195 = vmatpush1.bf16.msra.mxu0 %v5194_v62  ;;  %v481_v56 = vld [vmem:[#allocation7 + $0x9c8] sm:$0xff]  ;;  %v480_v60 = vld [vmem:[#allocation7 + $0x9c0] sm:$0xff] }
  0xcd   :  { %5197 = vmatprep.subr.bf16.mxu0 %v5196_v63  ;;  %v5232_v58 = vpack.c.bf16 %v481_v56, %v473_v55  ;;  %v489_v61 = vld [vmem:[#allocation7 + $0xa08] sm:$0xff]  ;;  %v5234_v63 = vpack.c.bf16 %v480_v60, %v472_v59  ;;  %v488_v1 = vld [vmem:[#allocation7 + $0xa00] sm:$0xff] }
  0xce   :  { %v497_v62 = vld [vmem:[#allocation7 + $0xa48] sm:$0xff]  ;;  %v496_v2 = vld [vmem:[#allocation7 + $0xa40] sm:$0xff] }
  0xcf   :  { %v5236_v0 = vpack.c.bf16 %v497_v62, %v489_v61  ;;  %v505_v3 = vld [vmem:[#allocation7 + $0xa88] sm:$0xff]  ;;  %v504_v7 = vld [vmem:[#allocation7 + $0xa80] sm:$0xff] }
  0xd0   :  { %5199 = vmatpush1.bf16.msra.mxu0 %v5198_v4  ;;  %v513_v4 = vld [vmem:[#allocation7 + $0xac8] sm:$0xff]  ;;  %v512_v8 = vld [vmem:[#allocation7 + $0xac0] sm:$0xff] }
  0xd1   :  { %5201 = vmatprep.subr.bf16.mxu0 %v5200_v5  ;;  %v5238_v5 = vpack.c.bf16 %v496_v2, %v488_v1  ;;  %v5240_v6 = vpack.c.bf16 %v513_v4, %v505_v3  ;;  %v521_v9 = vld [vmem:[#allocation7 + $0xb08] sm:$0xff]  ;;  %v520_v13 = vld [vmem:[#allocation7 + $0xb00] sm:$0xff] }
  0xd2   :  { %v528_v14 = vld [vmem:[#allocation7 + $0xb40] sm:$0xff]  ;;  %v537_v15 = vld [vmem:[#allocation7 + $0xb88] sm:$0xff] }
  0xd3   :  { %v536_v19 = vld [vmem:[#allocation7 + $0xb80] sm:$0xff]  ;;  %v553_v21 = vld [vmem:[#allocation7 + $0xc08] sm:$0xff] }
  0xd4   :  { %5203 = vmatpush1.bf16.msra.mxu0 %v5202_v10  ;;  %v529_v10 = vld [vmem:[#allocation7 + $0xb48] sm:$0xff]  ;;  %v544_v20 = vld [vmem:[#allocation7 + $0xbc0] sm:$0xff] }
  0xd5   :  { %5205 = vmatprep.subr.bf16.mxu0 %v5204_v11  ;;  %v5242_v11 = vpack.c.bf16 %v512_v8, %v504_v7  ;;  %v5244_v12 = vpack.c.bf16 %v529_v10, %v521_v9  ;;  %v552_v25 = vld [vmem:[#allocation7 + $0xc00] sm:$0xff]  ;;  %v569_v27 = vld [vmem:[#allocation7 + $0xc88] sm:$0xff] }
  0xd6   :  { %v560_v26 = vld [vmem:[#allocation7 + $0xc40] sm:$0xff]  ;;  %v585_v33 = vld [vmem:[#allocation7 + $0xd08] sm:$0xff] }
  0xd7   :  { %v568_v31 = vld [vmem:[#allocation7 + $0xc80] sm:$0xff]  ;;  %v601_v39 = vld [vmem:[#allocation7 + $0xd88] sm:$0xff] }
  0xd8   :  { %5207 = vmatpush1.bf16.msra.mxu0 %v5206_v16  ;;  %v545_v16 = vld [vmem:[#allocation7 + $0xbc8] sm:$0xff]  ;;  %v576_v32 = vld [vmem:[#allocation7 + $0xcc0] sm:$0xff] }
  0xd9   :  { %5209 = vmatprep.subr.bf16.mxu0 %v5208_v17  ;;  %v5246_v17 = vpack.c.bf16 %v528_v14, %v520_v13  ;;  %v5248_v18 = vpack.c.bf16 %v545_v16, %v537_v15  ;;  %v584_v37 = vld [vmem:[#allocation7 + $0xd00] sm:$0xff]  ;;  %v617_v48 = vld [vmem:[#allocation7 + $0xe08] sm:$0xff] }
  0xda   :  { %v592_v38 = vld [vmem:[#allocation7 + $0xd40] sm:$0xff]  ;;  %v633_v56 = vld [vmem:[#allocation7 + $0xe88] sm:$0xff] }
  0xdb   :  { %v600_v45 = vld [vmem:[#allocation7 + $0xd80] sm:$0xff]  ;;  %v649_v62 = vld [vmem:[#allocation7 + $0xf08] sm:$0xff] }
  0xdc   :  { %5211 = vmatpush1.bf16.msra.mxu0 %v5210_v22  ;;  %v561_v22 = vld [vmem:[#allocation7 + $0xc48] sm:$0xff]  ;;  %v608_v47 = vld [vmem:[#allocation7 + $0xdc0] sm:$0xff] }
  0xdd   :  { %5213 = vmatprep.subr.bf16.mxu0 %v5212_v23  ;;  %v5250_v23 = vpack.c.bf16 %v544_v20, %v536_v19  ;;  %v5252_v24 = vpack.c.bf16 %v561_v22, %v553_v21  ;;  %v616_v53 = vld [vmem:[#allocation7 + $0xe00] sm:$0xff]  ;;  %v665_v4 = vld [vmem:[#allocation7 + $0xf88] sm:$0xff]  ;;  %v159_v20 = vld [vmem:[#allocation2 + $0x38] sm:$0x3] }
  0xde   :  { %v624_v55 = vld [vmem:[#allocation7 + $0xe40] sm:$0xff]  ;;  %v173_v10 = vld [vmem:[#allocation7 + $0x28] sm:$0xff] }
  0xdf   :  { %v632_v60 = vld [vmem:[#allocation7 + $0xe80] sm:$0xff]  ;;  %v189_v16 = vld [vmem:[#allocation7 + $0xa8] sm:$0xff] }
  0xe0   :  { %5215 = vmatpush1.bf16.msra.mxu0 %v5214_v28  ;;  %v577_v28 = vld [vmem:[#allocation7 + $0xcc8] sm:$0xff]  ;;  %v640_v61 = vld [vmem:[#allocation7 + $0xec0] sm:$0xff] }
  0xe1   :  { %5217 = vmatprep.subr.bf16.mxu0 %v5216_v29  ;;  %v5254_v29 = vpack.c.bf16 %v560_v26, %v552_v25  ;;  %v5256_v30 = vpack.c.bf16 %v577_v28, %v569_v27  ;;  %v648_v2 = vld [vmem:[#allocation7 + $0xf00] sm:$0xff]  ;;  %v213_v25 = vld [vmem:[#allocation7 + $0x168] sm:$0xff]  ;;  %v158_v26 = vld [vmem:[#allocation2 + $0x30] sm:$0x3] }
  0xe2   :  { %v656_v3 = vld [vmem:[#allocation7 + $0xf40] sm:$0xff] }
  0xe3   :  { %v664_v8 = vld [vmem:[#allocation7 + $0xf80] sm:$0xff] }
  0xe4   :  { %5219 = vmatpush1.bf16.msra.mxu0 %v5218_v34  ;;  %v593_v34 = vld [vmem:[#allocation7 + $0xd48] sm:$0xff]  ;;  %v672_v9 = vld [vmem:[#allocation7 + $0xfc0] sm:$0xff] }
  0xe5   :  { %5221 = vmatprep.subr.bf16.mxu0 %v5220_v35  ;;  %v5258_v35 = vpack.c.bf16 %v576_v32, %v568_v31  ;;  %v5260_v36 = vpack.c.bf16 %v593_v34, %v585_v33  ;;  %v172_v14 = vld [vmem:[#allocation7 + $0x20] sm:$0xff]  ;;  %v221_v31 = vld [vmem:[#allocation7 + $0x1a8] sm:$0xff] }
  0xe6   :  { %v180_v15 = vld [vmem:[#allocation7 + $0x60] sm:$0xff]  ;;  %v229_v32 = vld [vmem:[#allocation7 + $0x1e8] sm:$0xff] }
  0xe7   :  { %787 = vmatmul.mubr.f32.vlgmr.msra.gmra.mrb[0].mxu0 %v6868_v40  ;;  %v5414_v19 = vpack.c.bf16 %v180_v15, %v172_v14  ;;  %v188_v22 = vld [vmem:[#allocation7 + $0xa0] sm:$0xff]  ;;  %v5424_v34 = vpack.c.bf16 %v229_v32, %v221_v31  ;;  %v293_v14 = vld [vmem:[#allocation7 + $0x3e8] sm:$0xff]  ;;  %v219_v15 = vld [vmem:[#allocation7 + $0x198] sm:$0xff] }
  0xe8   :  { %5223 = vmatpush1.bf16.msra.mxu0 %v5222_v42  ;;  %792 = vmatprep.mubr.f32.mxu0 %v6870_v46  ;;  %v609_v42 = vld [vmem:[#allocation7 + $0xdc8] sm:$0xff]  ;;  %v242_v31 = vld [vmem:[#allocation7 + $0x250] sm:$0xff] }
  0xe9   :  { %5225 = vmatprep.subr.bf16.mxu0 %v5224_v43  ;;  %v5262_v43 = vpack.c.bf16 %v592_v38, %v584_v37  ;;  %v5264_v44 = vpack.c.bf16 %v609_v42, %v601_v39  ;;  %v237_v37 = vld [vmem:[#allocation7 + $0x228] sm:$0xff]  ;;  %v171_v39 = vld [vmem:[#allocation7 + $0x18] sm:$0xff] }
  0xea   :  { %v245_v38 = vld [vmem:[#allocation7 + $0x268] sm:$0xff]  ;;  %v179_v42 = vld [vmem:[#allocation7 + $0x58] sm:$0xff] }
  0xeb   :  { %793 = vmatmul.mubr.f32.gmra.mrb[2].mxu0 %v6874_v50 }
  0xec   :  { %5227 = vmatpush1.bf16.msra.mxu0 %v5226_v49  ;;  %863 = vmatprep.mubr.f32.mxu0 %v6876_v54  ;;  %v625_v49 = vld [vmem:[#allocation7 + $0xe48] sm:$0xff] }
  0xed   :  { %5229 = vmatprep.subr.bf16.mxu0 %v5228_v51  ;;  %v5266_v51 = vpack.c.bf16 %v608_v47, %v600_v45  ;;  %v5268_v52 = vpack.c.bf16 %v625_v49, %v617_v48  ;;  %v178_v45 = vld [vmem:[#allocation7 + $0x50] sm:$0xff]  ;;  %v5428_v49 = vpack.c.bf16 %v245_v38, %v237_v37  ;;  %v317_v37 = vld [vmem:[#allocation7 + $0x4a8] sm:$0xff] }
  0xee   :  { %v325_v38 = vld [vmem:[#allocation7 + $0x4e8] sm:$0xff] }
  0xf0   :  { %5231 = vmatpush1.bf16.msra.mxu0 %v5230_v57  ;;  %v641_v57 = vld [vmem:[#allocation7 + $0xec8] sm:$0xff] }
  0xf1   :  { %5233 = vmatprep.subr.bf16.mxu0 %v5232_v58  ;;  %v5270_v58 = vpack.c.bf16 %v624_v55, %v616_v53  ;;  %v5272_v59 = vpack.c.bf16 %v641_v57, %v633_v56  ;;  %v253_v53 = vld [vmem:[#allocation7 + $0x2a8] sm:$0xff]  ;;  %v187_v55 = vld [vmem:[#allocation7 + $0x98] sm:$0xff] }
  0xf2   :  { %v195_v56 = vld [vmem:[#allocation7 + $0xd8] sm:$0xff] }
  0xf3   :  { %v5288_v57 = vpack.c.bf16 %v195_v56, %v187_v55  ;;  %v267_v55 = vld [vmem:[#allocation7 + $0x318] sm:$0xff] }
  0xf4   :  { %5235 = vmatpush1.bf16.msra.mxu0 %v5234_v63  ;;  %v657_v63 = vld [vmem:[#allocation7 + $0xf48] sm:$0xff]  ;;  %v275_v56 = vld [vmem:[#allocation7 + $0x358] sm:$0xff] }
  0xf5   :  { %5237 = vmatprep.subr.bf16.mxu0 %v5236_v0  ;;  %v5274_v0 = vpack.c.bf16 %v640_v61, %v632_v60  ;;  %v5276_v1 = vpack.c.bf16 %v657_v63, %v649_v62  ;;  %v252_v63 = vld [vmem:[#allocation7 + $0x2a0] sm:$0xff] }
  0xf8   :  { %5239 = vmatpush1.bf16.msra.mxu0 %v5238_v5  ;;  %v673_v5 = vld [vmem:[#allocation7 + $0xfc8] sm:$0xff] }
  0xf9   :  { %5241 = vmatprep.subr.bf16.mxu0 %v5240_v6  ;;  %v5278_v6 = vpack.c.bf16 %v656_v3, %v648_v2  ;;  %v5280_v7 = vpack.c.bf16 %v673_v5, %v665_v4  ;;  %v277_v2 = vld [vmem:[#allocation7 + $0x368] sm:$0xff]  ;;  %v203_v3 = vld [vmem:[#allocation7 + $0x118] sm:$0xff] }
  0xfa   :  { %v211_v4 = vld [vmem:[#allocation7 + $0x158] sm:$0xff] }
  0xfb   :  { %v5292_v5 = vpack.c.bf16 %v211_v4, %v203_v3  ;;  %v283_v3 = vld [vmem:[#allocation7 + $0x398] sm:$0xff] }
  0xfc   :  { %5243 = vmatpush1.bf16.msra.mxu0 %v5242_v11  ;;  %v181_v11 = vld [vmem:[#allocation7 + $0x68] sm:$0xff]  ;;  %v291_v4 = vld [vmem:[#allocation7 + $0x3d8] sm:$0xff] }
  0xfd   :  { %5245 = vmatprep.subr.bf16.mxu0 %v5244_v12  ;;  %v5282_v12 = vpack.c.bf16 %v672_v9, %v664_v8  ;;  %v5412_v13 = vpack.c.bf16 %v181_v11, %v173_v10  ;;  %v268_v11 = vld [vmem:[#allocation7 + $0x320] sm:$0xff] }
 0x100   :  { %5247 = vmatpush1.bf16.msra.mxu0 %v5246_v17  ;;  %v197_v17 = vld [vmem:[#allocation7 + $0xe8] sm:$0xff] }
 0x101   :  { %5249 = vmatprep.subr.bf16.mxu0 %v5248_v18  ;;  %v154_v18 = vld [vmem:[#allocation2 + $0x10] sm:$0xff]  ;;  %v5416_v21 = vpack.c.bf16 %v197_v17, %v189_v16  ;;  %v227_v16 = vld [vmem:[#allocation7 + $0x1d8] sm:$0xff] }
 0x102   :  { %v5296_v17 = vpack.c.bf16 %v227_v16, %v219_v15  ;;  %v299_v15 = vld [vmem:[#allocation7 + $0x418] sm:$0xff] }
 0x103   :  { %v307_v16 = vld [vmem:[#allocation7 + $0x458] sm:$0xff] }
 0x104   :  { %5251 = vmatpush1.bf16.msra.mxu0 %v5250_v23  ;;  %v196_v23 = vld [vmem:[#allocation7 + $0xe0] sm:$0xff] }
 0x105   :  { %5253 = vmatprep.subr.bf16.mxu0 %v5252_v24  ;;  %v205_v24 = vld [vmem:[#allocation7 + $0x128] sm:$0xff]  ;;  %v5418_v27 = vpack.c.bf16 %v196_v23, %v188_v22  ;;  %v284_v23 = vld [vmem:[#allocation7 + $0x3a0] sm:$0xff] }
 0x106   :  { %v5420_v28 = vpack.c.bf16 %v213_v25, %v205_v24  ;;  %v292_v24 = vld [vmem:[#allocation7 + $0x3e0] sm:$0xff]  ;;  %v301_v25 = vld [vmem:[#allocation7 + $0x428] sm:$0xff] }
 0x107   :  { %v5442_v32 = vpack.c.bf16 %v292_v24, %v284_v23  ;;  %v364_v23 = vld [vmem:[#allocation7 + $0x620] sm:$0xff] }
 0x108   :  { %5255 = vmatpush1.bf16.msra.mxu0 %v5254_v29  ;;  %v204_v29 = vld [vmem:[#allocation7 + $0x120] sm:$0xff] }
 0x109   :  { %5257 = vmatprep.subr.bf16.mxu0 %v5256_v30  ;;  %v212_v30 = vld [vmem:[#allocation7 + $0x160] sm:$0xff] }
 0x10a   :  { %v5422_v33 = vpack.c.bf16 %v212_v30, %v204_v29  ;;  %v234_v30 = vld [vmem:[#allocation7 + $0x210] sm:$0xff]  ;;  %v372_v24 = vld [vmem:[#allocation7 + $0x660] sm:$0xff] }
 0x10c   :  { %5259 = vmatpush1.bf16.msra.mxu0 %v5258_v35  ;;  %v220_v35 = vld [vmem:[#allocation7 + $0x1a0] sm:$0xff] }
 0x10d   :  { %5261 = vmatprep.subr.bf16.mxu0 %v5260_v36  ;;  %v228_v36 = vld [vmem:[#allocation7 + $0x1e0] sm:$0xff] }
 0x10e   :  { %v5426_v47 = vpack.c.bf16 %v228_v36, %v220_v35  ;;  %v300_v35 = vld [vmem:[#allocation7 + $0x420] sm:$0xff] }
 0x10f   :  { %v308_v36 = vld [vmem:[#allocation7 + $0x460] sm:$0xff] }
 0x110   :  { %5263 = vmatpush1.bf16.msra.mxu0 %v5262_v43  ;;  %v5284_v43 = vpack.c.bf16 %v179_v42, %v171_v39  ;;  %v251_v39 = vld [vmem:[#allocation7 + $0x298] sm:$0xff] }
 0x111   :  { %5265 = vmatprep.subr.bf16.mxu0 %v5264_v44  ;;  %v170_v44 = vld [vmem:[#allocation7 + $0x10] sm:$0xff]  ;;  %v259_v42 = vld [vmem:[#allocation7 + $0x2d8] sm:$0xff] }
 0x112   :  { %v5286_v48 = vpack.c.bf16 %v178_v45, %v170_v44  ;;  %5285 = vmatprep.subr.bf16.mxu1 %v5284_v43  ;;  %v5304_v43 = vpack.c.bf16 %v259_v42, %v251_v39  ;;  %v250_v44 = vld [vmem:[#allocation7 + $0x290] sm:$0xff]  ;;  %v331_v39 = vld [vmem:[#allocation7 + $0x518] sm:$0xff] }
 0x113   :  { %v258_v45 = vld [vmem:[#allocation7 + $0x2d0] sm:$0xff]  ;;  %v339_v42 = vld [vmem:[#allocation7 + $0x558] sm:$0xff] }
 0x114   :  { %5267 = vmatpush1.bf16.msra.mxu0 %v5266_v51  ;;  %v236_v51 = vld [vmem:[#allocation7 + $0x220] sm:$0xff]  ;;  %5287 = vmatpush1.bf16.msra.mxu1 %v5286_v48  ;;  %v5306_v48 = vpack.c.bf16 %v258_v45, %v250_v44  ;;  %v330_v44 = vld [vmem:[#allocation7 + $0x510] sm:$0xff] }
 0x115   :  { %5269 = vmatprep.subr.bf16.mxu0 %v5268_v52  ;;  %v244_v52 = vld [vmem:[#allocation7 + $0x260] sm:$0xff]  ;;  %5289 = vmatprep.subr.bf16.mxu1 %v5288_v57  ;;  %v5308_v57 = vpack.c.bf16 %v275_v56, %v267_v55  ;;  %v338_v45 = vld [vmem:[#allocation7 + $0x550] sm:$0xff]  ;;  %v347_v55 = vld [vmem:[#allocation7 + $0x598] sm:$0xff] }
 0x116   :  { %v5430_v60 = vpack.c.bf16 %v244_v52, %v236_v51  ;;  %v316_v51 = vld [vmem:[#allocation7 + $0x4a0] sm:$0xff]  ;;  %v355_v56 = vld [vmem:[#allocation7 + $0x5d8] sm:$0xff] }
 0x117   :  { %v324_v52 = vld [vmem:[#allocation7 + $0x4e0] sm:$0xff] }
 0x118   :  { %5271 = vmatpush1.bf16.msra.mxu0 %v5270_v58  ;;  %v186_v58 = vld [vmem:[#allocation7 + $0x90] sm:$0xff] }
 0x119   :  { %5273 = vmatprep.subr.bf16.mxu0 %v5272_v59  ;;  %v194_v59 = vld [vmem:[#allocation7 + $0xd0] sm:$0xff] }
 0x11a   :  { %v5290_v61 = vpack.c.bf16 %v194_v59, %v186_v58  ;;  %v266_v58 = vld [vmem:[#allocation7 + $0x310] sm:$0xff] }
 0x11b   :  { %v274_v59 = vld [vmem:[#allocation7 + $0x350] sm:$0xff] }
 0x11c   :  { %5275 = vmatpush1.bf16.msra.mxu0 %v5274_v0  ;;  %v260_v0 = vld [vmem:[#allocation7 + $0x2e0] sm:$0xff]  ;;  %5291 = vmatpush1.bf16.msra.mxu1 %v5290_v61  ;;  %v5310_v61 = vpack.c.bf16 %v274_v59, %v266_v58  ;;  %v346_v58 = vld [vmem:[#allocation7 + $0x590] sm:$0xff] }
 0x11d   :  { %5277 = vmatprep.subr.bf16.mxu0 %v5276_v1  ;;  %v269_v1 = vld [vmem:[#allocation7 + $0x328] sm:$0xff]  ;;  %v5434_v8 = vpack.c.bf16 %v260_v0, %v252_v63  ;;  %5293 = vmatprep.subr.bf16.mxu1 %v5292_v5  ;;  %v332_v63 = vld [vmem:[#allocation7 + $0x520] sm:$0xff]  ;;  %v5312_v5 = vpack.c.bf16 %v291_v4, %v283_v3  ;;  %v354_v59 = vld [vmem:[#allocation7 + $0x5d0] sm:$0xff] }
 0x11e   :  { %v5436_v10 = vpack.c.bf16 %v277_v2, %v269_v1  ;;  %v340_v0 = vld [vmem:[#allocation7 + $0x560] sm:$0xff]  ;;  %v349_v1 = vld [vmem:[#allocation7 + $0x5a8] sm:$0xff]  ;;  %v363_v3 = vld [vmem:[#allocation7 + $0x618] sm:$0xff] }
 0x11f   :  { %v357_v2 = vld [vmem:[#allocation7 + $0x5e8] sm:$0xff]  ;;  %v371_v4 = vld [vmem:[#allocation7 + $0x658] sm:$0xff] }
 0x120   :  { %5279 = vmatpush1.bf16.msra.mxu0 %v5278_v6  ;;  %v202_v6 = vld [vmem:[#allocation7 + $0x110] sm:$0xff] }
 0x121   :  { %5281 = vmatprep.subr.bf16.mxu0 %v5280_v7  ;;  %v210_v7 = vld [vmem:[#allocation7 + $0x150] sm:$0xff] }
 0x122   :  { %v5294_v9 = vpack.c.bf16 %v210_v7, %v202_v6  ;;  %v282_v6 = vld [vmem:[#allocation7 + $0x390] sm:$0xff] }
 0x123   :  { %v290_v7 = vld [vmem:[#allocation7 + $0x3d0] sm:$0xff] }
 0x124   :  { %5283 = vmatpush1.bf16.msra.mxu0 %v5282_v12  ;;  %v276_v12 = vld [vmem:[#allocation7 + $0x360] sm:$0xff]  ;;  %5295 = vmatpush1.bf16.msra.mxu1 %v5294_v9  ;;  %v5314_v9 = vpack.c.bf16 %v290_v7, %v282_v6  ;;  %v362_v6 = vld [vmem:[#allocation7 + $0x610] sm:$0xff] }
 0x125   :  { %5413 = vmatprep.subr.bf16.mxu0 %v5412_v13  ;;  %v285_v13 = vld [vmem:[#allocation7 + $0x3a8] sm:$0xff]  ;;  %5297 = vmatprep.subr.bf16.mxu1 %v5296_v17  ;;  %v5316_v17 = vpack.c.bf16 %v307_v16, %v299_v15  ;;  %v370_v7 = vld [vmem:[#allocation7 + $0x650] sm:$0xff]  ;;  %v379_v15 = vld [vmem:[#allocation7 + $0x698] sm:$0xff] }
 0x126   :  { %v5440_v22 = vpack.c.bf16 %v293_v14, %v285_v13  ;;  %v365_v13 = vld [vmem:[#allocation7 + $0x628] sm:$0xff]  ;;  %v387_v16 = vld [vmem:[#allocation7 + $0x6d8] sm:$0xff] }
 0x127   :  { %864 = vmatmul.mubr.f32.vlgmr.msra.gmra.mrb[0].mxu0 %v154_v18  ;;  %v218_v18 = vld [vmem:[#allocation7 + $0x190] sm:$0xff]  ;;  %v373_v14 = vld [vmem:[#allocation7 + $0x668] sm:$0xff] }
 0x128   :  { %5415 = vmatpush1.bf16.msra.mxu0 %v5414_v19  ;;  %869 = vmatprep.mubr.f32.mxu0 %v159_v20  ;;  %v226_v19 = vld [vmem:[#allocation7 + $0x1d0] sm:$0xff]  ;;  %v5438_v20 = vpack.c.bf16 %v276_v12, %v268_v11  ;;  %v348_v11 = vld [vmem:[#allocation7 + $0x5a0] sm:$0xff] }
 0x129   :  { %5417 = vmatprep.subr.bf16.mxu0 %v5416_v21  ;;  %v5298_v21 = vpack.c.bf16 %v226_v19, %v218_v18  ;;  %v356_v12 = vld [vmem:[#allocation7 + $0x5e0] sm:$0xff]  ;;  %v298_v18 = vld [vmem:[#allocation7 + $0x410] sm:$0xff] }
 0x12a   :  { %v306_v19 = vld [vmem:[#allocation7 + $0x450] sm:$0xff] }
 0x12b   :  { %870 = vmatmul.mubr.f32.gmra.mrb[2].mxu0 %v158_v26  ;;  %v309_v26 = vld [vmem:[#allocation7 + $0x468] sm:$0xff]  ;;  %5299 = vmatpush1.bf16.msra.mxu1 %v5298_v21  ;;  %v5318_v21 = vpack.c.bf16 %v306_v19, %v298_v18  ;;  %v378_v18 = vld [vmem:[#allocation7 + $0x690] sm:$0xff] }
 0x12c   :  { %5419 = vmatpush1.bf16.msra.mxu0 %v5418_v27  ;;  %1094 = vmatprep.mubr.f32.mxu0 %v6864_v41  ;;  %v261_v41 = vld [vmem:[#allocation7 + $0x2e8] sm:$0xff]  ;;  %v235_v27 = vld [vmem:[#allocation7 + $0x218] sm:$0xff]  ;;  %v386_v19 = vld [vmem:[#allocation7 + $0x6d0] sm:$0xff] }
 0x12d   :  { %5421 = vmatprep.subr.bf16.mxu0 %v5420_v28  ;;  %v5432_v62 = vpack.c.bf16 %v261_v41, %v253_v53  ;;  %v243_v28 = vld [vmem:[#allocation7 + $0x258] sm:$0xff]  ;;  %v333_v53 = vld [vmem:[#allocation7 + $0x528] sm:$0xff] }
 0x12e   :  { %v5300_v29 = vpack.c.bf16 %v243_v28, %v235_v27  ;;  %v341_v41 = vld [vmem:[#allocation7 + $0x568] sm:$0xff]  ;;  %v315_v27 = vld [vmem:[#allocation7 + $0x498] sm:$0xff] }
 0x12f   :  { %v323_v28 = vld [vmem:[#allocation7 + $0x4d8] sm:$0xff] }
 0x130   :  { %5423 = vmatpush1.bf16.msra.mxu0 %v5422_v33  ;;  %v5302_v33 = vpack.c.bf16 %v242_v31, %v234_v30  ;;  %5301 = vmatprep.subr.bf16.mxu1 %v5300_v29  ;;  %v5320_v29 = vpack.c.bf16 %v323_v28, %v315_v27  ;;  %v314_v30 = vld [vmem:[#allocation7 + $0x490] sm:$0xff]  ;;  %v395_v27 = vld [vmem:[#allocation7 + $0x718] sm:$0xff] }
 0x131   :  { %5425 = vmatprep.subr.bf16.mxu0 %v5424_v34  ;;  %v5444_v34 = vpack.c.bf16 %v309_v26, %v301_v25  ;;  %v381_v25 = vld [vmem:[#allocation7 + $0x6a8] sm:$0xff]  ;;  %v322_v31 = vld [vmem:[#allocation7 + $0x4d0] sm:$0xff]  ;;  %v403_v28 = vld [vmem:[#allocation7 + $0x758] sm:$0xff] }
 0x132   :  { %5303 = vmatpush1.bf16.msra.mxu1 %v5302_v33  ;;  %v389_v26 = vld [vmem:[#allocation7 + $0x6e8] sm:$0xff]  ;;  %v5322_v33 = vpack.c.bf16 %v322_v31, %v314_v30  ;;  %v394_v30 = vld [vmem:[#allocation7 + $0x710] sm:$0xff] }
 0x133   :  { %5305 = vmatprep.subr.bf16.mxu1 %v5304_v43  ;;  %v5324_v43 = vpack.c.bf16 %v339_v42, %v331_v39  ;;  %v402_v31 = vld [vmem:[#allocation7 + $0x750] sm:$0xff]  ;;  %v411_v39 = vld [vmem:[#allocation7 + $0x798] sm:$0xff] }
 0x134   :  { %5427 = vmatpush1.bf16.msra.mxu0 %v5426_v47  ;;  %v5446_v47 = vpack.c.bf16 %v308_v36, %v300_v35  ;;  %v380_v35 = vld [vmem:[#allocation7 + $0x6a0] sm:$0xff]  ;;  %v419_v42 = vld [vmem:[#allocation7 + $0x7d8] sm:$0xff] }
 0x135   :  { %5429 = vmatprep.subr.bf16.mxu0 %v5428_v49  ;;  %v5448_v49 = vpack.c.bf16 %v325_v38, %v317_v37  ;;  %v388_v36 = vld [vmem:[#allocation7 + $0x6e0] sm:$0xff]  ;;  %v397_v37 = vld [vmem:[#allocation7 + $0x728] sm:$0xff] }
 0x136   :  { %5307 = vmatpush1.bf16.msra.mxu1 %v5306_v48  ;;  %v405_v38 = vld [vmem:[#allocation7 + $0x768] sm:$0xff]  ;;  %v5326_v48 = vpack.c.bf16 %v338_v45, %v330_v44  ;;  %v410_v44 = vld [vmem:[#allocation7 + $0x790] sm:$0xff] }
 0x137   :  { %5309 = vmatprep.subr.bf16.mxu1 %v5308_v57  ;;  %v5328_v57 = vpack.c.bf16 %v355_v56, %v347_v55  ;;  %v418_v45 = vld [vmem:[#allocation7 + $0x7d0] sm:$0xff]  ;;  %v427_v55 = vld [vmem:[#allocation7 + $0x818] sm:$0xff] }
 0x138   :  { %5431 = vmatpush1.bf16.msra.mxu0 %v5430_v60  ;;  %v5450_v60 = vpack.c.bf16 %v324_v52, %v316_v51  ;;  %v396_v51 = vld [vmem:[#allocation7 + $0x720] sm:$0xff]  ;;  %v435_v56 = vld [vmem:[#allocation7 + $0x858] sm:$0xff] }
 0x139   :  { %5433 = vmatprep.subr.bf16.mxu0 %v5432_v62  ;;  %v5452_v62 = vpack.c.bf16 %v341_v41, %v333_v53  ;;  %v404_v52 = vld [vmem:[#allocation7 + $0x760] sm:$0xff]  ;;  %v413_v53 = vld [vmem:[#allocation7 + $0x7a8] sm:$0xff] }
 0x13a   :  { %5311 = vmatpush1.bf16.msra.mxu1 %v5310_v61  ;;  %v421_v41 = vld [vmem:[#allocation7 + $0x7e8] sm:$0xff]  ;;  %v5330_v61 = vpack.c.bf16 %v354_v59, %v346_v58  ;;  %v426_v58 = vld [vmem:[#allocation7 + $0x810] sm:$0xff] }
 0x13b   :  { %5313 = vmatprep.subr.bf16.mxu1 %v5312_v5  ;;  %v5332_v5 = vpack.c.bf16 %v371_v4, %v363_v3  ;;  %v434_v59 = vld [vmem:[#allocation7 + $0x850] sm:$0xff]  ;;  %v443_v3 = vld [vmem:[#allocation7 + $0x898] sm:$0xff] }
 0x13c   :  { %5435 = vmatpush1.bf16.msra.mxu0 %v5434_v8  ;;  %v5454_v8 = vpack.c.bf16 %v340_v0, %v332_v63  ;;  %v412_v63 = vld [vmem:[#allocation7 + $0x7a0] sm:$0xff]  ;;  %v451_v4 = vld [vmem:[#allocation7 + $0x8d8] sm:$0xff] }
 0x13d   :  { %5437 = vmatprep.subr.bf16.mxu0 %v5436_v10  ;;  %v5456_v10 = vpack.c.bf16 %v357_v2, %v349_v1  ;;  %v420_v0 = vld [vmem:[#allocation7 + $0x7e0] sm:$0xff]  ;;  %v429_v1 = vld [vmem:[#allocation7 + $0x828] sm:$0xff] }
 0x13e   :  { %5315 = vmatpush1.bf16.msra.mxu1 %v5314_v9  ;;  %v437_v2 = vld [vmem:[#allocation7 + $0x868] sm:$0xff]  ;;  %v5334_v9 = vpack.c.bf16 %v370_v7, %v362_v6  ;;  %v442_v6 = vld [vmem:[#allocation7 + $0x890] sm:$0xff] }
 0x13f   :  { %5317 = vmatprep.subr.bf16.mxu1 %v5316_v17  ;;  %v5336_v17 = vpack.c.bf16 %v387_v16, %v379_v15  ;;  %v450_v7 = vld [vmem:[#allocation7 + $0x8d0] sm:$0xff]  ;;  %v459_v15 = vld [vmem:[#allocation7 + $0x918] sm:$0xff] }
 0x140   :  { %5439 = vmatpush1.bf16.msra.mxu0 %v5438_v20  ;;  %v5458_v20 = vpack.c.bf16 %v356_v12, %v348_v11  ;;  %v428_v11 = vld [vmem:[#allocation7 + $0x820] sm:$0xff] }
 0x141   :  { %5441 = vmatprep.subr.bf16.mxu0 %v5440_v22  ;;  %v5460_v22 = vpack.c.bf16 %v373_v14, %v365_v13  ;;  %v436_v12 = vld [vmem:[#allocation7 + $0x860] sm:$0xff]  ;;  %v445_v13 = vld [vmem:[#allocation7 + $0x8a8] sm:$0xff] }
 0x142   :  { %5319 = vmatpush1.bf16.msra.mxu1 %v5318_v21  ;;  %v453_v14 = vld [vmem:[#allocation7 + $0x8e8] sm:$0xff]  ;;  %v5338_v21 = vpack.c.bf16 %v386_v19, %v378_v18  ;;  %v466_v18 = vld [vmem:[#allocation7 + $0x950] sm:$0xff] }
 0x143   :  { %5321 = vmatprep.subr.bf16.mxu1 %v5320_v29  ;;  %v5340_v29 = vpack.c.bf16 %v403_v28, %v395_v27  ;;  %v474_v27 = vld [vmem:[#allocation7 + $0x990] sm:$0xff] }
 0x144   :  { %5443 = vmatpush1.bf16.msra.mxu0 %v5442_v32  ;;  %v5462_v32 = vpack.c.bf16 %v372_v24, %v364_v23  ;;  %v444_v23 = vld [vmem:[#allocation7 + $0x8a0] sm:$0xff]  ;;  %v482_v28 = vld [vmem:[#allocation7 + $0x9d0] sm:$0xff] }
 0x145   :  { %5445 = vmatprep.subr.bf16.mxu0 %v5444_v34  ;;  %v5464_v34 = vpack.c.bf16 %v389_v26, %v381_v25  ;;  %v452_v24 = vld [vmem:[#allocation7 + $0x8e0] sm:$0xff]  ;;  %v461_v25 = vld [vmem:[#allocation7 + $0x928] sm:$0xff] }
 0x146   :  { %5323 = vmatpush1.bf16.msra.mxu1 %v5322_v33  ;;  %v469_v26 = vld [vmem:[#allocation7 + $0x968] sm:$0xff]  ;;  %v5342_v33 = vpack.c.bf16 %v402_v31, %v394_v30  ;;  %v5362_v30 = vpack.c.bf16 %v482_v28, %v474_v27  ;;  %v540_v31 = vld [vmem:[#allocation7 + $0xba0] sm:$0xff] }
 0x147   :  { %5325 = vmatprep.subr.bf16.mxu1 %v5324_v43  ;;  %v5344_v43 = vpack.c.bf16 %v419_v42, %v411_v39  ;;  %v498_v39 = vld [vmem:[#allocation7 + $0xa50] sm:$0xff]  ;;  %v620_v28 = vld [vmem:[#allocation7 + $0xe20] sm:$0xff] }
 0x148   :  { %5447 = vmatpush1.bf16.msra.mxu0 %v5446_v47  ;;  %v5466_v47 = vpack.c.bf16 %v388_v36, %v380_v35  ;;  %v460_v35 = vld [vmem:[#allocation7 + $0x920] sm:$0xff] }
 0x149   :  { %5449 = vmatprep.subr.bf16.mxu0 %v5448_v49  ;;  %v5468_v49 = vpack.c.bf16 %v405_v38, %v397_v37  ;;  %v468_v36 = vld [vmem:[#allocation7 + $0x960] sm:$0xff]  ;;  %v477_v37 = vld [vmem:[#allocation7 + $0x9a8] sm:$0xff] }
 0x14a   :  { %5327 = vmatpush1.bf16.msra.mxu1 %v5326_v48  ;;  %v485_v38 = vld [vmem:[#allocation7 + $0x9e8] sm:$0xff]  ;;  %v5346_v48 = vpack.c.bf16 %v418_v45, %v410_v44  ;;  %v556_v45 = vld [vmem:[#allocation7 + $0xc20] sm:$0xff] }
 0x14b   :  { %5329 = vmatprep.subr.bf16.mxu1 %v5328_v57  ;;  %v5348_v57 = vpack.c.bf16 %v435_v56, %v427_v55  ;;  %v514_v55 = vld [vmem:[#allocation7 + $0xad0] sm:$0xff] }
 0x14c   :  { %5451 = vmatpush1.bf16.msra.mxu0 %v5450_v60  ;;  %v5470_v60 = vpack.c.bf16 %v404_v52, %v396_v51  ;;  %v476_v51 = vld [vmem:[#allocation7 + $0x9a0] sm:$0xff] }
 0x14d   :  { %5453 = vmatprep.subr.bf16.mxu0 %v5452_v62  ;;  %v5472_v62 = vpack.c.bf16 %v421_v41, %v413_v53  ;;  %v484_v52 = vld [vmem:[#allocation7 + $0x9e0] sm:$0xff]  ;;  %v493_v53 = vld [vmem:[#allocation7 + $0xa28] sm:$0xff] }
 0x14e   :  { %5331 = vmatpush1.bf16.msra.mxu1 %v5330_v61  ;;  %v501_v41 = vld [vmem:[#allocation7 + $0xa68] sm:$0xff]  ;;  %v5350_v61 = vpack.c.bf16 %v434_v59, %v426_v58  ;;  %v572_v59 = vld [vmem:[#allocation7 + $0xca0] sm:$0xff] }
 0x14f   :  { %5333 = vmatprep.subr.bf16.mxu1 %v5332_v5  ;;  %v5352_v5 = vpack.c.bf16 %v451_v4, %v443_v3  ;;  %v530_v3 = vld [vmem:[#allocation7 + $0xb50] sm:$0xff] }
 0x150   :  { %5455 = vmatpush1.bf16.msra.mxu0 %v5454_v8  ;;  %v5474_v8 = vpack.c.bf16 %v420_v0, %v412_v63  ;;  %v492_v63 = vld [vmem:[#allocation7 + $0xa20] sm:$0xff] }
 0x151   :  { %5457 = vmatprep.subr.bf16.mxu0 %v5456_v10  ;;  %v5476_v10 = vpack.c.bf16 %v437_v2, %v429_v1  ;;  %v500_v0 = vld [vmem:[#allocation7 + $0xa60] sm:$0xff]  ;;  %v509_v1 = vld [vmem:[#allocation7 + $0xaa8] sm:$0xff] }
 0x152   :  { %5335 = vmatpush1.bf16.msra.mxu1 %v5334_v9  ;;  %v517_v2 = vld [vmem:[#allocation7 + $0xae8] sm:$0xff]  ;;  %v5354_v9 = vpack.c.bf16 %v450_v7, %v442_v6  ;;  %v588_v7 = vld [vmem:[#allocation7 + $0xd20] sm:$0xff] }
 0x153   :  { %5337 = vmatprep.subr.bf16.mxu1 %v5336_v17  ;;  %v458_v17 = vld [vmem:[#allocation7 + $0x910] sm:$0xff] }
 0x154   :  { %5459 = vmatpush1.bf16.msra.mxu0 %v5458_v20  ;;  %v5478_v20 = vpack.c.bf16 %v436_v12, %v428_v11  ;;  %v508_v11 = vld [vmem:[#allocation7 + $0xaa0] sm:$0xff]  ;;  %v5358_v19 = vpack.c.bf16 %v466_v18, %v458_v17 }
 0x155   :  { %5461 = vmatprep.subr.bf16.mxu0 %v5460_v22  ;;  %v5480_v22 = vpack.c.bf16 %v453_v14, %v445_v13  ;;  %v516_v12 = vld [vmem:[#allocation7 + $0xae0] sm:$0xff]  ;;  %v525_v13 = vld [vmem:[#allocation7 + $0xb28] sm:$0xff] }
 0x156   :  { %5339 = vmatpush1.bf16.msra.mxu1 %v5338_v21  ;;  %v533_v14 = vld [vmem:[#allocation7 + $0xb68] sm:$0xff]  ;;  %v524_v21 = vld [vmem:[#allocation7 + $0xb20] sm:$0xff] }
 0x157   :  { %5341 = vmatprep.subr.bf16.mxu1 %v5340_v29  ;;  %v604_v18 = vld [vmem:[#allocation7 + $0xda0] sm:$0xff] }
 0x158   :  { %5463 = vmatpush1.bf16.msra.mxu0 %v5462_v32  ;;  %v5482_v32 = vpack.c.bf16 %v452_v24, %v444_v23  ;;  %v541_v23 = vld [vmem:[#allocation7 + $0xba8] sm:$0xff] }
 0x159   :  { %5465 = vmatprep.subr.bf16.mxu0 %v5464_v34  ;;  %v5484_v34 = vpack.c.bf16 %v469_v26, %v461_v25  ;;  %v549_v24 = vld [vmem:[#allocation7 + $0xbe8] sm:$0xff]  ;;  %v475_v25 = vld [vmem:[#allocation7 + $0x998] sm:$0xff] }
 0x15a   :  { %5343 = vmatpush1.bf16.msra.mxu1 %v5342_v33  ;;  %v483_v26 = vld [vmem:[#allocation7 + $0x9d8] sm:$0xff]  ;;  %v557_v33 = vld [vmem:[#allocation7 + $0xc28] sm:$0xff] }
 0x15b   :  { %5345 = vmatprep.subr.bf16.mxu1 %v5344_v43 }
 0x15c   :  { %5467 = vmatpush1.bf16.msra.mxu0 %v5466_v47  ;;  %v5486_v47 = vpack.c.bf16 %v468_v36, %v460_v35  ;;  %v491_v35 = vld [vmem:[#allocation7 + $0xa18] sm:$0xff] }
 0x15d   :  { %5469 = vmatprep.subr.bf16.mxu0 %v5468_v49  ;;  %v5488_v49 = vpack.c.bf16 %v485_v38, %v477_v37  ;;  %v499_v36 = vld [vmem:[#allocation7 + $0xa58] sm:$0xff]  ;;  %v490_v38 = vld [vmem:[#allocation7 + $0xa10] sm:$0xff] }
 0x15e   :  { %5347 = vmatpush1.bf16.msra.mxu1 %v5346_v48  ;;  %v5364_v37 = vpack.c.bf16 %v499_v36, %v491_v35  ;;  %v5366_v43 = vpack.c.bf16 %v498_v39, %v490_v38  ;;  %v573_v48 = vld [vmem:[#allocation7 + $0xca8] sm:$0xff]  ;;  %v578_v35 = vld [vmem:[#allocation7 + $0xcd0] sm:$0xff]  ;;  %v636_v39 = vld [vmem:[#allocation7 + $0xea0] sm:$0xff] }
 0x15f   :  { %5349 = vmatprep.subr.bf16.mxu1 %v5348_v57 }
 0x160   :  { %5471 = vmatpush1.bf16.msra.mxu0 %v5470_v60  ;;  %v5490_v60 = vpack.c.bf16 %v484_v52, %v476_v51  ;;  %v507_v51 = vld [vmem:[#allocation7 + $0xa98] sm:$0xff] }
 0x161   :  { %5473 = vmatprep.subr.bf16.mxu0 %v5472_v62  ;;  %v5492_v62 = vpack.c.bf16 %v501_v41, %v493_v53  ;;  %941 = vmatmul.mubr.f32.vlgmr.msra.gmra.mrb[0].mxu1 %v6868_v40  ;;  %v515_v52 = vld [vmem:[#allocation7 + $0xad8] sm:$0xff]  ;;  %v506_v41 = vld [vmem:[#allocation7 + $0xa90] sm:$0xff] }
 0x162   :  { %5351 = vmatpush1.bf16.msra.mxu1 %v5350_v61  ;;  %946 = vmatprep.mubr.f32.mxu1 %v6870_v46  ;;  %v5368_v53 = vpack.c.bf16 %v515_v52, %v507_v51  ;;  %v5370_v57 = vpack.c.bf16 %v514_v55, %v506_v41  ;;  %v589_v61 = vld [vmem:[#allocation7 + $0xd28] sm:$0xff]  ;;  %v594_v51 = vld [vmem:[#allocation7 + $0xd50] sm:$0xff]  ;;  %v652_v55 = vld [vmem:[#allocation7 + $0xf20] sm:$0xff] }
 0x163   :  { %5353 = vmatprep.subr.bf16.mxu1 %v5352_v5 }
 0x164   :  { %5475 = vmatpush1.bf16.msra.mxu0 %v5474_v8  ;;  %v5494_v8 = vpack.c.bf16 %v500_v0, %v492_v63  ;;  %v523_v63 = vld [vmem:[#allocation7 + $0xb18] sm:$0xff] }
 0x165   :  { %5477 = vmatprep.subr.bf16.mxu0 %v5476_v10  ;;  %v5496_v10 = vpack.c.bf16 %v517_v2, %v509_v1  ;;  %947 = vmatmul.mubr.f32.gmra.mrb[2].mxu1 %v6874_v50  ;;  %v531_v0 = vld [vmem:[#allocation7 + $0xb58] sm:$0xff]  ;;  %v522_v2 = vld [vmem:[#allocation7 + $0xb10] sm:$0xff] }
 0x166   :  { %5355 = vmatpush1.bf16.msra.mxu1 %v5354_v9  ;;  %1017 = vmatprep.mubr.f32.mxu1 %v6876_v54  ;;  %v5372_v1 = vpack.c.bf16 %v531_v0, %v523_v63  ;;  %v5374_v5 = vpack.c.bf16 %v530_v3, %v522_v2  ;;  %v605_v9 = vld [vmem:[#allocation7 + $0xda8] sm:$0xff]  ;;  %v610_v63 = vld [vmem:[#allocation7 + $0xdd0] sm:$0xff]  ;;  %v668_v3 = vld [vmem:[#allocation7 + $0xfa0] sm:$0xff] }
 0x167   :  { %1095 = vmatmul.mubr.f32.vlgmr.msra.gmra.mrb[4].mxu0 %v6868_v40  ;;  %v467_v40 = vld [vmem:[#allocation7 + $0x958] sm:$0xff] }
 0x168   :  { %5479 = vmatpush1.bf16.msra.mxu0 %v5478_v20  ;;  %1100 = vmatprep.mubr.f32.mxu0 %v6870_v46  ;;  %v5356_v16 = vpack.c.bf16 %v467_v40, %v459_v15  ;;  %v5498_v46 = vpack.c.bf16 %v516_v12, %v508_v11  ;;  %v5500_v20 = vpack.c.bf16 %v533_v14, %v525_v13  ;;  %v539_v11 = vld [vmem:[#allocation7 + $0xb98] sm:$0xff]  ;;  %v538_v14 = vld [vmem:[#allocation7 + $0xb90] sm:$0xff] }
 0x169   :  { %5481 = vmatprep.subr.bf16.mxu0 %v5480_v22  ;;  %v532_v22 = vld [vmem:[#allocation7 + $0xb60] sm:$0xff]  ;;  %v547_v12 = vld [vmem:[#allocation7 + $0xbd8] sm:$0xff]  ;;  %v546_v15 = vld [vmem:[#allocation7 + $0xbd0] sm:$0xff] }
 0x16a   :  { %5357 = vmatprep.subr.bf16.mxu1 %v5356_v16  ;;  %v5502_v29 = vpack.c.bf16 %v532_v22, %v524_v21  ;;  %v5376_v13 = vpack.c.bf16 %v547_v12, %v539_v11  ;;  %v5378_v16 = vpack.c.bf16 %v546_v15, %v538_v14  ;;  %v555_v21 = vld [vmem:[#allocation7 + $0xc18] sm:$0xff]  ;;  %v626_v11 = vld [vmem:[#allocation7 + $0xe50] sm:$0xff]  ;;  %v1338_v15 = vld [vmem:[#allocation10] sm:$0xff] }
 0x16b   :  { %1101 = vmatmul.mubr.f32.gmra.mrb[6].mxu0 %v6874_v50  ;;  %5359 = vmatpush1.bf16.msra.mxu1 %v5358_v19  ;;  %v5360_v50 = vpack.c.bf16 %v483_v26, %v475_v25  ;;  %v621_v19 = vld [vmem:[#allocation7 + $0xe28] sm:$0xff]  ;;  %v563_v22 = vld [vmem:[#allocation7 + $0xc58] sm:$0xff]  ;;  %v562_v25 = vld [vmem:[#allocation7 + $0xc50] sm:$0xff] }
 0x16c   :  { %5483 = vmatpush1.bf16.msra.mxu0 %v5482_v32  ;;  %1171 = vmatprep.mubr.f32.mxu0 %v6876_v54  ;;  %v5504_v54 = vpack.c.bf16 %v549_v24, %v541_v23  ;;  %v548_v32 = vld [vmem:[#allocation7 + $0xbe0] sm:$0xff]  ;;  %v5380_v23 = vpack.c.bf16 %v563_v22, %v555_v21  ;;  %v554_v24 = vld [vmem:[#allocation7 + $0xc10] sm:$0xff] }
 0x16d   :  { %5485 = vmatprep.subr.bf16.mxu0 %v5484_v34  ;;  %5361 = vmatprep.subr.bf16.mxu1 %v5360_v50  ;;  %v565_v34 = vld [vmem:[#allocation7 + $0xc68] sm:$0xff]  ;;  %v5506_v42 = vpack.c.bf16 %v548_v32, %v540_v31  ;;  %v5382_v50 = vpack.c.bf16 %v562_v25, %v554_v24  ;;  %v571_v31 = vld [vmem:[#allocation7 + $0xc98] sm:$0xff]  ;;  %v642_v21 = vld [vmem:[#allocation7 + $0xed0] sm:$0xff] }
 0x16e   :  { %v5508_v44 = vpack.c.bf16 %v565_v34, %v557_v33  ;;  %v579_v32 = vld [vmem:[#allocation7 + $0xcd8] sm:$0xff]  ;;  %v570_v34 = vld [vmem:[#allocation7 + $0xc90] sm:$0xff]  ;;  %v1346_v25 = vld [vmem:[#allocation10 + $0x40] sm:$0xff] }
 0x16f   :  { %5363 = vmatpush1.bf16.msra.mxu1 %v5362_v30  ;;  %v637_v30 = vld [vmem:[#allocation7 + $0xea8] sm:$0xff]  ;;  %v5384_v33 = vpack.c.bf16 %v579_v32, %v571_v31  ;;  %v650_v31 = vld [vmem:[#allocation7 + $0xf10] sm:$0xff] }
 0x170   :  { %5487 = vmatpush1.bf16.msra.mxu0 %v5486_v47  ;;  %v564_v47 = vld [vmem:[#allocation7 + $0xc60] sm:$0xff]  ;;  %5365 = vmatprep.subr.bf16.mxu1 %v5364_v37  ;;  %v5386_v37 = vpack.c.bf16 %v578_v35, %v570_v34  ;;  %v658_v32 = vld [vmem:[#allocation7 + $0xf50] sm:$0xff]  ;;  %v1354_v35 = vld [vmem:[#allocation10 + $0x80] sm:$0xff] }
 0x171   :  { %5489 = vmatprep.subr.bf16.mxu0 %v5488_v49  ;;  %v581_v49 = vld [vmem:[#allocation7 + $0xce8] sm:$0xff]  ;;  %v5510_v56 = vpack.c.bf16 %v564_v47, %v556_v45  ;;  %v587_v45 = vld [vmem:[#allocation7 + $0xd18] sm:$0xff] }
 0x172   :  { %v5512_v58 = vpack.c.bf16 %v581_v49, %v573_v48  ;;  %v595_v47 = vld [vmem:[#allocation7 + $0xd58] sm:$0xff]  ;;  %v586_v49 = vld [vmem:[#allocation7 + $0xd10] sm:$0xff] }
 0x173   :  { %5367 = vmatpush1.bf16.msra.mxu1 %v5366_v43  ;;  %v653_v43 = vld [vmem:[#allocation7 + $0xf28] sm:$0xff]  ;;  %v5388_v48 = vpack.c.bf16 %v595_v47, %v587_v45  ;;  %v675_v45 = vld [vmem:[#allocation7 + $0xfd8] sm:$0xff]  ;;  %v6405_v47 = vld [vmem:[#allocation2 + $0x30] sm:$0x3] }
 0x174   :  { %5491 = vmatpush1.bf16.msra.mxu0 %v5490_v60  ;;  %v580_v60 = vld [vmem:[#allocation7 + $0xce0] sm:$0xff]  ;;  %5369 = vmatprep.subr.bf16.mxu1 %v5368_v53  ;;  %v5390_v53 = vpack.c.bf16 %v594_v51, %v586_v49  ;;  %v1366_v49 = vld [vmem:[#allocation10 + $0xe0] sm:$0xff] }
 0x175   :  { %5493 = vmatprep.subr.bf16.mxu0 %v5492_v62  ;;  %v597_v62 = vld [vmem:[#allocation7 + $0xd68] sm:$0xff]  ;;  %v5514_v4 = vpack.c.bf16 %v580_v60, %v572_v59  ;;  %v603_v59 = vld [vmem:[#allocation7 + $0xd98] sm:$0xff] }
 0x176   :  { %v5516_v6 = vpack.c.bf16 %v597_v62, %v589_v61  ;;  %v611_v60 = vld [vmem:[#allocation7 + $0xdd8] sm:$0xff]  ;;  %v602_v62 = vld [vmem:[#allocation7 + $0xd90] sm:$0xff] }
 0x177   :  { %5371 = vmatpush1.bf16.msra.mxu1 %v5370_v57  ;;  %v669_v57 = vld [vmem:[#allocation7 + $0xfa8] sm:$0xff]  ;;  %v5392_v61 = vpack.c.bf16 %v611_v60, %v603_v59 }
 0x178   :  { %5495 = vmatpush1.bf16.msra.mxu0 %v5494_v8  ;;  %v596_v8 = vld [vmem:[#allocation7 + $0xd60] sm:$0xff]  ;;  %5373 = vmatprep.subr.bf16.mxu1 %v5372_v1  ;;  %v5394_v1 = vpack.c.bf16 %v610_v63, %v602_v62  ;;  %v191_v62 = vld [vmem:[#allocation7 + $0xb8] sm:$0xff] }
 0x179   :  { %5497 = vmatprep.subr.bf16.mxu0 %v5496_v10  ;;  %v613_v10 = vld [vmem:[#allocation7 + $0xde8] sm:$0xff]  ;;  %v5518_v40 = vpack.c.bf16 %v596_v8, %v588_v7  ;;  %v619_v7 = vld [vmem:[#allocation7 + $0xe18] sm:$0xff] }
 0x17a   :  { %v5520_v17 = vpack.c.bf16 %v613_v10, %v605_v9  ;;  %v627_v8 = vld [vmem:[#allocation7 + $0xe58] sm:$0xff]  ;;  %v618_v10 = vld [vmem:[#allocation7 + $0xe10] sm:$0xff] }
 0x17b   :  { %5375 = vmatpush1.bf16.msra.mxu1 %v5374_v5  ;;  %v1339_v5 = vld [vmem:[#allocation10 + $0x8] sm:$0xff]  ;;  %v5396_v9 = vpack.c.bf16 %v627_v8, %v619_v7  ;;  %v199_v63 = vld [vmem:[#allocation7 + $0xf8] sm:$0xff] }
 0x17c   :  { %5499 = vmatpush1.bf16.msra.mxu0 %v5498_v46  ;;  %v612_v46 = vld [vmem:[#allocation7 + $0xde0] sm:$0xff]  ;;  %5377 = vmatprep.subr.bf16.mxu1 %v5376_v13  ;;  %v5398_v13 = vpack.c.bf16 %v626_v11, %v618_v10  ;;  %v198_v7 = vld [vmem:[#allocation7 + $0xf0] sm:$0xff]  ;;  %v207_v10 = vld [vmem:[#allocation7 + $0x138] sm:$0xff] }
 0x17d   :  { %5501 = vmatprep.subr.bf16.mxu0 %v5500_v20  ;;  %v629_v20 = vld [vmem:[#allocation7 + $0xe68] sm:$0xff]  ;;  %v5522_v26 = vpack.c.bf16 %v612_v46, %v604_v18  ;;  %v635_v18 = vld [vmem:[#allocation7 + $0xe98] sm:$0xff] }
 0x17e   :  { %v5524_v27 = vpack.c.bf16 %v629_v20, %v621_v19  ;;  %v643_v46 = vld [vmem:[#allocation7 + $0xed8] sm:$0xff]  ;;  %v634_v20 = vld [vmem:[#allocation7 + $0xe90] sm:$0xff] }
 0x17f   :  { %5379 = vmatpush1.bf16.msra.mxu1 %v5378_v16  ;;  %v1347_v16 = vld [vmem:[#allocation10 + $0x48] sm:$0xff]  ;;  %v5400_v19 = vpack.c.bf16 %v643_v46, %v635_v18  ;;  %v215_v11 = vld [vmem:[#allocation7 + $0x178] sm:$0xff] }
 0x180   :  { %5503 = vmatpush1.bf16.msra.mxu0 %v5502_v29  ;;  %v628_v29 = vld [vmem:[#allocation7 + $0xe60] sm:$0xff]  ;;  %5381 = vmatprep.subr.bf16.mxu1 %v5380_v23  ;;  %v5402_v23 = vpack.c.bf16 %v642_v21, %v634_v20  ;;  %v214_v18 = vld [vmem:[#allocation7 + $0x170] sm:$0xff]  ;;  %v223_v20 = vld [vmem:[#allocation7 + $0x1b8] sm:$0xff] }
 0x181   :  { %5505 = vmatprep.subr.bf16.mxu0 %v5504_v54  ;;  %v645_v54 = vld [vmem:[#allocation7 + $0xee8] sm:$0xff]  ;;  %v5526_v36 = vpack.c.bf16 %v628_v29, %v620_v28  ;;  %v651_v28 = vld [vmem:[#allocation7 + $0xf18] sm:$0xff] }
 0x182   :  { %v5528_v38 = vpack.c.bf16 %v645_v54, %v637_v30  ;;  %v659_v29 = vld [vmem:[#allocation7 + $0xf58] sm:$0xff]  ;;  %v6403_v30 = vld [vmem:[#allocation2 + $0x10] sm:$0xff] }
 0x183   :  { %5383 = vmatpush1.bf16.msra.mxu1 %v5382_v50  ;;  %v1355_v50 = vld [vmem:[#allocation10 + $0x88] sm:$0xff]  ;;  %v5404_v54 = vpack.c.bf16 %v659_v29, %v651_v28  ;;  %v231_v21 = vld [vmem:[#allocation7 + $0x1f8] sm:$0xff] }
 0x184   :  { %5507 = vmatpush1.bf16.msra.mxu0 %v5506_v42  ;;  %v644_v42 = vld [vmem:[#allocation7 + $0xee0] sm:$0xff]  ;;  %5385 = vmatprep.subr.bf16.mxu1 %v5384_v33  ;;  %v6404_v33 = vld [vmem:[#allocation2 + $0x38] sm:$0x3]  ;;  %v222_v28 = vld [vmem:[#allocation7 + $0x1b0] sm:$0xff] }
 0x185   :  { %5509 = vmatprep.subr.bf16.mxu0 %v5508_v44  ;;  %v661_v44 = vld [vmem:[#allocation7 + $0xf68] sm:$0xff]  ;;  %v5530_v52 = vpack.c.bf16 %v644_v42, %v636_v39  ;;  %v1363_v39 = vld [vmem:[#allocation10 + $0xc8] sm:$0xff] }
 0x186   :  { %v5532_v41 = vpack.c.bf16 %v661_v44, %v653_v43  ;;  %v161_v42 = vld [vmem:[#allocation5 + $0x8] sm:$0xff]  ;;  %v1367_v43 = vld [vmem:[#allocation10 + $0xe8] sm:$0xff]  ;;  %v667_v44 = vld [vmem:[#allocation7 + $0xf98] sm:$0xff] }
 0x187   :  { %5387 = vmatpush1.bf16.msra.mxu1 %v5386_v37  ;;  %v5408_v51 = vpack.c.bf16 %v675_v45, %v667_v44  ;;  %v5680_v59 = vpack.c.bf16 %v1367_v43, %v1363_v39  ;;  %v230_v29 = vld [vmem:[#allocation7 + $0x1f0] sm:$0xff]  ;;  %v1398_v44 = vld [vmem:[#allocation10 + $0x1e0] sm:$0xff]  ;;  %v255_v45 = vld [vmem:[#allocation7 + $0x2b8] sm:$0xff] }
 0x188   :  { %5511 = vmatpush1.bf16.msra.mxu0 %v5510_v56  ;;  %v660_v56 = vld [vmem:[#allocation7 + $0xf60] sm:$0xff]  ;;  %5389 = vmatprep.subr.bf16.mxu1 %v5388_v48  ;;  %v1362_v48 = vld [vmem:[#allocation10 + $0xc0] sm:$0xff]  ;;  %v238_v39 = vld [vmem:[#allocation7 + $0x230] sm:$0xff] }
 0x189   :  { %5513 = vmatprep.subr.bf16.mxu0 %v5512_v58  ;;  %v677_v58 = vld [vmem:[#allocation7 + $0xfe8] sm:$0xff]  ;;  %v5534_v0 = vpack.c.bf16 %v660_v56, %v652_v55  ;;  %v175_v56 = vld [vmem:[#allocation7 + $0x38] sm:$0xff] }
 0x18a   :  { %v5536_v2 = vpack.c.bf16 %v677_v58, %v669_v57  ;;  %v183_v57 = vld [vmem:[#allocation7 + $0x78] sm:$0xff]  ;;  %v174_v58 = vld [vmem:[#allocation7 + $0x30] sm:$0xff] }
 0x18b   :  { %5391 = vmatpush1.bf16.msra.mxu1 %v5390_v53  ;;  %v674_v53 = vld [vmem:[#allocation7 + $0xfd0] sm:$0xff]  ;;  %v5540_v60 = vpack.c.bf16 %v183_v57, %v175_v56 }
 0x18c   :  { %5515 = vmatpush1.bf16.msra.mxu0 %v5514_v4  ;;  %v676_v4 = vld [vmem:[#allocation7 + $0xfe0] sm:$0xff]  ;;  %5393 = vmatprep.subr.bf16.mxu1 %v5392_v61  ;;  %v182_v61 = vld [vmem:[#allocation7 + $0x70] sm:$0xff] }
 0x18d   :  { %5517 = vmatprep.subr.bf16.mxu0 %v5516_v6  ;;  %v1343_v6 = vld [vmem:[#allocation10 + $0x28] sm:$0xff]  ;;  %v5538_v12 = vpack.c.bf16 %v676_v4, %v668_v3  ;;  %v5682_v3 = vpack.c.bf16 %v1366_v49, %v1362_v48  ;;  %v1370_v4 = vld [vmem:[#allocation10 + $0x100] sm:$0xff] }
 0x18e   :  { %v5668_v14 = vpack.c.bf16 %v1343_v6, %v1339_v5  ;;  %v5544_v5 = vpack.c.bf16 %v199_v63, %v191_v62  ;;  %v190_v6 = vld [vmem:[#allocation7 + $0xb0] sm:$0xff] }
 0x18f   :  { %5395 = vmatpush1.bf16.msra.mxu1 %v5394_v1  ;;  %v1375_v1 = vld [vmem:[#allocation10 + $0x128] sm:$0xff] }
 0x190   :  { %5519 = vmatpush1.bf16.msra.mxu0 %v5518_v40  ;;  %v1342_v40 = vld [vmem:[#allocation10 + $0x20] sm:$0xff]  ;;  %5397 = vmatprep.subr.bf16.mxu1 %v5396_v9  ;;  %v1403_v48 = vld [vmem:[#allocation10 + $0x208] sm:$0xff] }
 0x191   :  { %5521 = vmatprep.subr.bf16.mxu0 %v5520_v17  ;;  %v1351_v17 = vld [vmem:[#allocation10 + $0x68] sm:$0xff]  ;;  %v5670_v22 = vpack.c.bf16 %v1342_v40, %v1338_v15  ;;  %v1374_v9 = vld [vmem:[#allocation10 + $0x120] sm:$0xff] }
 0x192   :  { %v5672_v24 = vpack.c.bf16 %v1351_v17, %v1347_v16  ;;  %v5686_v15 = vpack.c.bf16 %v1374_v9, %v1370_v4  ;;  %v1378_v40 = vld [vmem:[#allocation10 + $0x140] sm:$0xff]  ;;  %v5548_v16 = vpack.c.bf16 %v215_v11, %v207_v10  ;;  %v206_v17 = vld [vmem:[#allocation7 + $0x130] sm:$0xff] }
 0x193   :  { %5399 = vmatpush1.bf16.msra.mxu1 %v5398_v13  ;;  %v1383_v13 = vld [vmem:[#allocation10 + $0x168] sm:$0xff] }
 0x194   :  { %5523 = vmatpush1.bf16.msra.mxu0 %v5522_v26  ;;  %v1350_v26 = vld [vmem:[#allocation10 + $0x60] sm:$0xff]  ;;  %5401 = vmatprep.subr.bf16.mxu1 %v5400_v19  ;;  %v1407_v49 = vld [vmem:[#allocation10 + $0x228] sm:$0xff] }
 0x195   :  { %5525 = vmatprep.subr.bf16.mxu0 %v5524_v27  ;;  %v1359_v27 = vld [vmem:[#allocation10 + $0xa8] sm:$0xff]  ;;  %v5674_v34 = vpack.c.bf16 %v1350_v26, %v1346_v25  ;;  %v1382_v19 = vld [vmem:[#allocation10 + $0x160] sm:$0xff]  ;;  %v5700_v57 = vpack.c.bf16 %v1407_v49, %v1403_v48 }
 0x196   :  { %v5676_v37 = vpack.c.bf16 %v1359_v27, %v1355_v50  ;;  %v6406_v25 = vld [vmem:[#allocation2 + $0x8] sm:$0xff]  ;;  %v5690_v26 = vpack.c.bf16 %v1382_v19, %v1378_v40  ;;  %v5552_v27 = vpack.c.bf16 %v231_v21, %v223_v20  ;;  %v262_v56 = vld [vmem:[#allocation7 + $0x2f0] sm:$0xff] }
 0x197   :  { %5403 = vmatpush1.bf16.msra.mxu1 %v5402_v23  ;;  %v1391_v23 = vld [vmem:[#allocation10 + $0x1a8] sm:$0xff]  ;;  %v1386_v50 = vld [vmem:[#allocation10 + $0x180] sm:$0xff] }
 0x198   :  { %5527 = vmatpush1.bf16.msra.mxu0 %v5526_v36  ;;  %v5406_v36 = vpack.c.bf16 %v658_v32, %v650_v31  ;;  %5405 = vmatprep.subr.bf16.mxu1 %v5404_v54  ;;  %v1390_v54 = vld [vmem:[#allocation10 + $0x1a0] sm:$0xff]  ;;  %v239_v31 = vld [vmem:[#allocation7 + $0x238] sm:$0xff]  ;;  %v1415_v62 = vld [vmem:[#allocation10 + $0x268] sm:$0xff] }
 0x199   :  { %5529 = vmatprep.subr.bf16.mxu0 %v5528_v38  ;;  %v1358_v38 = vld [vmem:[#allocation10 + $0xa0] sm:$0xff]  ;;  %v247_v32 = vld [vmem:[#allocation7 + $0x278] sm:$0xff]  ;;  %v278_v4 = vld [vmem:[#allocation7 + $0x370] sm:$0xff] }
 0x19a   :  { %v1419_v9 = vld [vmem:[#allocation10 + $0x288] sm:$0xff]  ;;  %v1442_v48 = vld [vmem:[#allocation10 + $0x340] sm:$0xff] }
 0x19b   :  { %5407 = vmatpush1.bf16.msra.mxu1 %v5406_v36  ;;  %v5694_v36 = vpack.c.bf16 %v1390_v54, %v1386_v50  ;;  %v1423_v10 = vld [vmem:[#allocation10 + $0x2a8] sm:$0xff] }
 0x19c   :  { %5531 = vmatpush1.bf16.msra.mxu0 %v5530_v52  ;;  %v666_v52 = vld [vmem:[#allocation7 + $0xf90] sm:$0xff]  ;;  %5409 = vmatprep.subr.bf16.mxu1 %v5408_v51 }
 0x19d   :  { %5533 = vmatprep.subr.bf16.mxu0 %v5532_v41  ;;  %v5678_v41 = vpack.c.bf16 %v1358_v38, %v1354_v35  ;;  %v5410_v55 = vpack.c.bf16 %v674_v53, %v666_v52  ;;  %v5554_v35 = vpack.c.bf16 %v230_v29, %v222_v28  ;;  %v5556_v38 = vpack.c.bf16 %v247_v32, %v239_v31  ;;  %v1402_v53 = vld [vmem:[#allocation10 + $0x200] sm:$0xff]  ;;  %v294_v40 = vld [vmem:[#allocation7 + $0x3f0] sm:$0xff]  ;;  %v319_v28 = vld [vmem:[#allocation7 + $0x4b8] sm:$0xff] }
 0x19e   :  { %v1427_v19 = vld [vmem:[#allocation10 + $0x2c8] sm:$0xff]  ;;  %v327_v29 = vld [vmem:[#allocation7 + $0x4f8] sm:$0xff] }
 0x19f   :  { %5411 = vmatpush1.bf16.msra.mxu1 %v5410_v55  ;;  %v254_v55 = vld [vmem:[#allocation7 + $0x2b0] sm:$0xff] }
 0x1a0   :  { %5535 = vmatpush1.bf16.msra.mxu0 %v5534_v0  ;;  %v1371_v0 = vld [vmem:[#allocation10 + $0x108] sm:$0xff]  ;;  %5541 = vmatprep.subr.bf16.mxu1 %v5540_v60  ;;  %v279_v60 = vld [vmem:[#allocation7 + $0x378] sm:$0xff]  ;;  %v5562_v63 = vpack.c.bf16 %v262_v56, %v254_v55 }
 0x1a1   :  { %5537 = vmatprep.subr.bf16.mxu0 %v5536_v2  ;;  %v5542_v2 = vpack.c.bf16 %v182_v61, %v174_v58  ;;  %v5684_v8 = vpack.c.bf16 %v1375_v1, %v1371_v0  ;;  %v1406_v58 = vld [vmem:[#allocation10 + $0x220] sm:$0xff]  ;;  %v1411_v61 = vld [vmem:[#allocation10 + $0x248] sm:$0xff]  ;;  %v351_v55 = vld [vmem:[#allocation7 + $0x5b8] sm:$0xff] }
 0x1a2   :  { %1018 = vmatmul.mubr.f32.vlgmr.msra.gmra.mrb[0].mxu1 %v6403_v30  ;;  %v5702_v0 = vpack.c.bf16 %v1406_v58, %v1402_v53  ;;  %v1410_v1 = vld [vmem:[#allocation10 + $0x240] sm:$0xff]  ;;  %v1431_v20 = vld [vmem:[#allocation10 + $0x2e8] sm:$0xff]  ;;  %v359_v56 = vld [vmem:[#allocation7 + $0x5f8] sm:$0xff] }
 0x1a3   :  { %5543 = vmatpush1.bf16.msra.mxu1 %v5542_v2  ;;  %1023 = vmatprep.mubr.f32.mxu1 %v6404_v33  ;;  %v5712_v50 = vpack.c.bf16 %v1431_v20, %v1427_v19  ;;  %v1439_v54 = vld [vmem:[#allocation10 + $0x328] sm:$0xff] }
 0x1a4   :  { %5539 = vmatpush1.bf16.msra.mxu0 %v5538_v12  ;;  %v1379_v12 = vld [vmem:[#allocation10 + $0x148] sm:$0xff]  ;;  %5545 = vmatprep.subr.bf16.mxu1 %v5544_v5  ;;  %v5704_v5 = vpack.c.bf16 %v1415_v62, %v1411_v61  ;;  %v1450_v61 = vld [vmem:[#allocation10 + $0x380] sm:$0xff]  ;;  %v5584_v62 = vpack.c.bf16 %v359_v56, %v351_v55  ;;  %v431_v55 = vld [vmem:[#allocation7 + $0x838] sm:$0xff] }
 0x1a5   :  { %5669 = vmatprep.subr.bf16.mxu0 %v5668_v14  ;;  %v5546_v14 = vpack.c.bf16 %v198_v7, %v190_v6  ;;  %v5688_v46 = vpack.c.bf16 %v1383_v13, %v1379_v12  ;;  %v1414_v6 = vld [vmem:[#allocation10 + $0x260] sm:$0xff]  ;;  %v287_v7 = vld [vmem:[#allocation7 + $0x3b8] sm:$0xff]  ;;  %v1455_v58 = vld [vmem:[#allocation10 + $0x3a8] sm:$0xff] }
 0x1a6   :  { %1024 = vmatmul.mubr.f32.gmra.mrb[2].mxu1 %v6405_v47  ;;  %v5706_v12 = vpack.c.bf16 %v1414_v6, %v1410_v1  ;;  %v1418_v13 = vld [vmem:[#allocation10 + $0x280] sm:$0xff]  ;;  %v1463_v6 = vld [vmem:[#allocation10 + $0x3e8] sm:$0xff]  ;;  %v439_v56 = vld [vmem:[#allocation7 + $0x878] sm:$0xff] }
 0x1a7   :  { %1172 = vmatmul.mubr.f32.vlgmr.msra.gmra.mrb[4].mxu0 %v6403_v30  ;;  %5547 = vmatpush1.bf16.msra.mxu1 %v5546_v14  ;;  %v382_v20 = vld [vmem:[#allocation7 + $0x6b0] sm:$0xff] }
 0x1a8   :  { %5671 = vmatpush1.bf16.msra.mxu0 %v5670_v22  ;;  %1177 = vmatprep.mubr.f32.mxu0 %v6404_v33  ;;  %v1387_v22 = vld [vmem:[#allocation10 + $0x188] sm:$0xff] }
 0x1a9   :  { %5673 = vmatprep.subr.bf16.mxu0 %v5672_v24  ;;  %v5550_v24 = vpack.c.bf16 %v214_v18, %v206_v17  ;;  %1248 = vmatprep.mubr.f32.mxu1 %v6406_v25  ;;  %v5692_v30 = vpack.c.bf16 %v1391_v23, %v1387_v22  ;;  %v1395_v33 = vld [vmem:[#allocation10 + $0x1c8] sm:$0xff]  ;;  %v1422_v17 = vld [vmem:[#allocation10 + $0x2a0] sm:$0xff]  ;;  %v303_v18 = vld [vmem:[#allocation7 + $0x438] sm:$0xff] }
 0x1aa   :  { %5549 = vmatprep.subr.bf16.mxu1 %v5548_v16  ;;  %v5708_v16 = vpack.c.bf16 %v1423_v10, %v1419_v9  ;;  %v5710_v22 = vpack.c.bf16 %v1422_v17, %v1418_v13  ;;  %v1426_v23 = vld [vmem:[#allocation10 + $0x2c0] sm:$0xff]  ;;  %v302_v25 = vld [vmem:[#allocation7 + $0x430] sm:$0xff] }
 0x1ab   :  { %1178 = vmatmul.mubr.f32.gmra.mrb[6].mxu0 %v6405_v47  ;;  %5551 = vmatpush1.bf16.msra.mxu1 %v5550_v24  ;;  %v263_v47 = vld [vmem:[#allocation7 + $0x2f8] sm:$0xff]  ;;  %v1458_v9 = vld [vmem:[#allocation10 + $0x3c0] sm:$0xff]  ;;  %v1471_v17 = vld [vmem:[#allocation10 + $0x428] sm:$0xff] }
 0x1ac   :  { %5675 = vmatpush1.bf16.msra.mxu0 %v5674_v34  ;;  %1680 = vmatprep.mubr.f32.mxu0 %v161_v42  ;;  %v1399_v34 = vld [vmem:[#allocation10 + $0x1e8] sm:$0xff] }
 0x1ad   :  { %5677 = vmatprep.subr.bf16.mxu0 %v5676_v37  ;;  %v1394_v37 = vld [vmem:[#allocation10 + $0x1c0] sm:$0xff]  ;;  %5553 = vmatprep.subr.bf16.mxu1 %v5552_v27  ;;  %v246_v42 = vld [vmem:[#allocation7 + $0x270] sm:$0xff]  ;;  %v5696_v43 = vpack.c.bf16 %v1399_v34, %v1395_v33  ;;  %v5576_v34 = vpack.c.bf16 %v327_v29, %v319_v28  ;;  %v6889_v28 = vld [vmem:[#allocation5] sm:$0xff] }
 0x1ae   :  { %v5558_v51 = vpack.c.bf16 %v246_v42, %v238_v39  ;;  %v5698_v52 = vpack.c.bf16 %v1398_v44, %v1394_v37  ;;  %v1430_v27 = vld [vmem:[#allocation10 + $0x2e0] sm:$0xff]  ;;  %v335_v39 = vld [vmem:[#allocation7 + $0x538] sm:$0xff]  ;;  %v1447_v44 = vld [vmem:[#allocation10 + $0x368] sm:$0xff] }
 0x1af   :  { %5555 = vmatpush1.bf16.msra.mxu1 %v5554_v35  ;;  %v5714_v32 = vpack.c.bf16 %v1430_v27, %v1426_v23  ;;  %v1434_v33 = vld [vmem:[#allocation10 + $0x300] sm:$0xff]  ;;  %v318_v35 = vld [vmem:[#allocation7 + $0x4b0] sm:$0xff]  ;;  %v343_v42 = vld [vmem:[#allocation7 + $0x578] sm:$0xff] }
 0x1b0   :  { %5679 = vmatpush1.bf16.msra.mxu0 %v5678_v41  ;;  %5557 = vmatprep.subr.bf16.mxu1 %v5556_v38  ;;  %v5560_v41 = vpack.c.bf16 %v263_v47, %v255_v45  ;;  %v1438_v38 = vld [vmem:[#allocation10 + $0x320] sm:$0xff]  ;;  %v5580_v49 = vpack.c.bf16 %v343_v42, %v335_v39  ;;  %v407_v27 = vld [vmem:[#allocation7 + $0x778] sm:$0xff] }
 0x1b1   :  { %5681 = vmatprep.subr.bf16.mxu0 %v5680_v59  ;;  %v271_v59 = vld [vmem:[#allocation7 + $0x338] sm:$0xff]  ;;  %v5718_v47 = vpack.c.bf16 %v1438_v38, %v1434_v33  ;;  %v1466_v23 = vld [vmem:[#allocation10 + $0x400] sm:$0xff]  ;;  %v1487_v38 = vld [vmem:[#allocation10 + $0x4a8] sm:$0xff] }
 0x1b2   :  { %v5564_v2 = vpack.c.bf16 %v279_v60, %v271_v59  ;;  %v415_v39 = vld [vmem:[#allocation7 + $0x7b8] sm:$0xff] }
 0x1b3   :  { %5559 = vmatpush1.bf16.msra.mxu1 %v5558_v51  ;;  %v334_v51 = vld [vmem:[#allocation7 + $0x530] sm:$0xff]  ;;  %v423_v42 = vld [vmem:[#allocation7 + $0x7f8] sm:$0xff] }
 0x1b4   :  { %5683 = vmatpush1.bf16.msra.mxu0 %v5682_v3  ;;  %5561 = vmatprep.subr.bf16.mxu1 %v5560_v41  ;;  %v270_v3 = vld [vmem:[#allocation7 + $0x330] sm:$0xff]  ;;  %v1446_v41 = vld [vmem:[#allocation10 + $0x360] sm:$0xff] }
 0x1b5   :  { %5685 = vmatprep.subr.bf16.mxu0 %v5684_v8  ;;  %v295_v8 = vld [vmem:[#allocation7 + $0x3f8] sm:$0xff]  ;;  %v5566_v11 = vpack.c.bf16 %v278_v4, %v270_v3  ;;  %v5722_v60 = vpack.c.bf16 %v1446_v41, %v1442_v48  ;;  %v6895_v48 = vld [vmem:[#allocation5 + $0x20] sm:$0x3]  ;;  %v5600_v41 = vpack.c.bf16 %v423_v42, %v415_v39  ;;  %v1518_v39 = vld [vmem:[#allocation10 + $0x5a0] sm:$0xff] }
 0x1b6   :  { %v5568_v14 = vpack.c.bf16 %v295_v8, %v287_v7  ;;  %v367_v3 = vld [vmem:[#allocation7 + $0x638] sm:$0xff]  ;;  %v1523_v42 = vld [vmem:[#allocation10 + $0x5c8] sm:$0xff] }
 0x1b7   :  { %5563 = vmatpush1.bf16.msra.mxu1 %v5562_v63  ;;  %v350_v63 = vld [vmem:[#allocation7 + $0x5b0] sm:$0xff]  ;;  %v375_v4 = vld [vmem:[#allocation7 + $0x678] sm:$0xff] }
 0x1b8   :  { %5687 = vmatpush1.bf16.msra.mxu0 %v5686_v15  ;;  %5565 = vmatprep.subr.bf16.mxu1 %v5564_v2  ;;  %v286_v15 = vld [vmem:[#allocation7 + $0x3b0] sm:$0xff]  ;;  %v1454_v2 = vld [vmem:[#allocation10 + $0x3a0] sm:$0xff]  ;;  %v5588_v10 = vpack.c.bf16 %v375_v4, %v367_v3 }
 0x1b9   :  { %5689 = vmatprep.subr.bf16.mxu0 %v5688_v46  ;;  %v311_v46 = vld [vmem:[#allocation7 + $0x478] sm:$0xff]  ;;  %v5570_v21 = vpack.c.bf16 %v294_v40, %v286_v15  ;;  %v5726_v8 = vpack.c.bf16 %v1454_v2, %v1450_v61  ;;  %v5604_v61 = vpack.c.bf16 %v439_v56, %v431_v55  ;;  %v1494_v2 = vld [vmem:[#allocation10 + $0x4e0] sm:$0xff]  ;;  %v1499_v3 = vld [vmem:[#allocation10 + $0x508] sm:$0xff] }
 0x1ba   :  { %v5572_v24 = vpack.c.bf16 %v311_v46, %v303_v18  ;;  %v383_v15 = vld [vmem:[#allocation7 + $0x6b8] sm:$0xff]  ;;  %v1503_v4 = vld [vmem:[#allocation10 + $0x528] sm:$0xff] }
 0x1bb   :  { %5567 = vmatpush1.bf16.msra.mxu1 %v5566_v11  ;;  %v366_v11 = vld [vmem:[#allocation7 + $0x630] sm:$0xff]  ;;  %v391_v40 = vld [vmem:[#allocation7 + $0x6f8] sm:$0xff] }
 0x1bc   :  { %5691 = vmatpush1.bf16.msra.mxu0 %v5690_v26  ;;  %5569 = vmatprep.subr.bf16.mxu1 %v5568_v14  ;;  %v310_v26 = vld [vmem:[#allocation7 + $0x470] sm:$0xff]  ;;  %v1462_v14 = vld [vmem:[#allocation10 + $0x3e0] sm:$0xff]  ;;  %v5592_v19 = vpack.c.bf16 %v391_v40, %v383_v15  ;;  %v455_v15 = vld [vmem:[#allocation7 + $0x8f8] sm:$0xff] }
 0x1bd   :  { %5693 = vmatprep.subr.bf16.mxu0 %v5692_v30  ;;  %v1435_v30 = vld [vmem:[#allocation10 + $0x308] sm:$0xff]  ;;  %v5574_v31 = vpack.c.bf16 %v310_v26, %v302_v25  ;;  %v5730_v46 = vpack.c.bf16 %v1462_v14, %v1458_v9  ;;  %v1502_v9 = vld [vmem:[#allocation10 + $0x520] sm:$0xff]  ;;  %v447_v14 = vld [vmem:[#allocation7 + $0x8b8] sm:$0xff] }
 0x1be   :  { %v5716_v37 = vpack.c.bf16 %v1439_v54, %v1435_v30  ;;  %v1475_v25 = vld [vmem:[#allocation10 + $0x448] sm:$0xff]  ;;  %v1474_v54 = vld [vmem:[#allocation10 + $0x440] sm:$0xff]  ;;  %v5608_v40 = vpack.c.bf16 %v455_v15, %v447_v14  ;;  %v511_v14 = vld [vmem:[#allocation7 + $0xab8] sm:$0xff] }
 0x1bf   :  { %5571 = vmatpush1.bf16.msra.mxu1 %v5570_v21  ;;  %v390_v21 = vld [vmem:[#allocation7 + $0x6f0] sm:$0xff]  ;;  %v519_v15 = vld [vmem:[#allocation7 + $0xaf8] sm:$0xff] }
 0x1c0   :  { %5695 = vmatpush1.bf16.msra.mxu0 %v5694_v36  ;;  %5573 = vmatprep.subr.bf16.mxu1 %v5572_v24  ;;  %v326_v36 = vld [vmem:[#allocation7 + $0x4f0] sm:$0xff]  ;;  %v1470_v24 = vld [vmem:[#allocation10 + $0x420] sm:$0xff]  ;;  %v5594_v29 = vpack.c.bf16 %v390_v21, %v382_v20  ;;  %v471_v21 = vld [vmem:[#allocation7 + $0x978] sm:$0xff] }
 0x1c1   :  { %5697 = vmatprep.subr.bf16.mxu0 %v5696_v43  ;;  %v1443_v43 = vld [vmem:[#allocation10 + $0x348] sm:$0xff]  ;;  %v5578_v45 = vpack.c.bf16 %v326_v36, %v318_v35  ;;  %v5734_v30 = vpack.c.bf16 %v1470_v24, %v1466_v23  ;;  %v6891_v36 = vld [vmem:[#allocation5 + $0x28] sm:$0x3] }
 0x1c2   :  { %v5720_v53 = vpack.c.bf16 %v1447_v44, %v1443_v43  ;;  %v1479_v26 = vld [vmem:[#allocation10 + $0x468] sm:$0xff]  ;;  %v1482_v43 = vld [vmem:[#allocation10 + $0x480] sm:$0xff] }
 0x1c3   :  { %5575 = vmatpush1.bf16.msra.mxu1 %v5574_v31  ;;  %v398_v31 = vld [vmem:[#allocation7 + $0x730] sm:$0xff]  ;;  %v5736_v33 = vpack.c.bf16 %v1479_v26, %v1475_v25  ;;  %v1486_v44 = vld [vmem:[#allocation10 + $0x4a0] sm:$0xff] }
 0x1c4   :  { %5699 = vmatpush1.bf16.msra.mxu0 %v5698_v52  ;;  %5577 = vmatprep.subr.bf16.mxu1 %v5576_v34  ;;  %v342_v52 = vld [vmem:[#allocation7 + $0x570] sm:$0xff]  ;;  %v1478_v34 = vld [vmem:[#allocation10 + $0x460] sm:$0xff] }
 0x1c5   :  { %5701 = vmatprep.subr.bf16.mxu0 %v5700_v57  ;;  %v1451_v57 = vld [vmem:[#allocation10 + $0x388] sm:$0xff]  ;;  %v5582_v59 = vpack.c.bf16 %v342_v52, %v334_v51  ;;  %v1506_v24 = vld [vmem:[#allocation10 + $0x540] sm:$0xff] }
 0x1c6   :  { %v5724_v1 = vpack.c.bf16 %v1455_v58, %v1451_v57  ;;  %v1483_v35 = vld [vmem:[#allocation10 + $0x488] sm:$0xff]  ;;  %v1510_v25 = vld [vmem:[#allocation10 + $0x560] sm:$0xff] }
 0x1c7   :  { %5579 = vmatpush1.bf16.msra.mxu1 %v5578_v45  ;;  %v422_v51 = vld [vmem:[#allocation7 + $0x7f0] sm:$0xff]  ;;  %v5740_v52 = vpack.c.bf16 %v1487_v38, %v1483_v35  ;;  %v1514_v38 = vld [vmem:[#allocation10 + $0x580] sm:$0xff] }
 0x1c8   :  { %5703 = vmatpush1.bf16.msra.mxu0 %v5702_v0  ;;  %5581 = vmatprep.subr.bf16.mxu1 %v5580_v49  ;;  %v358_v0 = vld [vmem:[#allocation7 + $0x5f0] sm:$0xff]  ;;  %v5758_v55 = vpack.c.bf16 %v1518_v39, %v1514_v38 }
 0x1c9   :  { %5705 = vmatprep.subr.bf16.mxu0 %v5704_v5  ;;  %v1459_v5 = vld [vmem:[#allocation10 + $0x3c8] sm:$0xff]  ;;  %v5586_v7 = vpack.c.bf16 %v358_v0, %v350_v63 }
 0x1ca   :  { %v5728_v13 = vpack.c.bf16 %v1463_v6, %v1459_v5  ;;  %v414_v49 = vld [vmem:[#allocation7 + $0x7b0] sm:$0xff] }
 0x1cb   :  { %5583 = vmatpush1.bf16.msra.mxu1 %v5582_v59  ;;  %v1491_v57 = vld [vmem:[#allocation10 + $0x4c8] sm:$0xff]  ;;  %v5602_v59 = vpack.c.bf16 %v422_v51, %v414_v49 }
 0x1cc   :  { %5707 = vmatpush1.bf16.msra.mxu0 %v5706_v12  ;;  %5585 = vmatprep.subr.bf16.mxu1 %v5584_v62  ;;  %v374_v12 = vld [vmem:[#allocation7 + $0x670] sm:$0xff] }
 0x1cd   :  { %5709 = vmatprep.subr.bf16.mxu0 %v5708_v16  ;;  %v1467_v16 = vld [vmem:[#allocation10 + $0x408] sm:$0xff]  ;;  %v5590_v18 = vpack.c.bf16 %v374_v12, %v366_v11 }
 0x1ce   :  { %v1495_v58 = vld [vmem:[#allocation10 + $0x4e8] sm:$0xff] }
 0x1cf   :  { %5587 = vmatpush1.bf16.msra.mxu1 %v5586_v7  ;;  %v430_v62 = vld [vmem:[#allocation7 + $0x830] sm:$0xff]  ;;  %v5744_v0 = vpack.c.bf16 %v1495_v58, %v1491_v57  ;;  %v5748_v7 = vpack.c.bf16 %v1503_v4, %v1499_v3 }
 0x1d0   :  { %5711 = vmatpush1.bf16.msra.mxu0 %v5710_v22  ;;  %5589 = vmatprep.subr.bf16.mxu1 %v5588_v10  ;;  %v5732_v22 = vpack.c.bf16 %v1471_v17, %v1467_v16  ;;  %v438_v63 = vld [vmem:[#allocation7 + $0x870] sm:$0xff]  ;;  %v682_v10 = vlaneseq }
 0x1d1   :  { %5713 = vmatprep.subr.bf16.mxu0 %v5712_v50  ;;  %v399_v50 = vld [vmem:[#allocation7 + $0x738] sm:$0xff]  ;;  %v5606_v5 = vpack.c.bf16 %v438_v63, %v430_v62  ;;  %v1507_v11 = vld [vmem:[#allocation10 + $0x548] sm:$0xff] }
 0x1d2   :  { %v1511_v12 = vld [vmem:[#allocation10 + $0x568] sm:$0xff] }
 0x1d3   :  { %5591 = vmatpush1.bf16.msra.mxu1 %v5590_v18  ;;  %v446_v16 = vld [vmem:[#allocation7 + $0x8b0] sm:$0xff]  ;;  %v463_v18 = vld [vmem:[#allocation7 + $0x938] sm:$0xff]  ;;  %v5752_v23 = vpack.c.bf16 %v1511_v12, %v1507_v11  ;;  %v1534_v11 = vld [vmem:[#allocation10 + $0x620] sm:$0xff] }
 0x1d4   :  { %5715 = vmatpush1.bf16.msra.mxu0 %v5714_v32  ;;  %5593 = vmatprep.subr.bf16.mxu1 %v5592_v19  ;;  %v406_v32 = vld [vmem:[#allocation7 + $0x770] sm:$0xff]  ;;  %v5612_v26 = vpack.c.bf16 %v471_v21, %v463_v18  ;;  %v527_v18 = vld [vmem:[#allocation7 + $0xb38] sm:$0xff] }
 0x1d5   :  { %5717 = vmatprep.subr.bf16.mxu0 %v5716_v37  ;;  %v5596_v37 = vpack.c.bf16 %v407_v27, %v399_v50  ;;  %v5598_v45 = vpack.c.bf16 %v406_v32, %v398_v31  ;;  %v454_v17 = vld [vmem:[#allocation7 + $0x8f0] sm:$0xff]  ;;  %v6410_v31 = vld [vmem:[#allocation2 + $0x18] sm:$0xff]  ;;  %v6903_v32 = vld [vmem:[#allocation8] sm:$0xff] }
 0x1d6   :  { %v5610_v20 = vpack.c.bf16 %v454_v17, %v446_v16  ;;  %v1515_v50 = vld [vmem:[#allocation10 + $0x588] sm:$0xff]  ;;  %v5624_v16 = vpack.c.bf16 %v519_v15, %v511_v14  ;;  %v599_v14 = vld [vmem:[#allocation7 + $0xd78] sm:$0xff] }
 0x1d7   :  { %5595 = vmatpush1.bf16.msra.mxu1 %v5594_v29  ;;  %v1519_v27 = vld [vmem:[#allocation10 + $0x5a8] sm:$0xff]  ;;  %v6409_v29 = vld [vmem:[#allocation2 + $0x20] sm:$0x3] }
 0x1d8   :  { %5719 = vmatpush1.bf16.msra.mxu0 %v5718_v47  ;;  %v5738_v47 = vpack.c.bf16 %v1478_v34, %v1474_v54  ;;  %5597 = vmatprep.subr.bf16.mxu1 %v5596_v37  ;;  %v470_v54 = vld [vmem:[#allocation7 + $0x970] sm:$0xff]  ;;  %v5756_v37 = vpack.c.bf16 %v1519_v27, %v1515_v50  ;;  %v1542_v50 = vld [vmem:[#allocation10 + $0x660] sm:$0xff]  ;;  %v543_v27 = vld [vmem:[#allocation7 + $0xbb8] sm:$0xff] }
 0x1d9   :  { %5721 = vmatprep.subr.bf16.mxu0 %v5720_v53  ;;  %v6897_v53 = vld [vmem:[#allocation5 + $0x18] sm:$0xff]  ;;  %v1535_v63 = vld [vmem:[#allocation10 + $0x628] sm:$0xff] }
 0x1da   :  { %v1539_v12 = vld [vmem:[#allocation10 + $0x648] sm:$0xff] }
 0x1db   :  { %5599 = vmatpush1.bf16.msra.mxu1 %v5598_v45  ;;  %v479_v45 = vld [vmem:[#allocation7 + $0x9b8] sm:$0xff]  ;;  %v518_v17 = vld [vmem:[#allocation7 + $0xaf0] sm:$0xff] }
 0x1dc   :  { %5723 = vmatpush1.bf16.msra.mxu0 %v5722_v60  ;;  %v5742_v60 = vpack.c.bf16 %v1486_v44, %v1482_v43  ;;  %5601 = vmatprep.subr.bf16.mxu1 %v5600_v41  ;;  %v1527_v44 = vld [vmem:[#allocation10 + $0x5e8] sm:$0xff] }
 0x1dd   :  { %5725 = vmatprep.subr.bf16.mxu0 %v5724_v1  ;;  %v1490_v1 = vld [vmem:[#allocation10 + $0x4c0] sm:$0xff]  ;;  %v486_v41 = vld [vmem:[#allocation7 + $0x9f0] sm:$0xff]  ;;  %v5760_v58 = vpack.c.bf16 %v1527_v44, %v1523_v42 }
 0x1de   :  { %v5746_v6 = vpack.c.bf16 %v1494_v2, %v1490_v1  ;;  %v503_v1 = vld [vmem:[#allocation7 + $0xa78] sm:$0xff]  ;;  %v542_v38 = vld [vmem:[#allocation7 + $0xbb0] sm:$0xff]  ;;  %v1550_v44 = vld [vmem:[#allocation10 + $0x6a0] sm:$0xff] }
 0x1df   :  { %5603 = vmatpush1.bf16.msra.mxu1 %v5602_v59  ;;  %v1522_v59 = vld [vmem:[#allocation10 + $0x5c0] sm:$0xff]  ;;  %v550_v39 = vld [vmem:[#allocation7 + $0xbf0] sm:$0xff] }
 0x1e0   :  { %5727 = vmatpush1.bf16.msra.mxu0 %v5726_v8  ;;  %5605 = vmatprep.subr.bf16.mxu1 %v5604_v61  ;;  %v1498_v8 = vld [vmem:[#allocation10 + $0x500] sm:$0xff]  ;;  %v1531_v61 = vld [vmem:[#allocation10 + $0x608] sm:$0xff] }
 0x1e1   :  { %5729 = vmatprep.subr.bf16.mxu0 %v5728_v13  ;;  %v6407_v13 = vld [vmem:[#allocation2] sm:$0xff]  ;;  %v5750_v19 = vpack.c.bf16 %v1502_v9, %v1498_v8  ;;  %v1530_v8 = vld [vmem:[#allocation10 + $0x600] sm:$0xff]  ;;  %v1571_v15 = vld [vmem:[#allocation10 + $0x748] sm:$0xff] }
 0x1e2   :  { %1249 = vmatmul.mubr.f32.vlgmr.msra.gmra.mrb[4].mxu1 %v6407_v13  ;;  %v1543_v13 = vld [vmem:[#allocation10 + $0x668] sm:$0xff] }
 0x1e3   :  { %5607 = vmatpush1.bf16.msra.mxu1 %v5606_v5  ;;  %v494_v5 = vld [vmem:[#allocation7 + $0xa30] sm:$0xff] }
 0x1e4   :  { %5731 = vmatpush1.bf16.msra.mxu0 %v5730_v46  ;;  %v6408_v46 = vld [vmem:[#allocation2 + $0x28] sm:$0x3]  ;;  %5609 = vmatprep.subr.bf16.mxu1 %v5608_v40  ;;  %v510_v40 = vld [vmem:[#allocation7 + $0xab0] sm:$0xff] }
 0x1e5   :  { %5733 = vmatprep.subr.bf16.mxu0 %v5732_v22  ;;  %1254 = vmatprep.mubr.f32.mxu1 %v6408_v46  ;;  %v6901_v22 = vshrl.u32 %v682_v10, 7  ;;  %v5764_v10 = vpack.c.bf16 %v1535_v63, %v1531_v61  ;;  %v535_v46 = vld [vmem:[#allocation7 + $0xb78] sm:$0xff]  ;;  %v5626_v21 = vpack.c.bf16 %v518_v17, %v510_v40  ;;  %v1575_v40 = vld [vmem:[#allocation10 + $0x768] sm:$0xff] }
 0x1e6   :  { %1255 = vmatmul.mubr.f32.gmra.mrb[6].mxu1 %v6409_v29  ;;  %v551_v29 = vld [vmem:[#allocation7 + $0xbf8] sm:$0xff] }
 0x1e7   :  { %1681 = vmatmul.mubr.f32.vlgmr.msra.gmra.mrb[8].mxu0 %v6889_v28  ;;  %5611 = vmatpush1.bf16.msra.mxu1 %v5610_v20  ;;  %v684_v35 = vsub.s32 0, %v6901_v22  ;;  %v1538_v20 = vld [vmem:[#allocation10 + $0x640] sm:$0xff]  ;;  %v575_v63 = vld [vmem:[#allocation7 + $0xcb8] sm:$0xff] }
 0x1e8   :  { %5735 = vmatpush1.bf16.msra.mxu0 %v5734_v30  ;;  %1686 = vmatprep.mubr.f32.mxu0 %v6891_v36  ;;  %v462_v30 = vld [vmem:[#allocation7 + $0x930] sm:$0xff] }
 0x1e9   :  { %5737 = vmatprep.subr.bf16.mxu0 %v5736_v33  ;;  %1325 = vmatprep.mubr.f32.mxu1 %v6410_v31  ;;  %v5754_v33 = vpack.c.bf16 %v1510_v25, %v1506_v24  ;;  %v5614_v34 = vpack.c.bf16 %v470_v54, %v462_v30  ;;  %v6913_v57 = vrot.slane %v6903_v32, %v684_v35  ;;  %v526_v24 = vld [vmem:[#allocation7 + $0xb30] sm:$0xff] }
 0x1ea   :  { %5613 = vmatprep.subr.bf16.mxu1 %v5612_v26  ;;  %v534_v25 = vld [vmem:[#allocation7 + $0xb70] sm:$0xff]  ;;  %v5768_v26 = vpack.c.bf16 %v1543_v13, %v1539_v12  ;;  %v1566_v12 = vld [vmem:[#allocation10 + $0x720] sm:$0xff]  ;;  %v591_v13 = vld [vmem:[#allocation7 + $0xd38] sm:$0xff] }
 0x1eb   :  { %1687 = vmatmul.mubr.f32.gmra.mrb[10].mxu0 %v6895_v48  ;;  %5615 = vmatpush1.bf16.msra.mxu1 %v5614_v34  ;;  %v1547_v30 = vld [vmem:[#allocation10 + $0x688] sm:$0xff]  ;;  %v5630_v31 = vpack.c.bf16 %v534_v25, %v526_v24  ;;  %v1546_v34 = vld [vmem:[#allocation10 + $0x680] sm:$0xff]  ;;  %v607_v24 = vld [vmem:[#allocation7 + $0xdb8] sm:$0xff] }
 0x1ec   :  { %5739 = vmatpush1.bf16.msra.mxu0 %v5738_v47  ;;  %1757 = vmatprep.mubr.f32.mxu0 %v6897_v53  ;;  %v487_v47 = vld [vmem:[#allocation7 + $0x9f8] sm:$0xff]  ;;  %v1551_v54 = vld [vmem:[#allocation10 + $0x6a8] sm:$0xff] }
 0x1ed   :  { %5741 = vmatprep.subr.bf16.mxu0 %v5740_v52  ;;  %v5616_v51 = vpack.c.bf16 %v487_v47, %v479_v45  ;;  %v478_v52 = vld [vmem:[#allocation7 + $0x9b0] sm:$0xff]  ;;  %v5772_v42 = vpack.c.bf16 %v1551_v54, %v1547_v30  ;;  %v559_v45 = vld [vmem:[#allocation7 + $0xc38] sm:$0xff]  ;;  %v1578_v30 = vld [vmem:[#allocation10 + $0x780] sm:$0xff] }
 0x1ee   :  { %v5618_v56 = vpack.c.bf16 %v486_v41, %v478_v52  ;;  %v567_v47 = vld [vmem:[#allocation7 + $0xc78] sm:$0xff]  ;;  %v1559_v52 = vld [vmem:[#allocation10 + $0x6e8] sm:$0xff]  ;;  %v5634_v41 = vpack.c.bf16 %v550_v39, %v542_v38 }
 0x1ef   :  { %5617 = vmatprep.subr.bf16.mxu1 %v5616_v51  ;;  %v1555_v51 = vld [vmem:[#allocation10 + $0x6c8] sm:$0xff]  ;;  %v615_v25 = vld [vmem:[#allocation7 + $0xdf8] sm:$0xff] }
 0x1f0   :  { %5743 = vmatpush1.bf16.msra.mxu0 %v5742_v60  ;;  %v1526_v60 = vld [vmem:[#allocation10 + $0x5e0] sm:$0xff]  ;;  %5619 = vmatpush1.bf16.msra.mxu1 %v5618_v56  ;;  %v5776_v61 = vpack.c.bf16 %v1559_v52, %v1555_v51  ;;  %v5648_v54 = vpack.c.bf16 %v615_v25, %v607_v24  ;;  %v623_v38 = vld [vmem:[#allocation7 + $0xe38] sm:$0xff]  ;;  %v1349_v25 = vld [vmem:[#allocation10 + $0x58] sm:$0xff] }
 0x1f1   :  { %5745 = vmatprep.subr.bf16.mxu0 %v5744_v0  ;;  %v495_v0 = vld [vmem:[#allocation7 + $0xa38] sm:$0xff]  ;;  %v1554_v56 = vld [vmem:[#allocation10 + $0x6c0] sm:$0xff] }
 0x1f2   :  { %v5620_v4 = vpack.c.bf16 %v503_v1, %v495_v0  ;;  %v583_v0 = vld [vmem:[#allocation7 + $0xcf8] sm:$0xff]  ;;  %v1563_v1 = vld [vmem:[#allocation10 + $0x708] sm:$0xff]  ;;  %v1586_v51 = vld [vmem:[#allocation10 + $0x7c0] sm:$0xff] }
 0x1f3   :  { %v631_v39 = vld [vmem:[#allocation7 + $0xe78] sm:$0xff] }
 0x1f4   :  { %5747 = vmatpush1.bf16.msra.mxu0 %v5746_v6  ;;  %v502_v6 = vld [vmem:[#allocation7 + $0xa70] sm:$0xff]  ;;  %5621 = vmatprep.subr.bf16.mxu1 %v5620_v4  ;;  %v5652_v52 = vpack.c.bf16 %v631_v39, %v623_v38  ;;  %v1344_v24 = vld [vmem:[#allocation10 + $0x30] sm:$0xff]  ;;  %v1365_v39 = vld [vmem:[#allocation10 + $0xd8] sm:$0xff] }
 0x1f5   :  { %5749 = vmatprep.subr.bf16.mxu0 %v5748_v7  ;;  %v5762_v7 = vpack.c.bf16 %v1526_v60, %v1522_v59  ;;  %v5622_v9 = vpack.c.bf16 %v502_v6, %v494_v5  ;;  %v558_v59 = vld [vmem:[#allocation7 + $0xc30] sm:$0xff]  ;;  %v1360_v38 = vld [vmem:[#allocation10 + $0xb0] sm:$0xff] }
 0x1f6   :  { %v566_v60 = vld [vmem:[#allocation7 + $0xc70] sm:$0xff] }
 0x1f7   :  { %5623 = vmatpush1.bf16.msra.mxu1 %v5622_v9  ;;  %v1567_v4 = vld [vmem:[#allocation10 + $0x728] sm:$0xff]  ;;  %v5638_v5 = vpack.c.bf16 %v566_v60, %v558_v59  ;;  %v639_v59 = vld [vmem:[#allocation7 + $0xeb8] sm:$0xff] }
 0x1f8   :  { %5751 = vmatpush1.bf16.msra.mxu0 %v5750_v19  ;;  %v5766_v19 = vpack.c.bf16 %v1534_v11, %v1530_v8  ;;  %5625 = vmatprep.subr.bf16.mxu1 %v5624_v16  ;;  %v5640_v8 = vpack.c.bf16 %v583_v0, %v575_v63  ;;  %v574_v9 = vld [vmem:[#allocation7 + $0xcb0] sm:$0xff]  ;;  %v5780_v11 = vpack.c.bf16 %v1567_v4, %v1563_v1  ;;  %v647_v60 = vld [vmem:[#allocation7 + $0xef8] sm:$0xff] }
 0x1f9   :  { %5753 = vmatprep.subr.bf16.mxu0 %v5752_v23  ;;  %v5628_v23 = vpack.c.bf16 %v535_v46, %v527_v18  ;;  %v1570_v18 = vld [vmem:[#allocation10 + $0x740] sm:$0xff]  ;;  %v5644_v46 = vpack.c.bf16 %v599_v14, %v591_v13  ;;  %v5656_v63 = vpack.c.bf16 %v647_v60, %v639_v59  ;;  %v638_v0 = vld [vmem:[#allocation7 + $0xeb0] sm:$0xff]  ;;  %v655_v4 = vld [vmem:[#allocation7 + $0xf38] sm:$0xff] }
 0x1fa   :  { %v6906_v43 = vpop.f32.mrb[0].mxu0  ;;  %v646_v1 = vld [vmem:[#allocation7 + $0xef0] sm:$0xff]  ;;  %v679_v13 = vld [vmem:[#allocation7 + $0xff8] sm:$0xff] }
 0x1fb   :  { %v6908_v49 = vpop.f32.mrb[1].mxu0  ;;  %5627 = vmatpush1.bf16.msra.mxu1 %v5626_v21  ;;  %v5784_v21 = vpack.c.bf16 %v1575_v40, %v1571_v15  ;;  %v6928_v15 = vld [vmem:[#allocation5 + $0x30] sm:$0x3]  ;;  %v1372_v60 = vld [vmem:[#allocation10 + $0x110] sm:$0xff] }
 0x1fc   :  { %5755 = vmatpush1.bf16.msra.mxu0 %v5754_v33  ;;  %v5770_v33 = vpack.c.bf16 %v1542_v50, %v1538_v20  ;;  %5629 = vmatprep.subr.bf16.mxu1 %v5628_v23  ;;  %v598_v20 = vld [vmem:[#allocation7 + $0xd70] sm:$0xff]  ;;  %v1574_v23 = vld [vmem:[#allocation10 + $0x760] sm:$0xff] }
 0x1fd   :  { %5757 = vmatprep.subr.bf16.mxu0 %v5756_v37  ;;  %v5632_v37 = vpack.c.bf16 %v551_v29, %v543_v27  ;;  %v1583_v50 = vld [vmem:[#allocation10 + $0x7a8] sm:$0xff]  ;;  %v5786_v29 = vpack.c.bf16 %v1574_v23, %v1570_v18  ;;  %v1341_v18 = vld [vmem:[#allocation10 + $0x18] sm:$0xff]  ;;  %v1340_v23 = vld [vmem:[#allocation10 + $0x10] sm:$0xff] }
 0x1fe   :  { %v871_v62 = vpop.f32.mrb[2].mxu0 }
 0x1ff   :  { %v6916_v2 = vadd.f32 %v871_v62, %v6913_v57  ;;  %v6918_v3 = vpop.f32.mrb[3].mxu0  ;;  %5631 = vmatpush1.bf16.msra.mxu1 %v5630_v31  ;;  %v1558_v62 = vld [vmem:[#allocation10 + $0x6e0] sm:$0xff]  ;;  %v606_v31 = vld [vmem:[#allocation7 + $0xdb0] sm:$0xff] }
 0x200   :  { %5759 = vmatpush1.bf16.msra.mxu0 %v5758_v55  ;;  %v5774_v55 = vpack.c.bf16 %v1550_v44, %v1546_v34  ;;  %5633 = vmatprep.subr.bf16.mxu1 %v5632_v37  ;;  %v5778_v6 = vpack.c.bf16 %v1558_v62, %v1554_v56  ;;  %v1582_v37 = vld [vmem:[#allocation10 + $0x7a0] sm:$0xff]  ;;  %v1591_v44 = vld [vmem:[#allocation10 + $0x7e8] sm:$0xff] }
 0x201   :  { %2221 = vrot.lane.b32.xlu1 %v6916_v2, %s6659_s27  ;;  %5761 = vmatprep.subr.bf16.mxu0 %v5760_v58  ;;  %v5636_v58 = vpack.c.bf16 %v567_v47, %v559_v45  ;;  %v5790_v47 = vpack.c.bf16 %v1582_v37, %v1578_v30  ;;  %v1361_v30 = vld [vmem:[#allocation10 + $0xb8] sm:$0xff]  ;;  %v1356_v37 = vld [vmem:[#allocation10 + $0x90] sm:$0xff] }
 0x203   :  { %5635 = vmatpush1.bf16.msra.mxu1 %v5634_v41  ;;  %v622_v41 = vld [vmem:[#allocation7 + $0xe30] sm:$0xff] }
 0x204   :  { %5763 = vmatpush1.bf16.msra.mxu0 %v5762_v7  ;;  %v1562_v7 = vld [vmem:[#allocation10 + $0x700] sm:$0xff]  ;;  %5637 = vmatprep.subr.bf16.mxu1 %v5636_v58 }
 0x205   :  { %5765 = vmatprep.subr.bf16.mxu0 %v5764_v10  ;;  %v582_v10 = vld [vmem:[#allocation7 + $0xcf0] sm:$0xff]  ;;  %v5782_v17 = vpack.c.bf16 %v1566_v12, %v1562_v7  ;;  %v1590_v58 = vld [vmem:[#allocation10 + $0x7e0] sm:$0xff]  ;;  %v671_v12 = vld [vmem:[#allocation7 + $0xfb8] sm:$0xff] }
 0x206   :  { %v5642_v16 = vpack.c.bf16 %v582_v10, %v574_v9  ;;  %v5794_v62 = vpack.c.bf16 %v1590_v58, %v1586_v51  ;;  %v6922_v7 = vld [vmem:[#allocation5 + $0x10] sm:$0xff]  ;;  %v5664_v40 = vpack.c.bf16 %v679_v13, %v671_v12  ;;  %v1388_v12 = vld [vmem:[#allocation10 + $0x190] sm:$0xff] }
 0x207   :  { %5639 = vmatpush1.bf16.msra.mxu1 %v5638_v5  ;;  %v663_v5 = vld [vmem:[#allocation7 + $0xf78] sm:$0xff]  ;;  %v654_v9 = vld [vmem:[#allocation7 + $0xf30] sm:$0xff] }
 0x208   :  { %5767 = vmatpush1.bf16.msra.mxu0 %v5766_v19  ;;  %5641 = vmatprep.subr.bf16.mxu1 %v5640_v8  ;;  %v590_v19 = vld [vmem:[#allocation7 + $0xd30] sm:$0xff]  ;;  %v5660_v8 = vpack.c.bf16 %v663_v5, %v655_v4  ;;  %v1380_v4 = vld [vmem:[#allocation10 + $0x150] sm:$0xff] }
 0x209   :  { %5769 = vmatprep.subr.bf16.mxu0 %v5768_v26  ;;  %v1579_v26 = vld [vmem:[#allocation10 + $0x788] sm:$0xff]  ;;  %v5646_v27 = vpack.c.bf16 %v598_v20, %v590_v19  ;;  %v6932_v19 = vadd.f32 %v6906_v43, %v6913_v57  ;;  %v1352_v43 = vld [vmem:[#allocation10 + $0x70] sm:$0xff]  ;;  %v1357_v57 = vld [vmem:[#allocation10 + $0x98] sm:$0xff] }
 0x20a   :  { %v5788_v34 = vpack.c.bf16 %v1583_v50, %v1579_v26  ;;  %v662_v10 = vld [vmem:[#allocation7 + $0xf70] sm:$0xff]  ;;  %v1353_v26 = vld [vmem:[#allocation10 + $0x78] sm:$0xff]  ;;  %v5798_v50 = vpack.c.bf16 %v1344_v24, %v1340_v23  ;;  %v1384_v5 = vld [vmem:[#allocation10 + $0x170] sm:$0xff] }
 0x20b   :  { %5643 = vmatpush1.bf16.msra.mxu1 %v5642_v16  ;;  %v5662_v14 = vpack.c.bf16 %v662_v10, %v654_v9  ;;  %v670_v16 = vld [vmem:[#allocation7 + $0xfb0] sm:$0xff]  ;;  %v5818_v9 = vpack.c.bf16 %v1384_v5, %v1380_v4  ;;  %v1392_v13 = vld [vmem:[#allocation10 + $0x1b0] sm:$0xff]  ;;  %v1453_v4 = vld [vmem:[#allocation10 + $0x398] sm:$0xff] }
 0x20c   :  { %5771 = vmatpush1.bf16.msra.mxu0 %v5770_v33  ;;  %5645 = vmatprep.subr.bf16.mxu1 %v5644_v46  ;;  %v614_v33 = vld [vmem:[#allocation7 + $0xdf0] sm:$0xff]  ;;  %v1345_v46 = vld [vmem:[#allocation10 + $0x38] sm:$0xff] }
 0x20d   :  { %5773 = vmatprep.subr.bf16.mxu0 %v5772_v42  ;;  %v1587_v42 = vld [vmem:[#allocation10 + $0x7c8] sm:$0xff]  ;;  %v5650_v45 = vpack.c.bf16 %v614_v33, %v606_v31  ;;  %v6412_v31 = vld [vmem:[#allocation2 + $0x38] sm:$0x3]  ;;  %v1457_v5 = vld [vmem:[#allocation10 + $0x3b8] sm:$0xff] }
 0x20e   :  { %v5792_v56 = vpack.c.bf16 %v1591_v44, %v1587_v42  ;;  %v1369_v42 = vld [vmem:[#allocation10 + $0xf8] sm:$0xff]  ;;  %v6413_v44 = vld [vmem:[#allocation2 + $0x30] sm:$0x3] }
 0x20f   :  { %5647 = vmatpush1.bf16.msra.mxu1 %v5646_v27  ;;  %v5800_v27 = vpack.c.bf16 %v1353_v26, %v1349_v25  ;;  %v5808_v51 = vpack.c.bf16 %v1369_v42, %v1365_v39  ;;  %v1404_v25 = vld [vmem:[#allocation10 + $0x210] sm:$0xff]  ;;  %v1429_v39 = vld [vmem:[#allocation10 + $0x2d8] sm:$0xff] }
 0x210   :  { %5775 = vmatpush1.bf16.msra.mxu0 %v5774_v55  ;;  %5649 = vmatprep.subr.bf16.mxu1 %v5648_v54  ;;  %v630_v55 = vld [vmem:[#allocation7 + $0xe70] sm:$0xff]  ;;  %v1408_v26 = vld [vmem:[#allocation10 + $0x230] sm:$0xff]  ;;  %v1433_v42 = vld [vmem:[#allocation10 + $0x2f8] sm:$0xff] }
 0x211   :  { %5777 = vmatprep.subr.bf16.mxu0 %v5776_v61  ;;  %v5654_v61 = vpack.c.bf16 %v630_v55, %v622_v41  ;;  %v6411_v54 = vld [vmem:[#allocation2 + $0x10] sm:$0xff]  ;;  %v1368_v41 = vld [vmem:[#allocation10 + $0xf0] sm:$0xff]  ;;  %v1373_v55 = vld [vmem:[#allocation10 + $0x118] sm:$0xff] }
 0x213   :  { %5651 = vmatpush1.bf16.msra.mxu1 %v5650_v45  ;;  %v5806_v45 = vpack.c.bf16 %v1360_v38, %v1356_v37  ;;  %v1420_v37 = vld [vmem:[#allocation10 + $0x290] sm:$0xff] }
 0x214   :  { %5779 = vmatpush1.bf16.msra.mxu0 %v5778_v6  ;;  %5653 = vmatprep.subr.bf16.mxu1 %v5652_v52  ;;  %v5658_v6 = vpack.c.bf16 %v646_v1, %v638_v0  ;;  %v1364_v52 = vld [vmem:[#allocation10 + $0xd0] sm:$0xff] }
 0x215   :  { %5781 = vmatprep.subr.bf16.mxu0 %v5780_v11  ;;  %v6924_v11 = vld [vmem:[#allocation5 + $0x38] sm:$0x3]  ;;  %v5810_v58 = vpack.c.bf16 %v1368_v41, %v1364_v52  ;;  %v1437_v52 = vld [vmem:[#allocation10 + $0x318] sm:$0xff] }
 0x216   :  { %v1424_v38 = vld [vmem:[#allocation10 + $0x2b0] sm:$0xff]  ;;  %v1441_v41 = vld [vmem:[#allocation10 + $0x338] sm:$0xff] }
 0x217   :  { %5655 = vmatpush1.bf16.msra.mxu1 %v5654_v61  ;;  %v1376_v61 = vld [vmem:[#allocation10 + $0x130] sm:$0xff] }
 0x218   :  { %5783 = vmatpush1.bf16.msra.mxu0 %v5782_v17  ;;  %5657 = vmatprep.subr.bf16.mxu1 %v5656_v63  ;;  %v678_v17 = vld [vmem:[#allocation7 + $0xff0] sm:$0xff]  ;;  %v1385_v63 = vld [vmem:[#allocation10 + $0x178] sm:$0xff]  ;;  %v5814_v0 = vpack.c.bf16 %v1376_v61, %v1372_v60 }
 0x219   :  { %5785 = vmatprep.subr.bf16.mxu0 %v5784_v21  ;;  %v5666_v20 = vpack.c.bf16 %v678_v17, %v670_v16  ;;  %v5796_v21 = vpack.c.bf16 %v1345_v46, %v1341_v18  ;;  %v5822_v16 = vpack.c.bf16 %v1392_v13, %v1388_v12  ;;  %v1396_v18 = vld [vmem:[#allocation10 + $0x1d0] sm:$0xff]  ;;  %v1445_v60 = vld [vmem:[#allocation10 + $0x358] sm:$0xff] }
 0x21a   :  { %v1400_v46 = vld [vmem:[#allocation10 + $0x1f0] sm:$0xff]  ;;  %v1449_v61 = vld [vmem:[#allocation10 + $0x378] sm:$0xff] }
 0x21b   :  { %5659 = vmatpush1.bf16.msra.mxu1 %v5658_v6  ;;  %v1389_v6 = vld [vmem:[#allocation10 + $0x198] sm:$0xff]  ;;  %v5826_v23 = vpack.c.bf16 %v1400_v46, %v1396_v18 }
 0x21c   :  { %5787 = vmatpush1.bf16.msra.mxu0 %v5786_v29  ;;  %5661 = vmatprep.subr.bf16.mxu1 %v5660_v8  ;;  %v1348_v29 = vld [vmem:[#allocation10 + $0x50] sm:$0xff]  ;;  %v1393_v8 = vld [vmem:[#allocation10 + $0x1b8] sm:$0xff] }
 0x21d   :  { %5789 = vmatprep.subr.bf16.mxu0 %v5788_v34  ;;  %v5802_v33 = vpack.c.bf16 %v1352_v43, %v1348_v29  ;;  %v5804_v34 = vpack.c.bf16 %v1361_v30, %v1357_v57  ;;  %v5820_v10 = vpack.c.bf16 %v1393_v8, %v1389_v6  ;;  %v5830_v29 = vpack.c.bf16 %v1408_v26, %v1404_v25  ;;  %v1412_v57 = vld [vmem:[#allocation10 + $0x250] sm:$0xff]  ;;  %v1461_v12 = vld [vmem:[#allocation10 + $0x3d8] sm:$0xff] }
 0x21e   :  { %v1416_v30 = vld [vmem:[#allocation10 + $0x270] sm:$0xff]  ;;  %v5852_v8 = vpack.c.bf16 %v1457_v5, %v1453_v4  ;;  %v1465_v13 = vld [vmem:[#allocation10 + $0x3f8] sm:$0xff] }
 0x21f   :  { %5663 = vmatpush1.bf16.msra.mxu1 %v5662_v14  ;;  %v1397_v14 = vld [vmem:[#allocation10 + $0x1d8] sm:$0xff] }
 0x220   :  { %5791 = vmatpush1.bf16.msra.mxu0 %v5790_v47  ;;  %5665 = vmatprep.subr.bf16.mxu1 %v5664_v40  ;;  %v6414_v47 = vld [vmem:[#allocation5 + $0x8] sm:$0xff]  ;;  %v1401_v40 = vld [vmem:[#allocation10 + $0x1f8] sm:$0xff] }
 0x221   :  { %5793 = vmatprep.subr.bf16.mxu0 %v5792_v56  ;;  %v1377_v56 = vld [vmem:[#allocation10 + $0x138] sm:$0xff]  ;;  %v5824_v17 = vpack.c.bf16 %v1401_v40, %v1397_v14  ;;  %v5856_v40 = vpack.c.bf16 %v1465_v13, %v1461_v12  ;;  %v1508_v13 = vld [vmem:[#allocation10 + $0x550] sm:$0xff] }
 0x222   :  { %v5812_v59 = vpack.c.bf16 %v1377_v56, %v1373_v55  ;;  %v5844_v56 = vpack.c.bf16 %v1441_v41, %v1437_v52  ;;  %v1469_v18 = vld [vmem:[#allocation10 + $0x418] sm:$0xff] }
 0x223   :  { %5667 = vmatpush1.bf16.msra.mxu1 %v5666_v20  ;;  %v1405_v20 = vld [vmem:[#allocation10 + $0x218] sm:$0xff] }
 0x224   :  { %5795 = vmatpush1.bf16.msra.mxu0 %v5794_v62  ;;  %5797 = vmatprep.subr.bf16.mxu1 %v5796_v21  ;;  %v1381_v62 = vld [vmem:[#allocation10 + $0x158] sm:$0xff] }
 0x225   :  { %v5816_v1 = vpack.c.bf16 %v1385_v63, %v1381_v62  ;;  %v1409_v21 = vld [vmem:[#allocation10 + $0x238] sm:$0xff]  ;;  %v5848_v63 = vpack.c.bf16 %v1449_v61, %v1445_v60 }
 0x226   :  { %1326 = vmatmul.mubr.f32.vlgmr.msra.gmra.mrb[4].mxu1 %v6411_v54  ;;  %v5828_v24 = vpack.c.bf16 %v1409_v21, %v1405_v20  ;;  %v1421_v54 = vld [vmem:[#allocation10 + $0x298] sm:$0xff] }
 0x227   :  { %1758 = vmatmul.mubr.f32.vlgmr.msra.gmra.mrb[8].mxu0 %v6922_v7  ;;  %5799 = vmatpush1.bf16.msra.mxu1 %v5798_v50  ;;  %v1413_v50 = vld [vmem:[#allocation10 + $0x258] sm:$0xff] }
 0x228   :  { %1763 = vmatprep.mubr.f32.mxu0 %v6924_v11  ;;  %1331 = vmatprep.mubr.f32.mxu1 %v6412_v31  ;;  %v1425_v31 = vld [vmem:[#allocation10 + $0x2b8] sm:$0xff] }
 0x229   :  { %5801 = vmatprep.subr.bf16.mxu1 %v5800_v27  ;;  %v1417_v27 = vld [vmem:[#allocation10 + $0x278] sm:$0xff] }
 0x22a   :  { %1332 = vmatmul.mubr.f32.gmra.mrb[6].mxu1 %v6413_v44  ;;  %v5832_v43 = vpack.c.bf16 %v1417_v27, %v1413_v50  ;;  %v5838_v44 = vpack.c.bf16 %v1424_v38, %v1420_v37  ;;  %v1473_v46 = vld [vmem:[#allocation10 + $0x438] sm:$0xff]  ;;  %v1488_v37 = vld [vmem:[#allocation10 + $0x4b0] sm:$0xff]  ;;  %v704_v38 = vsub.s32 5, %v6901_v22 }
 0x22b   :  { %1764 = vmatmul.mubr.f32.gmra.mrb[10].mxu0 %v6928_v15  ;;  %5803 = vmatpush1.bf16.msra.mxu1 %v5802_v33  ;;  %v5834_v33 = vpack.c.bf16 %v1416_v30, %v1412_v57  ;;  %v5860_v21 = vpack.c.bf16 %v1473_v46, %v1469_v18  ;;  %v1477_v25 = vld [vmem:[#allocation10 + $0x458] sm:$0xff] }
 0x22c   :  { %4896 = vmatprep.mubr.msk.f32.mxu0 %vm1924_vm0, %v6932_v19  ;;  %1834 = vmatprep.mubr.f32.mxu1 %v6414_v47  ;;  %v1428_v47 = vld [vmem:[#allocation10 + $0x2d0] sm:$0xff]  ;;  %v1481_v26 = vld [vmem:[#allocation10 + $0x478] sm:$0xff]  ;;  %v705_v52 = vrot.slane %v6903_v32, %v704_v38 }
 0x22d   :  { %5805 = vmatprep.subr.bf16.mxu1 %v5804_v34  ;;  %v5836_v34 = vpack.c.bf16 %v1425_v31, %v1421_v54  ;;  %v5864_v27 = vpack.c.bf16 %v1481_v26, %v1477_v25  ;;  %v1485_v57 = vld [vmem:[#allocation10 + $0x498] sm:$0xff] }
 0x22e   :  { %v1489_v30 = vld [vmem:[#allocation10 + $0x4b8] sm:$0xff] }
 0x22f   :  { %5807 = vmatpush1.bf16.msra.mxu1 %v5806_v45  ;;  %v5840_v45 = vpack.c.bf16 %v1433_v42, %v1429_v39  ;;  %v5868_v31 = vpack.c.bf16 %v1489_v30, %v1485_v57  ;;  %v1493_v42 = vld [vmem:[#allocation10 + $0x4d8] sm:$0xff] }
 0x230   :  { %5809 = vmatprep.subr.bf16.mxu1 %v5808_v51  ;;  %v1432_v51 = vld [vmem:[#allocation10 + $0x2f0] sm:$0xff]  ;;  %v1525_v25 = vld [vmem:[#allocation10 + $0x5d8] sm:$0xff] }
 0x231   :  { %v5842_v55 = vpack.c.bf16 %v1432_v51, %v1428_v47  ;;  %v1496_v51 = vld [vmem:[#allocation10 + $0x4f0] sm:$0xff]  ;;  %v1529_v26 = vld [vmem:[#allocation10 + $0x5f8] sm:$0xff] }
 0x232   :  { %v1533_v57 = vld [vmem:[#allocation10 + $0x618] sm:$0xff] }
 0x233   :  { %5811 = vmatpush1.bf16.msra.mxu1 %v5810_v58  ;;  %v1436_v58 = vld [vmem:[#allocation10 + $0x310] sm:$0xff]  ;;  %v1537_v30 = vld [vmem:[#allocation10 + $0x638] sm:$0xff] }
 0x234   :  { %5813 = vmatprep.subr.bf16.mxu1 %v5812_v59  ;;  %v1440_v59 = vld [vmem:[#allocation10 + $0x330] sm:$0xff]  ;;  %v1545_v38 = vld [vmem:[#allocation10 + $0x678] sm:$0xff] }
 0x235   :  { %v5846_v62 = vpack.c.bf16 %v1440_v59, %v1436_v58 }
 0x237   :  { %5815 = vmatpush1.bf16.msra.mxu1 %v5814_v0  ;;  %v1444_v0 = vld [vmem:[#allocation10 + $0x350] sm:$0xff] }
 0x238   :  { %5817 = vmatprep.subr.bf16.mxu1 %v5816_v1  ;;  %v1448_v1 = vld [vmem:[#allocation10 + $0x370] sm:$0xff] }
 0x239   :  { %v5850_v6 = vpack.c.bf16 %v1448_v1, %v1444_v0 }
 0x23b   :  { %5819 = vmatpush1.bf16.msra.mxu1 %v5818_v9  ;;  %v1452_v9 = vld [vmem:[#allocation10 + $0x390] sm:$0xff] }
 0x23c   :  { %5821 = vmatprep.subr.bf16.mxu1 %v5820_v10  ;;  %v1456_v10 = vld [vmem:[#allocation10 + $0x3b0] sm:$0xff] }
 0x23d   :  { %v5854_v14 = vpack.c.bf16 %v1456_v10, %v1452_v9  ;;  %v1513_v9 = vld [vmem:[#allocation10 + $0x578] sm:$0xff] }
 0x23f   :  { %5823 = vmatpush1.bf16.msra.mxu1 %v5822_v16  ;;  %v1460_v16 = vld [vmem:[#allocation10 + $0x3d0] sm:$0xff] }
 0x240   :  { %5825 = vmatprep.subr.bf16.mxu1 %v5824_v17  ;;  %v1464_v17 = vld [vmem:[#allocation10 + $0x3f0] sm:$0xff] }
 0x241   :  { %v5858_v20 = vpack.c.bf16 %v1464_v17, %v1460_v16  ;;  %v1517_v16 = vld [vmem:[#allocation10 + $0x598] sm:$0xff] }
 0x242   :  { %v1521_v17 = vld [vmem:[#allocation10 + $0x5b8] sm:$0xff] }
 0x243   :  { %5827 = vmatpush1.bf16.msra.mxu1 %v5826_v23  ;;  %v1468_v23 = vld [vmem:[#allocation10 + $0x410] sm:$0xff]  ;;  %v5884_v46 = vpack.c.bf16 %v1521_v17, %v1517_v16 }
 0x244   :  { %5829 = vmatprep.subr.bf16.mxu1 %v5828_v24  ;;  %v1472_v24 = vld [vmem:[#allocation10 + $0x430] sm:$0xff] }
 0x245   :  { %v5862_v50 = vpack.c.bf16 %v1472_v24, %v1468_v23 }
 0x247   :  { %5831 = vmatpush1.bf16.msra.mxu1 %v5830_v29  ;;  %v1476_v29 = vld [vmem:[#allocation10 + $0x450] sm:$0xff] }
 0x248   :  { %5833 = vmatprep.subr.bf16.mxu1 %v5832_v43  ;;  %v1480_v43 = vld [vmem:[#allocation10 + $0x470] sm:$0xff] }
 0x249   :  { %v5866_v54 = vpack.c.bf16 %v1480_v43, %v1476_v29  ;;  %v1528_v29 = vld [vmem:[#allocation10 + $0x5f0] sm:$0xff] }
 0x24b   :  { %5835 = vmatpush1.bf16.msra.mxu1 %v5834_v33  ;;  %v700_v33 = vsub.s32 4, %v6901_v22 }
 0x24c   :  { %5837 = vmatprep.subr.bf16.mxu1 %v5836_v34  ;;  %v1484_v34 = vld [vmem:[#allocation10 + $0x490] sm:$0xff] }
 0x24d   :  { %v5870_v39 = vpack.c.bf16 %v1488_v37, %v1484_v34  ;;  %v1536_v34 = vld [vmem:[#allocation10 + $0x630] sm:$0xff]  ;;  %v1541_v37 = vld [vmem:[#allocation10 + $0x658] sm:$0xff] }
 0x24f   :  { %5839 = vmatpush1.bf16.msra.mxu1 %v5838_v44  ;;  %v1497_v44 = vld [vmem:[#allocation10 + $0x4f8] sm:$0xff] }
 0x250   :  { %5841 = vmatprep.subr.bf16.mxu1 %v5840_v45  ;;  %v5872_v47 = vpack.c.bf16 %v1497_v44, %v1493_v42  ;;  %v5896_v42 = vpack.c.bf16 %v1545_v38, %v1541_v37  ;;  %v1540_v44 = vld [vmem:[#allocation10 + $0x650] sm:$0xff]  ;;  %v1594_v37 = vld [vmem:[#allocation11] sm:$0xf]  ;;  %v688_v38 = vsub.s32 1, %v6901_v22 }
 0x253   :  { %5843 = vmatpush1.bf16.msra.mxu1 %v5842_v55 }
 0x254   :  { %5845 = vmatprep.subr.bf16.mxu1 %v5844_v56  ;;  %v1505_v56 = vld [vmem:[#allocation10 + $0x538] sm:$0xff] }
 0x257   :  { %5847 = vmatpush1.bf16.msra.mxu1 %v5846_v62  ;;  %v1500_v62 = vld [vmem:[#allocation10 + $0x510] sm:$0xff] }
 0x258   :  { %5849 = vmatprep.subr.bf16.mxu1 %v5848_v63  ;;  %v1504_v63 = vld [vmem:[#allocation10 + $0x530] sm:$0xff] }
 0x259   :  { %v5878_v4 = vpack.c.bf16 %v1504_v63, %v1500_v62  ;;  %v1560_v62 = vld [vmem:[#allocation10 + $0x6f0] sm:$0xff]  ;;  %v1565_v63 = vld [vmem:[#allocation10 + $0x718] sm:$0xff] }
 0x25b   :  { %5851 = vmatpush1.bf16.msra.mxu1 %v5850_v6 }
 0x25c   :  { %5853 = vmatprep.subr.bf16.mxu1 %v5852_v8  ;;  %v1509_v8 = vld [vmem:[#allocation10 + $0x558] sm:$0xff] }
 0x25d   :  { %v5880_v12 = vpack.c.bf16 %v1513_v9, %v1509_v8 }
 0x25f   :  { %5855 = vmatpush1.bf16.msra.mxu1 %v5854_v14  ;;  %v1512_v14 = vld [vmem:[#allocation10 + $0x570] sm:$0xff] }
 0x260   :  { %5857 = vmatprep.subr.bf16.mxu1 %v5856_v40  ;;  %v5882_v40 = vpack.c.bf16 %v1512_v14, %v1508_v13  ;;  %v1568_v13 = vld [vmem:[#allocation10 + $0x730] sm:$0xff]  ;;  %v1573_v14 = vld [vmem:[#allocation10 + $0x758] sm:$0xff] }
 0x263   :  { %5859 = vmatpush1.bf16.msra.mxu1 %v5858_v20  ;;  %v1516_v20 = vld [vmem:[#allocation10 + $0x590] sm:$0xff] }
 0x264   :  { %5861 = vmatprep.subr.bf16.mxu1 %v5860_v21  ;;  %v1520_v21 = vld [vmem:[#allocation10 + $0x5b0] sm:$0xff] }
 0x265   :  { %v5886_v24 = vpack.c.bf16 %v1520_v21, %v1516_v20  ;;  %v1576_v20 = vld [vmem:[#allocation10 + $0x770] sm:$0xff]  ;;  %v1581_v21 = vld [vmem:[#allocation10 + $0x798] sm:$0xff] }
 0x266   :  { %1835 = vmatmul.mubr.f32.vlgmr.msra.gmra.mrb[8].mxu1 %v6889_v28 }
 0x267   :  { %5863 = vmatpush1.bf16.msra.mxu1 %v5862_v50  ;;  %1840 = vmatprep.mubr.f32.mxu1 %v6891_v36  ;;  %v701_v36 = vrot.slane %v6903_v32, %v700_v33  ;;  %v5888_v50 = vpack.c.bf16 %v1529_v26, %v1525_v25  ;;  %v5892_v33 = vpack.c.bf16 %v1537_v30, %v1533_v57 }
 0x268   :  { %5865 = vmatprep.subr.bf16.mxu1 %v5864_v27  ;;  %v1524_v27 = vld [vmem:[#allocation10 + $0x5d0] sm:$0xff] }
 0x269   :  { %v5890_v43 = vpack.c.bf16 %v1528_v29, %v1524_v27  ;;  %v1584_v27 = vld [vmem:[#allocation10 + $0x7b0] sm:$0xff]  ;;  %v1589_v29 = vld [vmem:[#allocation10 + $0x7d8] sm:$0xff] }
 0x26a   :  { %1841 = vmatmul.mubr.f32.gmra.mrb[10].mxu1 %v6895_v48  ;;  %v1492_v48 = vld [vmem:[#allocation10 + $0x4d0] sm:$0xff] }
 0x26b   :  { %5867 = vmatpush1.bf16.msra.mxu1 %v5866_v54  ;;  %1911 = vmatprep.mubr.f32.mxu1 %v6897_v53  ;;  %v5874_v41 = vpack.c.bf16 %v1496_v51, %v1492_v48  ;;  %v1501_v53 = vld [vmem:[#allocation10 + $0x518] sm:$0xff]  ;;  %v1532_v54 = vld [vmem:[#allocation10 + $0x610] sm:$0xff] }
 0x26c   :  { %5869 = vmatprep.subr.bf16.mxu1 %v5868_v31  ;;  %v5876_v61 = vpack.c.bf16 %v1505_v56, %v1501_v53  ;;  %v1561_v53 = vld [vmem:[#allocation10 + $0x6f8] sm:$0xff] }
 0x26f   :  { %5871 = vmatpush1.bf16.msra.mxu1 %v5870_v39 }
 0x270   :  { %5873 = vmatprep.subr.bf16.mxu1 %v5872_v47  ;;  %v1553_v47 = vld [vmem:[#allocation10 + $0x6b8] sm:$0xff] }
 0x273   :  { %5875 = vmatpush1.bf16.msra.mxu1 %v5874_v41  ;;  %v1552_v41 = vld [vmem:[#allocation10 + $0x6b0] sm:$0xff] }
 0x274   :  { %5877 = vmatprep.subr.bf16.mxu1 %v5876_v61  ;;  %v1556_v61 = vld [vmem:[#allocation10 + $0x6d0] sm:$0xff] }
 0x275   :  { %v6965_v18 = vpop.f32.mrb[0].mxu1  ;;  %v5906_v8 = vpack.c.bf16 %v1560_v62, %v1556_v61  ;;  %v7008_v61 = vld [vmem:[#allocation8] sm:$0xff] }
 0x276   :  { %v6967_v23 = vpop.f32.mrb[1].mxu1 }
 0x277   :  { %5879 = vmatpush1.bf16.msra.mxu1 %v5878_v4  ;;  %v1569_v4 = vld [vmem:[#allocation10 + $0x738] sm:$0xff] }
 0x278   :  { %5881 = vmatprep.subr.bf16.mxu1 %v5880_v12  ;;  %v5908_v9 = vpack.c.bf16 %v1569_v4, %v1565_v63  ;;  %v1564_v12 = vld [vmem:[#allocation10 + $0x710] sm:$0xff] }
 0x279   :  { %v6969_v31 = vpop.f32.mrb[2].mxu1  ;;  %v5910_v16 = vpack.c.bf16 %v1568_v13, %v1564_v12 }
 0x27a   :  { %v1173_v28 = vpop.f32.mrb[4].mxu0  ;;  %v6971_v39 = vpop.f32.mrb[3].mxu1 }
 0x27b   :  { %v1175_v45 = vpop.f32.mrb[5].mxu0  ;;  %v6945_v58 = vadd.f32 %v1173_v28, %v701_v36  ;;  %5883 = vmatpush1.bf16.msra.mxu1 %v5882_v40  ;;  %v5894_v28 = vpack.c.bf16 %v1536_v34, %v1532_v54  ;;  %v1577_v40 = vld [vmem:[#allocation10 + $0x778] sm:$0xff]  ;;  %v1588_v54 = vld [vmem:[#allocation10 + $0x7d0] sm:$0xff] }
 0x27c   :  { %v6949_v0 = vadd.f32 %v1175_v45, %v705_v52  ;;  %5885 = vmatprep.subr.bf16.mxu1 %v5884_v46  ;;  %v1549_v45 = vld [vmem:[#allocation10 + $0x698] sm:$0xff]  ;;  %v5912_v17 = vpack.c.bf16 %v1577_v40, %v1573_v14  ;;  %v1572_v46 = vld [vmem:[#allocation10 + $0x750] sm:$0xff] }
 0x27d   :  { %v5900_v51 = vpack.c.bf16 %v1553_v47, %v1549_v45  ;;  %v5914_v25 = vpack.c.bf16 %v1576_v20, %v1572_v46 }
 0x27e   :  { %v1179_v55 = vpop.f32.mrb[6].mxu0 }
 0x27f   :  { %v6947_v59 = vadd.f32 %v1179_v55, %v701_v36  ;;  %v1181_v60 = vpop.f32.mrb[7].mxu0  ;;  %5887 = vmatpush1.bf16.msra.mxu1 %v5886_v24  ;;  %v1544_v36 = vld [vmem:[#allocation10 + $0x670] sm:$0xff]  ;;  %v1557_v55 = vld [vmem:[#allocation10 + $0x6d8] sm:$0xff] }
 0x280   :  { %v6951_v1 = vadd.f32 %v1181_v60, %v705_v52  ;;  %5889 = vmatprep.subr.bf16.mxu1 %v5888_v50  ;;  %v5898_v48 = vpack.c.bf16 %v1544_v36, %v1540_v44  ;;  %v1548_v52 = vld [vmem:[#allocation10 + $0x690] sm:$0xff]  ;;  %v5904_v60 = vpack.c.bf16 %v1561_v53, %v1557_v55  ;;  %v1585_v24 = vld [vmem:[#allocation10 + $0x7b8] sm:$0xff]  ;;  %v1603_v36 = vrot.slane %v1594_v37, %v688_v38 }
 0x281   :  { %v6955_v32 = vpack.c.bf16 %v6947_v59, %v6945_v58  ;;  %v6284_v5 = vpack.i.bf16 %v6947_v59, %v6945_v58  ;;  %v5902_v56 = vpack.c.bf16 %v1552_v41, %v1548_v52  ;;  %v5916_v26 = vpack.c.bf16 %v1585_v24, %v1581_v21  ;;  %v1580_v50 = vld [vmem:[#allocation10 + $0x790] sm:$0xff] }
 0x282   :  { %v6961_v6 = vpack.c.bf16 %v6951_v1, %v6949_v0  ;;  %v6294_v10 = vpack.i.bf16 %v6951_v1, %v6949_v0  ;;  %v5918_v57 = vpack.c.bf16 %v1584_v27, %v1580_v50  ;;  %v708_v53 = vsub.s32 6, %v6901_v22  ;;  %v2124_v58 = vld [vmem:[#allocation13 + $0x8] sm:$0xff] }
 0x283   :  { %5891 = vmatpush1.bf16.msra.mxu1 %v5890_v43  ;;  %v1593_v43 = vld [vmem:[#allocation10 + $0x7f8] sm:$0xff]  ;;  %v692_v50 = vsub.s32 2, %v6901_v22  ;;  %v696_v27 = vsub.s32 3, %v6901_v22  ;;  %v2718_v0 = vld [vmem:[#allocation13 + $0x88] sm:$0xff] }
 0x284   :  { %5893 = vmatprep.subr.bf16.mxu1 %v5892_v33  ;;  %v5920_v30 = vpack.c.bf16 %v1593_v43, %v1589_v29  ;;  %v1592_v33 = vld [vmem:[#allocation10 + $0x7f0] sm:$0xff]  ;;  %v709_v62 = vrot.slane %v7008_v61, %v708_v53 }
 0x285   :  { %v5922_v34 = vpack.c.bf16 %v1592_v33, %v1588_v54  ;;  %v1607_v29 = vrot.slane %v1594_v37, %v692_v50 }
 0x287   :  { %5895 = vmatpush1.bf16.msra.mxu1 %v5894_v28 }
 0x288   :  { %5897 = vmatprep.subr.bf16.mxu1 %v5896_v42  ;;  %v1599_v42 = vrot.slane %v1594_v37, %v684_v35 }
 0x28b   :  { %5899 = vmatpush1.bf16.msra.mxu1 %v5898_v48 }
 0x28c   :  { %5901 = vmatprep.subr.bf16.mxu1 %v5900_v51 }
 0x28f   :  { %5903 = vmatpush1.bf16.msra.mxu1 %v5902_v56  ;;  %v712_v56 = vsub.s32 7, %v6901_v22  ;;  %v3312_v22 = vld [vmem:[#allocation13 + $0x100] sm:$0xff] }
 0x290   :  { %5905 = vmatprep.subr.bf16.mxu1 %v5904_v60 }
 0x291   :  { %v713_v4 = vrot.slane %v7008_v61, %v712_v56 }
 0x293   :  { %5907 = vmatpush1.bf16.msra.mxu1 %v5906_v8 }
 0x294   :  { %5909 = vmatprep.subr.bf16.mxu1 %v5908_v9 }
 0x297   :  { %5911 = vmatpush1.bf16.msra.mxu1 %v5910_v16 }
 0x298   :  { %5913 = vmatprep.subr.bf16.mxu1 %v5912_v17 }
 0x29b   :  { %5915 = vmatpush1.bf16.msra.mxu1 %v5914_v25 }
 0x29c   :  { %5917 = vmatprep.subr.bf16.mxu1 %v5916_v26 }
 0x29f   :  { %5919 = vmatpush1.bf16.msra.mxu1 %v5918_v57  ;;  %v1611_v57 = vrot.slane %v1594_v37, %v696_v27 }
 0x2a0   :  { %5921 = vmatprep.subr.bf16.mxu1 %v5920_v30 }
 0x2a3   :  { %5923 = vmatpush1.bf16.msra.mxu1 %v5922_v34 }
 0x2a6   :  { %1912 = vmatmul.mubr.f32.vlgmr.msra.gmra.mrb[8].mxu1 %v6922_v7 }
 0x2a7   :  { %1917 = vmatprep.mubr.f32.mxu1 %v6924_v11 }
 0x2aa   :  { %1918 = vmatmul.mubr.f32.gmra.mrb[10].mxu1 %v6928_v15 }
 0x2f9   :  { %v1327_v63 = vpop.f32.mrb[4].mxu1 }
 0x2fa   :  { %v1759_v28 = vpop.f32.mrb[8].mxu0  ;;  %v1329_v8 = vpop.f32.mrb[5].mxu1  ;;  %v7017_v9 = vadd.f32 %v1327_v63, %v709_v62 }
 0x2fb   :  { %v1761_v44 = vpop.f32.mrb[9].mxu0  ;;  %v6228_v47 = vadd.f32 %v1759_v28, %v1599_v42  ;;  %v7019_v12 = vadd.f32 %v1329_v8, %v713_v4 }
 0x2fc   :  { %v6981_v7 = vadd.f32 %v1761_v44, %v1603_v36 }
 0x2fd   :  { %v1333_v13 = vpop.f32.mrb[6].mxu1 }
 0x2fe   :  { %v1765_v45 = vpop.f32.mrb[10].mxu0  ;;  %v7021_v14 = vadd.f32 %v1333_v13, %v709_v62  ;;  %v1335_v40 = vpop.f32.mrb[7].mxu1 }
 0x2ff   :  { %v6230_v48 = vadd.f32 %v1765_v45, %v1599_v42  ;;  %v1767_v51 = vpop.f32.mrb[11].mxu0  ;;  %v7025_v16 = vadd.f32 %v1335_v40, %v713_v4 }
 0x300   :  { %v6983_v11 = vadd.f32 %v1767_v51, %v1603_v36  ;;  %v6304_v46 = vpack.i.bf16 %v7021_v14, %v7017_v9 }
 0x301   :  { %v5924_v35 = vpack.c.bf16 %v6230_v48, %v6228_v47  ;;  %v6279_v52 = vpack.i.bf16 %v6230_v48, %v6228_v47  ;;  %v7036_v17 = vpack.c.bf16 %v7025_v16, %v7019_v12 }
 0x302   :  { %v6993_v41 = vpack.c.bf16 %v6983_v11, %v6981_v7  ;;  %v6289_v60 = vpack.i.bf16 %v6983_v11, %v6981_v7  ;;  %v2424_v11 = vld [vmem:[#allocation13 + $0x40] sm:$0xff] }
 0x303   :  { %6280 = vrot.lane.b32.xlu0 %v6279_v52, %s6659_s27  ;;  %5926 = vmatprep.subr.msk.bf16.mxu0 %vm6987_vm2, %v5924_v35 }
 0x304   :  { %5929 = vmatpush3.bf16.xpose.msk.msra.mxu0 %vm6987_vm2, %v5924_v35 }
 0x305   :  { %5932 = vmatprep.subr.msk.bf16.mxu0 %vm6995_vm4, %v6955_v32 }
 0x307   :  { %2219 = vrot.lane.b32.xlu0 %v6932_v19, %s6659_s27  ;;  %v7032_v19 = vpack.c.bf16 %v7021_v14, %v7017_v9 }
 0x30b   :  { %4897 = vmatmul.mubr.msk.f32.vlgmr.msra.gmra.mrb[12].mxu0 %vm1924_vm0, %v6916_v2  ;;  %v6314_v2 = vpack.i.bf16 %v7025_v16, %v7019_v12  ;;  %v4211_v16 = vld [vmem:[#allocation13 + $0x1d0] sm:$0xff] }
 0x30c   :  { %5935 = vmatpush3.bf16.msk.msra.mxu0 %vm6995_vm4, %v6955_v32  ;;  %v2222_v32 = vpop.permute.xlu1 %2221 }
 0x375   :  { %v6281_v20 = vpop.permute.xlu0 %6280 }
 0x376   :  { %v6283_v21 = vunpack.i.h.bf16 %v6281_v20  ;;  %v6282_v24 = vunpack.i.l.bf16 %v6281_v20 }
 0x378   :  { %v5952_v25 = vpack.c.bf16 %v6283_v21, %v6282_v24 }
 0x379   :  { %v2220_v26 = vpop.permute.xlu0 %2219  ;;  %v1913_v43 = vpop.f32.mrb[8].mxu1 }
 0x37a   :  { %5954 = vmatprep.subr.msk.bf16.mxu1 %vm6987_vm2, %v5952_v25  ;;  %4929 = vmatprep.mubr.msk.f32.mxu1 %vm1924_vm0, %v2220_v26  ;;  %v1915_v30 = vpop.f32.mrb[9].mxu1  ;;  %v7054_v54 = vadd.f32 %v1913_v43, %v1607_v29 }
 0x37b   :  { %5957 = vmatpush3.bf16.xpose.msk.msra.mxu1 %vm6987_vm2, %v5952_v25  ;;  %v7056_v33 = vadd.f32 %v1915_v30, %v1611_v57 }
 0x37d   :  { %v1919_v34 = vpop.f32.mrb[10].mxu1 }
 0x37e   :  { %v7058_v28 = vadd.f32 %v1919_v34, %v1607_v29  ;;  %v1921_v42 = vpop.f32.mrb[11].mxu1 }
 0x37f   :  { %v7060_v44 = vadd.f32 %v1921_v42, %v1611_v57 }
 0x380   :  { %v7064_v36 = vpack.c.bf16 %v7058_v28, %v7054_v54  ;;  %v6299_v37 = vpack.i.bf16 %v7058_v28, %v7054_v54 }
 0x381   :  { %v7068_v45 = vpack.c.bf16 %v7060_v44, %v7056_v33  ;;  %v6309_v47 = vpack.i.bf16 %v7060_v44, %v7056_v33 }
 0x382   :  { %4930 = vmatmul.mubr.msk.f32.vlgmr.msra.gmra.mrb[12].mxu1 %vm1924_vm0, %v2222_v32 }
 0x3de   :  { %v4898_v48 = vpop.f32.mrb[12].mxu0 }
 0x3df   :  { %v2003_v51 = vpop.f32.mrb[13].mxu0  ;;  %v2013_v4 = vmul.f32 0.125, %v4898_v48 }
 0x3e0   :  { %v2012_v62 = vmul.f32 0.125, %v2003_v51 }
 0x3e1   :  { %v2019_v40 = vsel %vm2018_vm5, %v2013_v4, -inf }
 0x3e2   :  { %v2015_v13 = vsel %vm2014_vm6, %v2012_v62, -inf }
 0x455   :  { %v4931_v35 = vpop.f32.mrb[12].mxu1 }
 0x456   :  { %v2311_v52 = vmul.f32 0.125, %v4931_v35  ;;  %v2301_v53 = vpop.f32.mrb[13].mxu1 }
 0x457   :  { %v2310_v56 = vmul.f32 0.125, %v2301_v53 }
 0x458   :  { %v2315_v63 = vsel %vm2018_vm5, %v2311_v52, -inf }
 0x459   :  { %2316 = vmax.xlane.f32.xlu0 %v2315_v63  ;;  %v2312_v8 = vsel %vm2014_vm6, %v2310_v56, -inf }
 0x45a   :  { %2313 = vmax.xlane.f32.xlu1 %v2312_v8 }
 0x45d   :  { %2016 = vmax.xlane.f32.xlu0 %v2015_v13 }
 0x45e   :  { %2020 = vmax.xlane.f32.xlu1 %v2019_v40 }
 0x4e6   :  { %v2317_v20 = vpop.xlane.xlu0 %2316 }
 0x4e7   :  { %v2319_v21 = vsub.f32 %v2311_v52, %v2317_v20  ;;  %v2314_v24 = vpop.xlane.xlu1 %2313 }
 0x4e8   :  { %v2318_v25 = vsub.f32 %v2310_v56, %v2314_v24 }
 0x4e9   :  { %v2322_v26 = vmul.f32 1.442695, %v2319_v21 }
 0x4ea   :  { %v2320_v32 = vmul.f32 1.442695, %v2318_v25  ;;  %v2017_v29 = vpop.xlane.xlu0 %2016 }
 0x4eb   :  { %6339 = vpow2.f32 %v2322_v26  ;;  %v2022_v43 = vsub.f32 %v2012_v62, %v2017_v29  ;;  %v2021_v57 = vpop.xlane.xlu1 %2020  ;;  %v2427_v29 = vld [vmem:[#allocation13 + $0x58] sm:$0xff] }
 0x4ec   :  { %6341 = vpow2.f32 %v2320_v32  ;;  %v2023_v30 = vsub.f32 %v2013_v4, %v2021_v57  ;;  %v689_v4 = vrot.slane %v7008_v61, %v688_v38  ;;  %v2123_v38 = vld [vmem:[#allocation13] sm:$0xff]  ;;  %v2426_v32 = vld [vmem:[#allocation13 + $0x50] sm:$0xff] }
 0x4ed   :  { %v2024_v34 = vmul.f32 1.442695, %v2022_v43  ;;  %v5936_v59 = vpack.c.bf16 %v2124_v58, %v2123_v38 }
 0x4ee   :  { %v2026_v42 = vmul.f32 1.442695, %v2023_v30  ;;  %v7090_v8 = vadd.f32 %v6908_v49, %v689_v4  ;;  %v7099_v13 = vadd.f32 %v6918_v3, %v689_v4  ;;  %v2126_v4 = vld [vmem:[#allocation13 + $0x18] sm:$0xff] }
 0x4ef   :  { %6343 = vpow2.f32 %v2024_v34  ;;  %5937 = vmatprep.subr.bf16.mxu0 %v5936_v59  ;;  %v5968_v34 = vpack.c.bf16 %v2427_v29, %v2426_v32 }
 0x4f0   :  { %6345 = vpow2.f32 %v2026_v42 }
 0x4f5   :  { %v6340_v48 = vpop.eup %6339 }
 0x4f6   :  { %v6342_v51 = vpop.eup %6341  ;;  %v2327_v35 = vsel %vm2018_vm5, %v6340_v48, 0.0 }
 0x4f7   :  { %2328 = vadd.xlane.f32.xlu1 %v2327_v35  ;;  %v2324_v52 = vsel %vm2014_vm6, %v6342_v51, 0.0  ;;  %v2428_v35 = vld [vmem:[#allocation13 + $0x60] sm:$0xff] }
 0x4f8   :  { %2325 = vadd.xlane.f32.xlu0 %v2324_v52  ;;  %v2429_v52 = vld [vmem:[#allocation13 + $0x68] sm:$0xff] }
 0x4f9   :  { %v6344_v53 = vpop.eup %6343  ;;  %v5972_v38 = vpack.c.bf16 %v2429_v52, %v2428_v35 }
 0x4fa   :  { %v2028_v56 = vsel %vm2014_vm6, %v6344_v53, 0.0  ;;  %v6346_v63 = vpop.eup %6345 }
 0x4fb   :  { %2029 = vadd.xlane.f32.xlu1 %v2028_v56  ;;  %v2031_v62 = vsel %vm2018_vm5, %v6346_v63, 0.0 }
 0x4ff   :  { %2032 = vadd.xlane.f32.xlu1 %v2031_v62  ;;  %v2125_v62 = vld [vmem:[#allocation13 + $0x10] sm:$0xff] }
 0x50e   :  { %6285 = vrot.lane.b32.xlu0 %v6284_v5, %s6659_s27 }
 0x510   :  { %6290 = vrot.lane.b32.xlu1 %v6289_v60, %s6659_s27  ;;  %v2425_v60 = vld [vmem:[#allocation13 + $0x48] sm:$0xff] }
 0x511   :  { %v5964_v25 = vpack.c.bf16 %v2425_v60, %v2424_v11  ;;  %v2128_v11 = vld [vmem:[#allocation13 + $0x28] sm:$0xff] }
 0x512   :  { %2814 = vrot.lane.b32.xlu0 %v7090_v8, %s6659_s27 }
 0x516   :  { %2816 = vrot.lane.b32.xlu0 %v7099_v13, %s6659_s27 }
 0x584   :  { %v2329_v49 = vpop.xlane.xlu1 %2328 }
 0x585   :  { %6347 = vrcp.f32 %v2329_v49  ;;  %v2326_v5 = vpop.xlane.xlu0 %2325  ;;  %v2430_v49 = vld [vmem:[#allocation13 + $0x70] sm:$0xff] }
 0x586   :  { %6349 = vrcp.f32 %v2326_v5  ;;  %v5940_v5 = vpack.c.bf16 %v2126_v4, %v2125_v62 }
 0x588   :  { %v2030_v40 = vpop.xlane.xlu1 %2029 }
 0x589   :  { %6351 = vrcp.f32 %v2030_v40  ;;  %v6286_v7 = vpop.permute.xlu0 %6285 }
 0x58a   :  { %v6288_v20 = vunpack.i.h.bf16 %v6286_v7  ;;  %v6287_v21 = vunpack.i.l.bf16 %v6286_v7  ;;  %v2127_v7 = vld [vmem:[#allocation13 + $0x20] sm:$0xff] }
 0x58c   :  { %v5958_v3 = vpack.c.bf16 %v6288_v20, %v6287_v21  ;;  %v2033_v24 = vpop.xlane.xlu1 %2032  ;;  %v5944_v21 = vpack.c.bf16 %v2128_v11, %v2127_v7 }
 0x58d   :  { %6353 = vrcp.f32 %v2033_v24  ;;  %v2130_v24 = vld [vmem:[#allocation13 + $0x38] sm:$0xff]  ;;  %v2815_v32 = vpop.permute.xlu0 %2814 }
 0x58e   :  { %5960 = vmatprep.subr.msk.bf16.mxu1 %vm6995_vm4, %v5958_v3 }
 0x58f   :  { %v6348_v26 = vpop.eup %6347  ;;  %5963 = vmatpush3.bf16.msk.msra.mxu1 %vm6995_vm4, %v5958_v3  ;;  %v2129_v3 = vld [vmem:[#allocation13 + $0x30] sm:$0xff] }
 0x590   :  { %v6350_v43 = vpop.eup %6349  ;;  %5965 = vmatprep.subr.bf16.mxu1 %v5964_v25  ;;  %v2333_v30 = vmul.f32 %v6348_v26, %v6340_v48  ;;  %v6291_v40 = vpop.permute.xlu1 %6290 }
 0x591   :  { %v2332_v57 = vmul.f32 %v6350_v43, %v6342_v51  ;;  %v2431_v51 = vld [vmem:[#allocation13 + $0x78] sm:$0xff]  ;;  %v6293_v60 = vunpack.i.h.bf16 %v6291_v40  ;;  %v6292_v20 = vunpack.i.l.bf16 %v6291_v40 }
 0x593   :  { %v6352_v42 = vpop.eup %6351  ;;  %4936 = vmatprep.mubr.msk.f32.mxu1 %vm2014_vm6, %v2332_v57  ;;  %v2817_v57 = vpop.permute.xlu0 %2816 }
 0x594   :  { %4937 = vmatmul.mubr.msk.f32.vlgmr.msra.gmra.mrb[14].mxu1 %vm2014_vm6, %v2333_v30  ;;  %v2036_v56 = vmul.f32 %v6352_v42, %v6344_v53  ;;  %v5976_v53 = vpack.c.bf16 %v2431_v51, %v2430_v49  ;;  %v7137_v30 = vld [vmem:[#allocation14 + $0x1] ss:$0 sm:$0xff]  ;;  %v7144_v42 = vld [vmem:[#allocation14] ss:$0 sm:$0xff] }
 0x595   :  { %5967 = vmatpush3.bf16.msra.mxu1 %v5964_v25  ;;  %v5948_v25 = vpack.c.bf16 %v2130_v24, %v2129_v3 }
 0x596   :  { %4903 = vmatprep.mubr.msk.f32.mxu0 %vm2014_vm6, %v2036_v56  ;;  %5969 = vmatprep.subr.bf16.mxu1 %v5968_v34 }
 0x597   :  { %v6354_v58 = vpop.eup %6353 }
 0x598   :  { %v2037_v48 = vmul.f32 %v6354_v58, %v6346_v63  ;;  %v6008_v63 = vpack.c.bf16 %v6293_v60, %v6292_v20 }
 0x599   :  { %5971 = vmatpush3.bf16.msra.mxu1 %v5968_v34 }
 0x59a   :  { %4904 = vmatmul.mubr.msk.f32.vlgmr.msra.gmra.mrb[14].mxu0 %vm2014_vm6, %v2037_v48  ;;  %5973 = vmatprep.subr.bf16.mxu1 %v5972_v38 }
 0x59b   :  { %5939 = vmatpush3.bf16.msra.mxu0 %v5936_v59 }
 0x59c   :  { %5941 = vmatprep.subr.bf16.mxu0 %v5940_v5 }
 0x59d   :  { %5975 = vmatpush3.bf16.msra.mxu1 %v5972_v38 }
 0x59e   :  { %5977 = vmatprep.subr.bf16.mxu1 %v5976_v53 }
 0x59f   :  { %5943 = vmatpush3.bf16.msra.mxu0 %v5940_v5 }
 0x5a0   :  { %5945 = vmatprep.subr.bf16.mxu0 %v5944_v21 }
 0x5a1   :  { %5979 = vmatpush3.bf16.msra.mxu1 %v5976_v53 }
 0x5a2   :  { %6010 = vmatprep.subr.msk.bf16.mxu1 %vm6987_vm2, %v6008_v63 }
 0x5a3   :  { %5947 = vmatpush3.bf16.msra.mxu0 %v5944_v21 }
 0x5a4   :  { %5949 = vmatprep.subr.bf16.mxu0 %v5948_v25 }
 0x5a7   :  { %5951 = vmatpush3.bf16.msra.mxu0 %v5948_v25 }
 0x5a8   :  { %5982 = vmatprep.subr.msk.bf16.mxu0 %vm6987_vm2, %v6993_v41 }
 0x667   :  { %v4938_v59 = vpop.f32.mrb[14].mxu1 }
 0x668   :  { %v2414_v26 = vpop.f32.mrb[15].mxu1 }
 0x669   :  { %4955 = vmatprep.mubr.msk.f32.mxu1 %vm1924_vm0, %v2414_v26 }
 0x66a   :  { %4956 = vmatmul.mubr.msk.f32.vlgmr.msra.gmra.mrb[16].mxu1 %vm1924_vm0, %v4938_v59 }
 0x66b   :  { %6013 = vmatpush3.bf16.xpose.msk.msra.mxu1 %vm6987_vm2, %v6008_v63  ;;  %4995 = vmatprep.mubr.msk.f32.mxu1 %vm1924_vm0, %v2815_v32 }
 0x66d   :  { %v4905_v29 = vpop.f32.mrb[14].mxu0 }
 0x66e   :  { %v2114_v43 = vpop.f32.mrb[15].mxu0 }
 0x66f   :  { %4922 = vmatprep.mubr.msk.f32.mxu0 %vm1924_vm0, %v2114_v43 }
 0x670   :  { %4923 = vmatmul.mubr.msk.f32.vlgmr.msra.gmra.mrb[16].mxu0 %vm1924_vm0, %v4905_v29 }
 0x671   :  { %5985 = vmatpush3.bf16.xpose.msk.msra.mxu0 %vm6987_vm2, %v6993_v41  ;;  %4962 = vmatprep.mubr.msk.f32.mxu0 %vm1924_vm0, %v7090_v8 }
 0x672   :  { %5988 = vmatprep.subr.msk.bf16.mxu0 %vm6995_vm4, %v6961_v6  ;;  %4996 = vmatmul.mubr.msk.f32.vlgmr.msra.gmra.mrb[18].mxu1 %vm1924_vm0, %v2817_v57 }
 0x678   :  { %4963 = vmatmul.mubr.msk.f32.vlgmr.msra.gmra.mrb[18].mxu0 %vm1924_vm0, %v7099_v13 }
 0x679   :  { %5991 = vmatpush3.bf16.msk.msra.mxu0 %vm6995_vm4, %v6961_v6 }
 0x73d   :  { %v4957_v34 = vpop.f32.mrb[16].mxu1 }
 0x73e   :  { %v7140_v41 = vadd.f32 %v4957_v34, %v7137_v30  ;;  %v7142_v8 = vpop.f32.mrb[17].mxu1 }
 0x743   :  { %v4924_v35 = vpop.f32.mrb[16].mxu0 }
 0x744   :  { %v7147_v52 = vadd.f32 %v4924_v35, %v7144_v42  ;;  %v7149_v56 = vpop.f32.mrb[17].mxu0 }
 0x745   :  { %v4997_v13 = vpop.f32.mrb[18].mxu1 }
 0x746   :  { %v2906_v62 = vmul.f32 0.125, %v4997_v13  ;;  %v2896_v4 = vpop.f32.mrb[19].mxu1 }
 0x747   :  { %v2905_v6 = vmul.f32 0.125, %v2896_v4 }
 0x748   :  { %v2910_v38 = vsel %vm2018_vm5, %v2906_v62, -inf }
 0x749   :  { %2911 = vmax.xlane.f32.xlu0 %v2910_v38  ;;  %v2907_v58 = vsel %vm2014_vm6, %v2905_v6, -inf }
 0x74a   :  { %2908 = vmax.xlane.f32.xlu1 %v2907_v58 }
 0x74b   :  { %v4964_v49 = vpop.f32.mrb[18].mxu0 }
 0x74c   :  { %v2609_v51 = vmul.f32 0.125, %v4964_v49  ;;  %v2599_v48 = vpop.f32.mrb[19].mxu0 }
 0x74d   :  { %v2608_v5 = vmul.f32 0.125, %v2599_v48  ;;  %v3020_v48 = vld [vmem:[#allocation13 + $0xc8] sm:$0xff] }
 0x74e   :  { %v2613_v40 = vsel %vm2018_vm5, %v2609_v51, -inf }
 0x74f   :  { %2614 = vmax.xlane.f32.xlu1 %v2613_v40  ;;  %v2610_v7 = vsel %vm2014_vm6, %v2608_v5, -inf }
 0x750   :  { %2611 = vmax.xlane.f32.xlu0 %v2610_v7 }
 0x7d6   :  { %v2912_v11 = vpop.xlane.xlu0 %2911 }
 0x7d7   :  { %v2914_v53 = vsub.f32 %v2906_v62, %v2912_v11  ;;  %v2909_v60 = vpop.xlane.xlu1 %2908  ;;  %v3021_v11 = vld [vmem:[#allocation13 + $0xd0] sm:$0xff] }
 0x7d8   :  { %v2913_v20 = vsub.f32 %v2905_v6, %v2909_v60  ;;  %v693_v6 = vrot.slane %v7008_v61, %v692_v50  ;;  %v2717_v50 = vld [vmem:[#allocation13 + $0x80] sm:$0xff] }
 0x7d9   :  { %v2917_v21 = vmul.f32 1.442695, %v2914_v53  ;;  %v5992_v1 = vpack.c.bf16 %v2718_v0, %v2717_v50  ;;  %v3022_v53 = vld [vmem:[#allocation13 + $0xd8] sm:$0xff] }
 0x7da   :  { %v2915_v3 = vmul.f32 1.442695, %v2913_v20  ;;  %v7167_v38 = vadd.f32 %v6965_v18, %v693_v6  ;;  %v7176_v58 = vadd.f32 %v6969_v31, %v693_v6 }
 0x7db   :  { %6355 = vpow2.f32 %v2917_v21  ;;  %5993 = vmatprep.subr.bf16.mxu0 %v5992_v1 }
 0x7dc   :  { %6357 = vpow2.f32 %v2915_v3  ;;  %v2615_v24 = vpop.xlane.xlu1 %2614  ;;  %v6024_v3 = vpack.c.bf16 %v3022_v53, %v3021_v11 }
 0x7dd   :  { %v2617_v63 = vsub.f32 %v2609_v51, %v2615_v24  ;;  %v2612_v25 = vpop.xlane.xlu0 %2611  ;;  %v3019_v51 = vld [vmem:[#allocation13 + $0xc0] sm:$0xff] }
 0x7de   :  { %v2616_v59 = vsub.f32 %v2608_v5, %v2612_v25  ;;  %v6020_v31 = vpack.c.bf16 %v3020_v48, %v3019_v51  ;;  %v3023_v24 = vld [vmem:[#allocation13 + $0xe0] sm:$0xff]  ;;  %v2723_v48 = vld [vmem:[#allocation13 + $0xb0] sm:$0xff] }
 0x7df   :  { %v2620_v26 = vmul.f32 1.442695, %v2617_v63  ;;  %v3024_v63 = vld [vmem:[#allocation13 + $0xe8] sm:$0xff] }
 0x7e0   :  { %v2618_v32 = vmul.f32 1.442695, %v2616_v59  ;;  %v6028_v59 = vpack.c.bf16 %v3024_v63, %v3023_v24 }
 0x7e2   :  { %6359 = vpow2.f32 %v2618_v32  ;;  %v3025_v32 = vld [vmem:[#allocation13 + $0xf0] sm:$0xff] }
 0x7e3   :  { %6361 = vpow2.f32 %v2620_v26 }
 0x7e5   :  { %v6356_v29 = vpop.eup %6355 }
 0x7e6   :  { %v6358_v43 = vpop.eup %6357  ;;  %v2922_v57 = vsel %vm2018_vm5, %v6356_v29, 0.0 }
 0x7e7   :  { %2923 = vadd.xlane.f32.xlu1 %v2922_v57  ;;  %v2919_v34 = vsel %vm2014_vm6, %v6358_v43, 0.0  ;;  %v3026_v57 = vld [vmem:[#allocation13 + $0xf8] sm:$0xff] }
 0x7e8   :  { %2920 = vadd.xlane.f32.xlu0 %v2919_v34  ;;  %v2719_v34 = vld [vmem:[#allocation13 + $0x90] sm:$0xff] }
 0x7ec   :  { %v6360_v35 = vpop.eup %6359 }
 0x7ed   :  { %v2622_v13 = vsel %vm2014_vm6, %v6360_v35, 0.0  ;;  %v6362_v62 = vpop.eup %6361 }
 0x7ee   :  { %2623 = vadd.xlane.f32.xlu1 %v2622_v13  ;;  %v2625_v4 = vsel %vm2018_vm5, %v6362_v62, 0.0  ;;  %v2720_v13 = vld [vmem:[#allocation13 + $0x98] sm:$0xff] }
 0x7ef   :  { %v5996_v50 = vpack.c.bf16 %v2720_v13, %v2719_v34 }
 0x7f2   :  { %2626 = vadd.xlane.f32.xlu1 %v2625_v4 }
 0x7fe   :  { %6295 = vrot.lane.b32.xlu0 %v6294_v10, %s6659_s27 }
 0x802   :  { %3409 = vrot.lane.b32.xlu0 %v7167_v38, %s6659_s27 }
 0x803   :  { %6300 = vrot.lane.b32.xlu1 %v6299_v37, %s6659_s27 }
 0x806   :  { %3411 = vrot.lane.b32.xlu0 %v7176_v58, %s6659_s27 }
 0x874   :  { %v2924_v10 = vpop.xlane.xlu1 %2923 }
 0x875   :  { %6363 = vrcp.f32 %v2924_v10  ;;  %v2921_v18 = vpop.xlane.xlu0 %2920 }
 0x876   :  { %6365 = vrcp.f32 %v2921_v18  ;;  %v2721_v18 = vld [vmem:[#allocation13 + $0xa0] sm:$0xff] }
 0x879   :  { %v6296_v49 = vpop.permute.xlu0 %6295 }
 0x87a   :  { %v6298_v5 = vunpack.i.h.bf16 %v6296_v49  ;;  %v6297_v54 = vunpack.i.l.bf16 %v6296_v49  ;;  %v2722_v49 = vld [vmem:[#allocation13 + $0xa8] sm:$0xff] }
 0x87b   :  { %v2624_v28 = vpop.xlane.xlu1 %2623 }
 0x87c   :  { %v6014_v37 = vpack.c.bf16 %v6298_v5, %v6297_v54  ;;  %6367 = vrcp.f32 %v2624_v28  ;;  %v2724_v5 = vld [vmem:[#allocation13 + $0xb8] sm:$0xff] }
 0x87d   :  { %v3410_v28 = vpop.permute.xlu0 %3409 }
 0x87e   :  { %6016 = vmatprep.subr.msk.bf16.mxu1 %vm6995_vm4, %v6014_v37 }
 0x87f   :  { %v6364_v40 = vpop.eup %6363  ;;  %6019 = vmatpush3.bf16.msk.msra.mxu1 %vm6995_vm4, %v6014_v37  ;;  %v2627_v7 = vpop.xlane.xlu1 %2626 }
 0x880   :  { %v6366_v60 = vpop.eup %6365  ;;  %6369 = vrcp.f32 %v2627_v7  ;;  %6021 = vmatprep.subr.bf16.mxu1 %v6020_v31  ;;  %v2928_v21 = vmul.f32 %v6364_v40, %v6356_v29  ;;  %v4628_v7 = vld [vmem:[#allocation14 + $0x3] ss:$0 sm:$0xff] }
 0x881   :  { %v2927_v20 = vmul.f32 %v6366_v60, %v6358_v43  ;;  %v6032_v43 = vpack.c.bf16 %v3026_v57, %v3025_v32 }
 0x883   :  { %5002 = vmatprep.mubr.msk.f32.mxu1 %vm2014_vm6, %v2927_v20  ;;  %v6301_v4 = vpop.permute.xlu1 %6300 }
 0x884   :  { %5003 = vmatmul.mubr.msk.f32.vlgmr.msra.gmra.mrb[20].mxu1 %vm2014_vm6, %v2928_v21  ;;  %v6303_v0 = vunpack.i.h.bf16 %v6301_v4  ;;  %v6302_v10 = vunpack.i.l.bf16 %v6301_v4  ;;  %v7226_v21 = vld [vmem:[#allocation14 + $0x2] ss:$0 sm:$0xff] }
 0x885   :  { %6023 = vmatpush3.bf16.msra.mxu1 %v6020_v31  ;;  %v3412_v31 = vpop.permute.xlu0 %3411 }
 0x886   :  { %v6368_v25 = vpop.eup %6367  ;;  %6025 = vmatprep.subr.bf16.mxu1 %v6024_v3  ;;  %v6064_v51 = vpack.c.bf16 %v6303_v0, %v6302_v10 }
 0x887   :  { %v2630_v26 = vmul.f32 %v6368_v25, %v6360_v35  ;;  %v6000_v35 = vpack.c.bf16 %v2722_v49, %v2721_v18 }
 0x889   :  { %6027 = vmatpush3.bf16.msra.mxu1 %v6024_v3  ;;  %4969 = vmatprep.mubr.msk.f32.mxu0 %vm2014_vm6, %v2630_v26 }
 0x88a   :  { %v6370_v29 = vpop.eup %6369  ;;  %6029 = vmatprep.subr.bf16.mxu1 %v6028_v59 }
 0x88b   :  { %v2631_v6 = vmul.f32 %v6370_v29, %v6362_v62  ;;  %v6004_v62 = vpack.c.bf16 %v2724_v5, %v2723_v48 }
 0x88d   :  { %6031 = vmatpush3.bf16.msra.mxu1 %v6028_v59  ;;  %4970 = vmatmul.mubr.msk.f32.vlgmr.msra.gmra.mrb[20].mxu0 %vm2014_vm6, %v2631_v6 }
 0x88e   :  { %5995 = vmatpush3.bf16.msra.mxu0 %v5992_v1  ;;  %6033 = vmatprep.subr.bf16.mxu1 %v6032_v43 }
 0x88f   :  { %5997 = vmatprep.subr.bf16.mxu0 %v5996_v50 }
 0x891   :  { %6035 = vmatpush3.bf16.msra.mxu1 %v6032_v43 }
 0x892   :  { %5999 = vmatpush3.bf16.msra.mxu0 %v5996_v50  ;;  %6066 = vmatprep.subr.msk.bf16.mxu1 %vm6987_vm2, %v6064_v51 }
 0x893   :  { %6001 = vmatprep.subr.bf16.mxu0 %v6000_v35 }
 0x896   :  { %6003 = vmatpush3.bf16.msra.mxu0 %v6000_v35 }
 0x897   :  { %6005 = vmatprep.subr.bf16.mxu0 %v6004_v62 }
 0x89a   :  { %6007 = vmatpush3.bf16.msra.mxu0 %v6004_v62 }
 0x89b   :  { %6038 = vmatprep.subr.msk.bf16.mxu0 %vm6987_vm2, %v7064_v36 }
 0x957   :  { %v5004_v1 = vpop.f32.mrb[20].mxu1 }
 0x958   :  { %v3009_v54 = vpop.f32.mrb[21].mxu1 }
 0x959   :  { %5021 = vmatprep.mubr.msk.f32.mxu1 %vm1924_vm0, %v3009_v54 }
 0x95a   :  { %5022 = vmatmul.mubr.msk.f32.vlgmr.msra.gmra.mrb[22].mxu1 %vm1924_vm0, %v5004_v1 }
 0x95b   :  { %6069 = vmatpush3.bf16.xpose.msk.msra.mxu1 %vm6987_vm2, %v6064_v51  ;;  %5061 = vmatprep.mubr.msk.f32.mxu1 %vm1924_vm0, %v3410_v28 }
 0x960   :  { %v4971_v37 = vpop.f32.mrb[20].mxu0 }
 0x961   :  { %v2707_v40 = vpop.f32.mrb[21].mxu0 }
 0x962   :  { %5062 = vmatmul.mubr.msk.f32.vlgmr.msra.gmra.mrb[24].mxu1 %vm1924_vm0, %v3412_v31  ;;  %4988 = vmatprep.mubr.msk.f32.mxu0 %vm1924_vm0, %v2707_v40 }
 0x963   :  { %4989 = vmatmul.mubr.msk.f32.vlgmr.msra.gmra.mrb[22].mxu0 %vm1924_vm0, %v4971_v37 }
 0x964   :  { %6041 = vmatpush3.bf16.xpose.msk.msra.mxu0 %vm6987_vm2, %v7064_v36  ;;  %5028 = vmatprep.mubr.msk.f32.mxu0 %vm1924_vm0, %v7167_v38  ;;  %v7218_v36 = vadd.f32 %v7137_v30, %v7142_v8 }
 0x965   :  { %6044 = vmatprep.subr.msk.bf16.mxu0 %vm6995_vm4, %v7032_v19 }
 0x96b   :  { %5029 = vmatmul.mubr.msk.f32.vlgmr.msra.gmra.mrb[24].mxu0 %vm1924_vm0, %v7176_v58 }
 0x96c   :  { %6047 = vmatpush3.bf16.msk.msra.mxu0 %vm6995_vm4, %v7032_v19 }
 0xa2d   :  { %v5023_v11 = vpop.f32.mrb[22].mxu1 }
 0xa2e   :  { %v7214_v53 = vadd.f32 %v5023_v11, %v4628_v7  ;;  %v3107_v60 = vpop.f32.mrb[23].mxu1 }
 0xa2f   :  { %v7220_v38 = vadd.f32 %v4628_v7, %v3107_v60  ;;  %v697_v60 = vrot.slane %v7008_v61, %v696_v27  ;;  %v3313_v61 = vld [vmem:[#allocation13 + $0x108] sm:$0xff]  ;;  %v3614_v27 = vld [vmem:[#allocation13 + $0x140] sm:$0xff] }
 0xa30   :  { %v6329_v20 = vpack.i.bf16 %v7140_v41, %v7214_v53  ;;  %v6048_v9 = vpack.c.bf16 %v3313_v61, %v3312_v22  ;;  %v3319_v22 = vld [vmem:[#allocation13 + $0x138] sm:$0xff] }
 0xa31   :  { %v6319_v58 = vpack.i.bf16 %v7218_v36, %v7220_v38 }
 0xa32   :  { %6049 = vmatprep.subr.bf16.mxu0 %v6048_v9 }
 0xa35   :  { %v5063_v19 = vpop.f32.mrb[24].mxu1 }
 0xa36   :  { %v3501_v3 = vmul.f32 0.125, %v5063_v19  ;;  %v3491_v24 = vpop.f32.mrb[25].mxu1  ;;  %v4990_v63 = vpop.f32.mrb[22].mxu0  ;;  %v7249_v19 = vadd.f32 %v6967_v23, %v697_v60 }
 0xa37   :  { %v3500_v25 = vmul.f32 0.125, %v3491_v24  ;;  %v7229_v59 = vadd.f32 %v4990_v63, %v7226_v21  ;;  %v7231_v30 = vpop.f32.mrb[23].mxu0 }
 0xa38   :  { %v3505_v8 = vsel %vm2018_vm5, %v3501_v3, -inf }
 0xa39   :  { %3506 = vmax.xlane.f32.xlu0 %v3505_v8  ;;  %v3502_v26 = vsel %vm2014_vm6, %v3500_v25, -inf }
 0xa3a   :  { %3503 = vmax.xlane.f32.xlu1 %v3502_v26  ;;  %v3617_v26 = vld [vmem:[#allocation13 + $0x158] sm:$0xff] }
 0xa3e   :  { %v5030_v32 = vpop.f32.mrb[24].mxu0 }
 0xa3f   :  { %v3204_v57 = vmul.f32 0.125, %v5030_v32  ;;  %v3194_v34 = vpop.f32.mrb[25].mxu0 }
 0xa40   :  { %v3203_v13 = vmul.f32 0.125, %v3194_v34 }
 0xa41   :  { %v3208_v4 = vsel %vm2018_vm5, %v3204_v57, -inf }
 0xa42   :  { %3209 = vmax.xlane.f32.xlu1 %v3208_v4  ;;  %v3205_v29 = vsel %vm2014_vm6, %v3203_v13, -inf }
 0xa43   :  { %3206 = vmax.xlane.f32.xlu0 %v3205_v29  ;;  %v3618_v29 = vld [vmem:[#allocation13 + $0x160] sm:$0xff] }
 0xac6   :  { %v3507_v43 = vpop.xlane.xlu0 %3506 }
 0xac7   :  { %v3509_v6 = vsub.f32 %v3501_v3, %v3507_v43  ;;  %v3504_v50 = vpop.xlane.xlu1 %3503  ;;  %v7254_v3 = vadd.f32 %v6971_v39, %v697_v60  ;;  %v3615_v39 = vld [vmem:[#allocation13 + $0x148] sm:$0xff]  ;;  %v3318_v60 = vld [vmem:[#allocation13 + $0x130] sm:$0xff] }
 0xac8   :  { %v3508_v0 = vsub.f32 %v3500_v25, %v3504_v50  ;;  %v6076_v8 = vpack.c.bf16 %v3615_v39, %v3614_v27  ;;  %v3619_v43 = vld [vmem:[#allocation13 + $0x168] sm:$0xff]  ;;  %v3620_v50 = vld [vmem:[#allocation13 + $0x170] sm:$0xff]  ;;  %v6060_v61 = vpack.c.bf16 %v3319_v22, %v3318_v60  ;;  %v4209_v60 = vld [vmem:[#allocation13 + $0x1c0] sm:$0xff] }
 0xac9   :  { %v3512_v10 = vmul.f32 1.442695, %v3509_v6  ;;  %v6084_v6 = vpack.c.bf16 %v3619_v43, %v3618_v29  ;;  %v4210_v22 = vld [vmem:[#allocation13 + $0x1c8] sm:$0xff] }
 0xaca   :  { %v3510_v18 = vmul.f32 1.442695, %v3508_v0  ;;  %v3621_v0 = vld [vmem:[#allocation13 + $0x178] sm:$0xff] }
 0xacb   :  { %6371 = vpow2.f32 %v3512_v10 }
 0xacc   :  { %6373 = vpow2.f32 %v3510_v18 }
 0xacf   :  { %v3210_v49 = vpop.xlane.xlu1 %3209 }
 0xad0   :  { %v3212_v35 = vsub.f32 %v3204_v57, %v3210_v49  ;;  %v3207_v51 = vpop.xlane.xlu0 %3206 }
 0xad1   :  { %v3211_v48 = vsub.f32 %v3203_v13, %v3207_v51  ;;  %v3314_v51 = vld [vmem:[#allocation13 + $0x110] sm:$0xff] }
 0xad2   :  { %v3215_v5 = vmul.f32 1.442695, %v3212_v35  ;;  %v6088_v35 = vpack.c.bf16 %v3621_v0, %v3620_v50 }
 0xad3   :  { %v3213_v62 = vmul.f32 1.442695, %v3211_v48  ;;  %v3315_v48 = vld [vmem:[#allocation13 + $0x118] sm:$0xff] }
 0xad5   :  { %v6372_v1 = vpop.eup %6371  ;;  %6375 = vpow2.f32 %v3213_v62 }
 0xad6   :  { %v6374_v54 = vpop.eup %6373  ;;  %v3517_v28 = vsel %vm2018_vm5, %v6372_v1, 0.0  ;;  %6377 = vpow2.f32 %v3215_v5 }
 0xad7   :  { %3518 = vadd.xlane.f32.xlu1 %v3517_v28  ;;  %v3514_v37 = vsel %vm2014_vm6, %v6374_v54, 0.0  ;;  %v6052_v28 = vpack.c.bf16 %v3315_v48, %v3314_v51 }
 0xad8   :  { %3515 = vadd.xlane.f32.xlu0 %v3514_v37  ;;  %v3316_v37 = vld [vmem:[#allocation13 + $0x120] sm:$0xff] }
 0xadf   :  { %v6376_v31 = vpop.eup %6375 }
 0xae0   :  { %v3217_v40 = vsel %vm2014_vm6, %v6376_v31, 0.0  ;;  %v6378_v7 = vpop.eup %6377 }
 0xae1   :  { %3218 = vadd.xlane.f32.xlu1 %v3217_v40  ;;  %v3220_v11 = vsel %vm2018_vm5, %v6378_v7, 0.0  ;;  %v3317_v40 = vld [vmem:[#allocation13 + $0x128] sm:$0xff] }
 0xae5   :  { %3221 = vadd.xlane.f32.xlu1 %v3220_v11 }
 0xaee   :  { %6305 = vrot.lane.b32.xlu0 %v6304_v46, %s6659_s27 }
 0xaf2   :  { %4004 = vrot.lane.b32.xlu0 %v7249_v19, %s6659_s27 }
 0xaf6   :  { %4006 = vrot.lane.b32.xlu0 %v7254_v3, %s6659_s27  ;;  %6310 = vrot.lane.b32.xlu1 %v6309_v47, %s6659_s27  ;;  %v3616_v47 = vld [vmem:[#allocation13 + $0x150] sm:$0xff] }
 0xaf7   :  { %v6080_v4 = vpack.c.bf16 %v3617_v26, %v3616_v47 }
 0xb64   :  { %v3519_v23 = vpop.xlane.xlu1 %3518 }
 0xb65   :  { %6379 = vrcp.f32 %v3519_v23  ;;  %v3516_v14 = vpop.xlane.xlu0 %3515 }
 0xb66   :  { %6381 = vrcp.f32 %v3516_v14 }
 0xb69   :  { %v6306_v46 = vpop.permute.xlu0 %6305 }
 0xb6a   :  { %v6308_v24 = vunpack.i.h.bf16 %v6306_v46  ;;  %v6307_v63 = vunpack.i.l.bf16 %v6306_v46 }
 0xb6c   :  { %v6070_v25 = vpack.c.bf16 %v6308_v24, %v6307_v63 }
 0xb6d   :  { %v4005_v23 = vpop.permute.xlu0 %4004 }
 0xb6e   :  { %6072 = vmatprep.subr.msk.bf16.mxu1 %vm6995_vm4, %v6070_v25  ;;  %v3219_v33 = vpop.xlane.xlu1 %3218 }
 0xb6f   :  { %v6380_v44 = vpop.eup %6379  ;;  %6383 = vrcp.f32 %v3219_v33  ;;  %6075 = vmatpush3.bf16.msk.msra.mxu1 %vm6995_vm4, %v6070_v25 }
 0xb70   :  { %v6382_v32 = vpop.eup %6381  ;;  %6077 = vmatprep.subr.bf16.mxu1 %v6076_v8  ;;  %v3523_v34 = vmul.f32 %v6380_v44, %v6372_v1 }
 0xb71   :  { %v3522_v57 = vmul.f32 %v6382_v32, %v6374_v54  ;;  %v4007_v14 = vpop.permute.xlu0 %4006 }
 0xb72   :  { %v3222_v13 = vpop.xlane.xlu1 %3221 }
 0xb73   :  { %6385 = vrcp.f32 %v3222_v13  ;;  %5068 = vmatprep.mubr.msk.f32.mxu1 %vm2014_vm6, %v3522_v57 }
 0xb74   :  { %5069 = vmatmul.mubr.msk.f32.vlgmr.msra.gmra.mrb[26].mxu1 %vm2014_vm6, %v3523_v34 }
 0xb75   :  { %6079 = vmatpush3.bf16.msra.mxu1 %v6076_v8 }
 0xb76   :  { %6081 = vmatprep.subr.bf16.mxu1 %v6080_v4  ;;  %v6311_v18 = vpop.permute.xlu1 %6310 }
 0xb77   :  { %v6313_v5 = vunpack.i.h.bf16 %v6311_v18  ;;  %v6312_v62 = vunpack.i.l.bf16 %v6311_v18 }
 0xb79   :  { %v6384_v10 = vpop.eup %6383  ;;  %6083 = vmatpush3.bf16.msra.mxu1 %v6080_v4  ;;  %v6120_v11 = vpack.c.bf16 %v6313_v5, %v6312_v62 }
 0xb7a   :  { %6085 = vmatprep.subr.bf16.mxu1 %v6084_v6  ;;  %v3225_v49 = vmul.f32 %v6384_v10, %v6376_v31  ;;  %v6056_v31 = vpack.c.bf16 %v3317_v40, %v3316_v37 }
 0xb7c   :  { %5035 = vmatprep.mubr.msk.f32.mxu0 %vm2014_vm6, %v3225_v49 }
 0xb7d   :  { %v6386_v1 = vpop.eup %6385  ;;  %6087 = vmatpush3.bf16.msra.mxu1 %v6084_v6 }
 0xb7e   :  { %v3226_v54 = vmul.f32 %v6386_v1, %v6378_v7  ;;  %6089 = vmatprep.subr.bf16.mxu1 %v6088_v35 }
 0xb80   :  { %5036 = vmatmul.mubr.msk.f32.vlgmr.msra.gmra.mrb[26].mxu0 %vm2014_vm6, %v3226_v54 }
 0xb81   :  { %6051 = vmatpush3.bf16.msra.mxu0 %v6048_v9  ;;  %6091 = vmatpush3.bf16.msra.mxu1 %v6088_v35 }
 0xb82   :  { %6122 = vmatprep.subr.msk.bf16.mxu1 %vm6987_vm2, %v6120_v11  ;;  %6053 = vmatprep.subr.bf16.mxu0 %v6052_v28 }
 0xb85   :  { %6055 = vmatpush3.bf16.msra.mxu0 %v6052_v28 }
 0xb86   :  { %6057 = vmatprep.subr.bf16.mxu0 %v6056_v31 }
 0xb89   :  { %6059 = vmatpush3.bf16.msra.mxu0 %v6056_v31 }
 0xb8a   :  { %6061 = vmatprep.subr.bf16.mxu0 %v6060_v61 }
 0xb8d   :  { %6063 = vmatpush3.bf16.msra.mxu0 %v6060_v61 }
 0xb8e   :  { %6094 = vmatprep.subr.msk.bf16.mxu0 %vm6987_vm2, %v7068_v45 }
 0xc47   :  { %v5070_v7 = vpop.f32.mrb[26].mxu1 }
 0xc48   :  { %v3604_v9 = vpop.f32.mrb[27].mxu1 }
 0xc49   :  { %5087 = vmatprep.mubr.msk.f32.mxu1 %vm1924_vm0, %v3604_v9 }
 0xc4a   :  { %5088 = vmatmul.mubr.msk.f32.vlgmr.msra.gmra.mrb[28].mxu1 %vm1924_vm0, %v5070_v7 }
 0xc4b   :  { %6125 = vmatpush3.bf16.xpose.msk.msra.mxu1 %vm6987_vm2, %v6120_v11  ;;  %5127 = vmatprep.mubr.msk.f32.mxu1 %vm1924_vm0, %v4005_v23  ;;  %v6132_v23 = vpack.c.bf16 %v4210_v22, %v4209_v60 }
 0xc52   :  { %5128 = vmatmul.mubr.msk.f32.vlgmr.msra.gmra.mrb[30].mxu1 %vm1924_vm0, %v4007_v14 }
 0xc53   :  { %v5037_v46 = vpop.f32.mrb[26].mxu0 }
 0xc54   :  { %v3302_v27 = vpop.f32.mrb[27].mxu0 }
 0xc55   :  { %5054 = vmatprep.mubr.msk.f32.mxu0 %vm1924_vm0, %v3302_v27  ;;  %v4213_v27 = vld [vmem:[#allocation13 + $0x1e0] sm:$0xff] }
 0xc56   :  { %5055 = vmatmul.mubr.msk.f32.vlgmr.msra.gmra.mrb[28].mxu0 %vm1924_vm0, %v5037_v46 }
 0xc57   :  { %6097 = vmatpush3.bf16.xpose.msk.msra.mxu0 %vm6987_vm2, %v7068_v45  ;;  %5094 = vmatprep.mubr.msk.f32.mxu0 %vm1924_vm0, %v7249_v19 }
 0xc58   :  { %6100 = vmatprep.subr.msk.bf16.mxu0 %vm6995_vm4, %v7036_v17 }
 0xc5e   :  { %5095 = vmatmul.mubr.msk.f32.vlgmr.msra.gmra.mrb[30].mxu0 %vm1924_vm0, %v7254_v3 }
 0xc5f   :  { %6103 = vmatpush3.bf16.msk.msra.mxu0 %vm6995_vm4, %v7036_v17 }
 0xd1d   :  { %v7296_v39 = vpop.f32.mrb[28].mxu1 }
 0xd1e   :  { %v7298_v24 = vpop.f32.mrb[29].mxu1 }
 0xd25   :  { %v5129_v15 = vpop.f32.mrb[30].mxu1 }
 0xd26   :  { %v4096_v45 = vmul.f32 0.125, %v5129_v15  ;;  %v4086_v63 = vpop.f32.mrb[31].mxu1  ;;  %v4214_v15 = vld [vmem:[#allocation13 + $0x1e8] sm:$0xff] }
 0xd27   :  { %v4095_v25 = vmul.f32 0.125, %v4086_v63  ;;  %v6140_v55 = vpack.c.bf16 %v4214_v15, %v4213_v27  ;;  %v4215_v63 = vld [vmem:[#allocation13 + $0x1f0] sm:$0xff] }
 0xd28   :  { %v4100_v19 = vsel %vm2018_vm5, %v4096_v45, -inf  ;;  %v4353_v27 = vld [vmem:[%s7576_s8 + $0x38] sm:$0xff]  ;;  %v4370_v15 = vld [vmem:[%s7576_s8 + $0xc0] sm:$0xff] }
 0xd29   :  { %4101 = vmax.xlane.f32.xlu0 %v4100_v19  ;;  %v7301_v8 = vpop.f32.mrb[28].mxu0  ;;  %v4097_v33 = vsel %vm2014_vm6, %v4095_v25, -inf }
 0xd2a   :  { %4098 = vmax.xlane.f32.xlu1 %v4097_v33  ;;  %v7304_v3 = vpop.f32.mrb[29].mxu0 }
 0xd31   :  { %v5096_v44 = vpop.f32.mrb[30].mxu0 }
 0xd32   :  { %v3799_v17 = vmul.f32 0.125, %v5096_v44  ;;  %v3789_v47 = vpop.f32.mrb[31].mxu0 }
 0xd33   :  { %v3798_v26 = vmul.f32 0.125, %v3789_v47 }
 0xd34   :  { %v3803_v32 = vsel %vm2018_vm5, %v3799_v17, -inf }
 0xd35   :  { %3804 = vmax.xlane.f32.xlu1 %v3803_v32  ;;  %v3800_v57 = vsel %vm2014_vm6, %v3798_v26, -inf  ;;  %v3908_v32 = vld [vmem:[#allocation13 + $0x188] sm:$0xff] }
 0xd36   :  { %3801 = vmax.xlane.f32.xlu0 %v3800_v57 }
 0xdb6   :  { %v4102_v34 = vpop.xlane.xlu0 %4101 }
 0xdb7   :  { %v4104_v13 = vsub.f32 %v4096_v45, %v4102_v34  ;;  %v4099_v4 = vpop.xlane.xlu1 %4098  ;;  %v3909_v34 = vld [vmem:[#allocation13 + $0x190] sm:$0xff] }
 0xdb8   :  { %v4103_v29 = vsub.f32 %v4095_v25, %v4099_v4  ;;  %v4216_v25 = vld [vmem:[#allocation13 + $0x1f8] sm:$0xff] }
 0xdb9   :  { %v4107_v43 = vmul.f32 1.442695, %v4104_v13  ;;  %v6144_v19 = vpack.c.bf16 %v4216_v25, %v4215_v63  ;;  %v3910_v13 = vld [vmem:[#allocation13 + $0x198] sm:$0xff] }
 0xdba   :  { %v4105_v6 = vmul.f32 1.442695, %v4103_v29  ;;  %v6108_v4 = vpack.c.bf16 %v3910_v13, %v3909_v34  ;;  %v3911_v29 = vld [vmem:[#allocation13 + $0x1a0] sm:$0xff]  ;;  %v4354_v25 = vld [vmem:[%s7576_s8 + $0x40] sm:$0xff] }
 0xdbb   :  { %6387 = vpow2.f32 %v4107_v43  ;;  %v3912_v43 = vld [vmem:[#allocation13 + $0x1a8] sm:$0xff]  ;;  %v4375_v34 = vld [vmem:[%s7576_s8 + $0xe8] sm:$0xff] }
 0xdbc   :  { %6389 = vpow2.f32 %v4105_v6  ;;  %v6112_v6 = vpack.c.bf16 %v3912_v43, %v3911_v29  ;;  %v4358_v29 = vld [vmem:[%s7576_s8 + $0x60] sm:$0xff]  ;;  %v4359_v43 = vld [vmem:[%s7576_s8 + $0x68] sm:$0xff] }
 0xdc2   :  { %v3805_v50 = vpop.xlane.xlu1 %3804 }
 0xdc3   :  { %v3807_v0 = vsub.f32 %v3799_v17, %v3805_v50  ;;  %v3802_v10 = vpop.xlane.xlu0 %3801  ;;  %v3913_v50 = vld [vmem:[#allocation13 + $0x1b0] sm:$0xff] }
 0xdc4   :  { %v3806_v18 = vsub.f32 %v3798_v26, %v3802_v10  ;;  %v3907_v26 = vld [vmem:[#allocation13 + $0x180] sm:$0xff] }
 0xdc5   :  { %v6388_v49 = vpop.eup %6387  ;;  %v3810_v51 = vmul.f32 1.442695, %v3807_v0  ;;  %v6104_v57 = vpack.c.bf16 %v3908_v32, %v3907_v26  ;;  %v3914_v0 = vld [vmem:[#allocation13 + $0x1b8] sm:$0xff]  ;;  %v4356_v26 = vld [vmem:[%s7576_s8 + $0x50] sm:$0xff]  ;;  %v4357_v32 = vld [vmem:[%s7576_s8 + $0x58] sm:$0xff] }
 0xdc6   :  { %v6390_v35 = vpop.eup %6389  ;;  %v3808_v48 = vmul.f32 1.442695, %v3806_v18  ;;  %v4112_v5 = vsel %vm2018_vm5, %v6388_v49, 0.0  ;;  %v6116_v10 = vpack.c.bf16 %v3914_v0, %v3913_v50  ;;  %v4362_v18 = vld [vmem:[%s7576_s8 + $0x80] sm:$0xff]  ;;  %v6170_v13 = vpack.c.bf16 %v4357_v32, %v4356_v26  ;;  %v4377_v50 = vld [vmem:[%s7576_s8 + $0xf8] sm:$0xff] }
 0xdc7   :  { %4113 = vadd.xlane.f32.xlu1 %v4112_v5  ;;  %v4109_v62 = vsel %vm2014_vm6, %v6390_v35, 0.0  ;;  %6105 = vmatprep.subr.bf16.mxu0 %v6104_v57  ;;  %v6174_v0 = vpack.c.bf16 %v4359_v43, %v4358_v29  ;;  %v4409_v29 = vld [vmem:[%s7576_s8 + $0x1f8] sm:$0xff] }
 0xdc8   :  { %6391 = vpow2.f32 %v3808_v48  ;;  %4110 = vadd.xlane.f32.xlu0 %v4109_v62  ;;  %v4346_v62 = vld [vmem:[%s7576_s8] sm:$0xff] }
 0xdc9   :  { %6393 = vpow2.f32 %v3810_v51 }
 0xdd2   :  { %v6392_v1 = vpop.eup %6391 }
 0xdd3   :  { %v3812_v54 = vsel %vm2014_vm6, %v6392_v1, 0.0  ;;  %v6394_v28 = vpop.eup %6393 }
 0xdd4   :  { %3813 = vadd.xlane.f32.xlu1 %v3812_v54  ;;  %v3815_v37 = vsel %vm2018_vm5, %v6394_v28, 0.0  ;;  %v4364_v54 = vld [vmem:[%s7576_s8 + $0x90] sm:$0xff] }
 0xdd8   :  { %3816 = vadd.xlane.f32.xlu1 %v3815_v37 }
 0xdde   :  { %6315 = vrot.lane.b32.xlu0 %v6314_v2, %s6659_s27  ;;  %v4212_v2 = vld [vmem:[#allocation13 + $0x1d8] sm:$0xff] }
 0xddf   :  { %v6136_v46 = vpack.c.bf16 %v4212_v2, %v4211_v16  ;;  %v4350_v16 = vld [vmem:[%s7576_s8 + $0x20] sm:$0xff]  ;;  %v4351_v2 = vld [vmem:[%s7576_s8 + $0x28] sm:$0xff] }
 0xde9   :  { %6320 = vrot.lane.b32.xlu1 %v6319_v58, %s6659_s27 }
 0xe54   :  { %v4114_v40 = vpop.xlane.xlu1 %4113 }
 0xe55   :  { %6395 = vrcp.f32 %v4114_v40  ;;  %v4111_v11 = vpop.xlane.xlu0 %4110 }
 0xe56   :  { %6397 = vrcp.f32 %v4111_v11 }
 0xe59   :  { %v6316_v31 = vpop.permute.xlu0 %6315 }
 0xe5a   :  { %v6318_v61 = vunpack.i.h.bf16 %v6316_v31  ;;  %v6317_v7 = vunpack.i.l.bf16 %v6316_v31  ;;  %v2806_v31 = vadd.f32 %v7226_v21, %v7231_v30  ;;  %v4367_v21 = vld [vmem:[%s7576_s8 + $0xa8] sm:$0xff] }
 0xe5c   :  { %v6126_v9 = vpack.c.bf16 %v6318_v61, %v6317_v7  ;;  %v4348_v61 = vld [vmem:[%s7576_s8 + $0x10] sm:$0xff]  ;;  %v4349_v7 = vld [vmem:[%s7576_s8 + $0x18] sm:$0xff] }
 0xe5e   :  { %6128 = vmatprep.subr.msk.bf16.mxu1 %vm6995_vm4, %v6126_v9 }
 0xe5f   :  { %v6396_v12 = vpop.eup %6395  ;;  %6131 = vmatpush3.bf16.msk.msra.mxu1 %vm6995_vm4, %v6126_v9  ;;  %v4366_v9 = vld [vmem:[%s7576_s8 + $0xa0] sm:$0xff] }
 0xe60   :  { %v6398_v36 = vpop.eup %6397  ;;  %6133 = vmatprep.subr.bf16.mxu1 %v6132_v23  ;;  %v4118_v14 = vmul.f32 %v6396_v12, %v6388_v49  ;;  %v4363_v49 = vld [vmem:[%s7576_s8 + $0x88] sm:$0xff]  ;;  %v6156_v12 = vpack.c.bf16 %v4367_v21, %v4366_v9  ;;  %v4382_v21 = vld [vmem:[%s7576_s8 + $0x120] sm:$0xff] }
 0xe61   :  { %v3814_v38 = vpop.xlane.xlu1 %3813  ;;  %v4117_v58 = vmul.f32 %v6398_v36, %v6390_v35  ;;  %v6148_v35 = vpack.c.bf16 %v4363_v49, %v4362_v18  ;;  %v4368_v36 = vld [vmem:[%s7576_s8 + $0xb0] sm:$0xff]  ;;  %v4361_v49 = vld [vmem:[%s7576_s8 + $0x78] sm:$0xff] }
 0xe62   :  { %6399 = vrcp.f32 %v3814_v38  ;;  %v4369_v38 = vld [vmem:[%s7576_s8 + $0xb8] sm:$0xff]  ;;  %v4360_v18 = vld [vmem:[%s7576_s8 + $0x70] sm:$0xff] }
 0xe63   :  { %5134 = vmatprep.mubr.msk.f32.mxu1 %vm2014_vm6, %v4117_v58  ;;  %v6158_v58 = vpack.c.bf16 %v4351_v2, %v4350_v16 }
 0xe64   :  { %5135 = vmatmul.mubr.msk.f32.vlgmr.msra.gmra.mrb[32].mxu1 %vm2014_vm6, %v4118_v14  ;;  %v6160_v14 = vpack.c.bf16 %v4369_v38, %v4368_v36  ;;  %v4384_v36 = vld [vmem:[%s7576_s8 + $0x130] sm:$0xff]  ;;  %v4385_v38 = vld [vmem:[%s7576_s8 + $0x138] sm:$0xff] }
 0xe65   :  { %v3817_v45 = vpop.xlane.xlu1 %3816  ;;  %6135 = vmatpush3.bf16.msra.mxu1 %v6132_v23  ;;  %v6154_v23 = vpack.c.bf16 %v4349_v7, %v4348_v61  ;;  %v4399_v61 = vld [vmem:[%s7576_s8 + $0x1a8] sm:$0xff] }
 0xe66   :  { %6401 = vrcp.f32 %v3817_v45  ;;  %6137 = vmatprep.subr.bf16.mxu1 %v6136_v46  ;;  %v4371_v45 = vld [vmem:[%s7576_s8 + $0xc8] sm:$0xff] }
 0xe67   :  { %v6164_v63 = vpack.c.bf16 %v4371_v45, %v4370_v15  ;;  %v4386_v15 = vld [vmem:[%s7576_s8 + $0x140] sm:$0xff]  ;;  %v4387_v45 = vld [vmem:[%s7576_s8 + $0x148] sm:$0xff] }
 0xe69   :  { %6139 = vmatpush3.bf16.msra.mxu1 %v6136_v46  ;;  %v7336_v5 = vpop.permute.xlu1 %6320  ;;  %v4352_v46 = vld [vmem:[%s7576_s8 + $0x30] sm:$0xff] }
 0xe6a   :  { %6141 = vmatprep.subr.bf16.mxu1 %v6140_v55  ;;  %v6322_v37 = vunpack.i.l.bf16 %v7336_v5 }
 0xe6c   :  { %v6400_v33 = vpop.eup %6399  ;;  %v4340_v30 = vsel %vm1924_vm0, %v2806_v31, %v6322_v37  ;;  %v4397_v37 = vld [vmem:[%s7576_s8 + $0x198] sm:$0xff]  ;;  %v4380_v31 = vld [vmem:[%s7576_s8 + $0x110] sm:$0xff] }
 0xe6d   :  { %v3820_v44 = vmul.f32 %v6400_v33, %v6392_v1  ;;  %6143 = vmatpush3.bf16.msra.mxu1 %v6140_v55  ;;  %v4347_v1 = vld [vmem:[%s7576_s8 + $0x8] sm:$0xff]  ;;  %v6162_v55 = vpack.c.bf16 %v4353_v27, %v4352_v46  ;;  %v4372_v33 = vld [vmem:[%s7576_s8 + $0xd0] sm:$0xff]  ;;  %v6194_v46 = vpack.c.bf16 %v4385_v38, %v4384_v36 }
 0xe6e   :  { %6145 = vmatprep.subr.bf16.mxu1 %v6144_v19  ;;  %v6150_v11 = vpack.c.bf16 %v4347_v1, %v4346_v62  ;;  %v4394_v1 = vld [vmem:[%s7576_s8 + $0x180] sm:$0xff] }
 0xe6f   :  { %5101 = vmatprep.mubr.msk.f32.mxu0 %vm2014_vm6, %v3820_v44  ;;  %v4373_v44 = vld [vmem:[%s7576_s8 + $0xd8] sm:$0xff] }
 0xe70   :  { %v6402_v17 = vpop.eup %6401 }
 0xe71   :  { %v3821_v47 = vmul.f32 %v6402_v17, %v6394_v28  ;;  %6147 = vmatpush3.bf16.msra.mxu1 %v6144_v19  ;;  %v4365_v28 = vld [vmem:[%s7576_s8 + $0x98] sm:$0xff]  ;;  %v4355_v19 = vld [vmem:[%s7576_s8 + $0x48] sm:$0xff] }
 0xe72   :  { %v6152_v22 = vpack.c.bf16 %v4365_v28, %v4364_v54  ;;  %v6166_v17 = vpack.c.bf16 %v4355_v19, %v4354_v25  ;;  %v4395_v54 = vld [vmem:[%s7576_s8 + $0x188] sm:$0xff]  ;;  %v4378_v28 = vld [vmem:[%s7576_s8 + $0x100] sm:$0xff]  ;;  %v6198_v25 = vpack.c.bf16 %v4387_v45, %v4386_v15 }
 0xe73   :  { %5102 = vmatmul.mubr.msk.f32.vlgmr.msra.gmra.mrb[32].mxu0 %vm2014_vm6, %v3821_v47  ;;  %v6168_v47 = vpack.c.bf16 %v4373_v44, %v4372_v33  ;;  %v4388_v33 = vld [vmem:[%s7576_s8 + $0x150] sm:$0xff]  ;;  %v4389_v44 = vld [vmem:[%s7576_s8 + $0x158] sm:$0xff] }
 0xe74   :  { %6107 = vmatpush3.bf16.msra.mxu0 %v6104_v57  ;;  %v4374_v57 = vld [vmem:[%s7576_s8 + $0xe0] sm:$0xff]  ;;  %v6202_v26 = vpack.c.bf16 %v4389_v44, %v4388_v33 }
 0xe75   :  { %6109 = vmatprep.subr.bf16.mxu0 %v6108_v4 }
 0xe78   :  { %6111 = vmatpush3.bf16.msra.mxu0 %v6108_v4  ;;  %v6172_v4 = vpack.c.bf16 %v4375_v34, %v4374_v57  ;;  %v4390_v57 = vld [vmem:[%s7576_s8 + $0x160] sm:$0xff]  ;;  %v4391_v34 = vld [vmem:[%s7576_s8 + $0x168] sm:$0xff] }
 0xe79   :  { %6113 = vmatprep.subr.bf16.mxu0 %v6112_v6 }
 0xe7c   :  { %6115 = vmatpush3.bf16.msra.mxu0 %v6112_v6  ;;  %v4376_v6 = vld [vmem:[%s7576_s8 + $0xf0] sm:$0xff] }
 0xe7d   :  { %6117 = vmatprep.subr.bf16.mxu0 %v6116_v10 }
 0xe80   :  { %6119 = vmatpush3.bf16.msra.mxu0 %v6116_v10  ;;  %v6176_v10 = vpack.c.bf16 %v4377_v50, %v4376_v6  ;;  %v4392_v6 = vld [vmem:[%s7576_s8 + $0x170] sm:$0xff]  ;;  %v4393_v50 = vld [vmem:[%s7576_s8 + $0x178] sm:$0xff] }
 0xe81   :  { %6149 = vmatprep.subr.bf16.mxu0 %v6148_v35  ;;  %v6178_v35 = vpack.c.bf16 %v4361_v49, %v4360_v18  ;;  %v4668_v18 = vld [vmem:[#allocation14 + $0x7] ss:$0 sm:$0xff] }
 0xf37   :  { %v5136_v51 = vpop.f32.mrb[32].mxu1 }
 0xf38   :  { %v4199_v48 = vpop.f32.mrb[33].mxu1 }
 0xf39   :  { %5153 = vmatprep.mubr.msk.f32.mxu1 %vm1924_vm0, %v4199_v48  ;;  %v2211_v48 = vadd.f32 %v7144_v42, %v7149_v56  ;;  %v4379_v42 = vld [vmem:[%s7576_s8 + $0x108] sm:$0xff]  ;;  %v4396_v56 = vld [vmem:[%s7576_s8 + $0x190] sm:$0xff] }
 0xf3a   :  { %5154 = vmatmul.mubr.msk.f32.vlgmr.msra.gmra.mrb[34].mxu1 %vm1924_vm0, %v5136_v51  ;;  %v6323_v51 = vunpack.i.h.bf16 %v7336_v5  ;;  %v6180_v5 = vpack.c.bf16 %v4395_v54, %v4394_v1 }
 0xf3c   :  { %v4338_v62 = vsel %vm1924_vm0, %v2211_v48, %v6323_v51  ;;  %6181 = vmatprep.subr.bf16.mxu1 %v6180_v5 }
 0xf46   :  { %v5103_v40 = vpop.f32.mrb[32].mxu0 }
 0xf47   :  { %v3897_v60 = vpop.f32.mrb[33].mxu0 }
 0xf48   :  { %5120 = vmatprep.mubr.msk.f32.mxu0 %vm1924_vm0, %v3897_v60  ;;  %v4381_v60 = vld [vmem:[%s7576_s8 + $0x118] sm:$0xff] }
 0xf49   :  { %5121 = vmatmul.mubr.msk.f32.vlgmr.msra.gmra.mrb[34].mxu0 %vm1924_vm0, %v5103_v40  ;;  %v6182_v40 = vpack.c.bf16 %v4379_v42, %v4378_v28  ;;  %v6186_v7 = vpack.c.bf16 %v4381_v60, %v4380_v31 }
 0xf4a   :  { %6151 = vmatpush3.bf16.msra.mxu0 %v6150_v11  ;;  %4481 = vmatprep.mubr.f32.mxu0 %v4340_v30  ;;  %v6184_v11 = vpack.c.bf16 %v4397_v37, %v4396_v56  ;;  %v4383_v30 = vld [vmem:[%s7576_s8 + $0x128] sm:$0xff] }
 0xf4b   :  { %6153 = vmatprep.subr.bf16.mxu0 %v6152_v22  ;;  %v4398_v22 = vld [vmem:[%s7576_s8 + $0x1a0] sm:$0xff]  ;;  %6183 = vmatpush3.bf16.msra.mxu1 %v6182_v40  ;;  %v6190_v16 = vpack.c.bf16 %v4383_v30, %v4382_v21  ;;  %v4638_v40 = vld [vmem:[#allocation14 + $0x4] ss:$0 sm:$0xff] }
 0xf4c   :  { %6185 = vmatprep.subr.bf16.mxu1 %v6184_v11  ;;  %v6188_v9 = vpack.c.bf16 %v4399_v61, %v4398_v22  ;;  %v4658_v11 = vld [vmem:[#allocation14 + $0x6] ss:$0 sm:$0xff]  ;;  %v3401_v31 = vadd.f32 %v4638_v40, %v7304_v3  ;;  %v3406_v3 = vadd.f32 %v7301_v8, %v4638_v40 }
 0xf4e   :  { %6155 = vmatpush3.bf16.msra.mxu0 %v6154_v23  ;;  %v4400_v23 = vld [vmem:[%s7576_s8 + $0x1b0] sm:$0xff] }
 0xf4f   :  { %6157 = vmatprep.subr.bf16.mxu0 %v6156_v12  ;;  %v4401_v12 = vld [vmem:[%s7576_s8 + $0x1b8] sm:$0xff]  ;;  %6187 = vmatpush3.bf16.msra.mxu1 %v6186_v7 }
 0xf50   :  { %6189 = vmatprep.subr.bf16.mxu1 %v6188_v9  ;;  %v6192_v2 = vpack.c.bf16 %v4401_v12, %v4400_v23 }
 0xf52   :  { %6159 = vmatpush3.bf16.msra.mxu0 %v6158_v58  ;;  %v4402_v58 = vld [vmem:[%s7576_s8 + $0x1c0] sm:$0xff] }
 0xf53   :  { %6161 = vmatprep.subr.bf16.mxu0 %v6160_v14  ;;  %v4403_v14 = vld [vmem:[%s7576_s8 + $0x1c8] sm:$0xff]  ;;  %6191 = vmatpush3.bf16.msra.mxu1 %v6190_v16 }
 0xf54   :  { %6193 = vmatprep.subr.bf16.mxu1 %v6192_v2  ;;  %v6196_v27 = vpack.c.bf16 %v4403_v14, %v4402_v58  ;;  %v4671_v58 = vld [vmem:[#allocation16] ss:$0 sm:$0xff] }
 0xf56   :  { %6163 = vmatpush3.bf16.msra.mxu0 %v6162_v55  ;;  %v4404_v55 = vld [vmem:[%s7576_s8 + $0x1d0] sm:$0xff] }
 0xf57   :  { %6165 = vmatprep.subr.bf16.mxu0 %v6164_v63  ;;  %v4405_v63 = vld [vmem:[%s7576_s8 + $0x1d8] sm:$0xff]  ;;  %6195 = vmatpush3.bf16.msra.mxu1 %v6194_v46 }
 0xf58   :  { %6197 = vmatprep.subr.bf16.mxu1 %v6196_v27  ;;  %v6200_v19 = vpack.c.bf16 %v4405_v63, %v4404_v55 }
 0xf5a   :  { %6167 = vmatpush3.bf16.msra.mxu0 %v6166_v17  ;;  %v4406_v17 = vld [vmem:[%s7576_s8 + $0x1e0] sm:$0xff] }
 0xf5b   :  { %6169 = vmatprep.subr.bf16.mxu0 %v6168_v47  ;;  %v4407_v47 = vld [vmem:[%s7576_s8 + $0x1e8] sm:$0xff]  ;;  %6199 = vmatpush3.bf16.msra.mxu1 %v6198_v25 }
 0xf5c   :  { %6201 = vmatprep.subr.bf16.mxu1 %v6200_v19  ;;  %v6204_v32 = vpack.c.bf16 %v4407_v47, %v4406_v17 }
 0xf5e   :  { %6171 = vmatpush3.bf16.msra.mxu0 %v6170_v13  ;;  %v6206_v13 = vpack.c.bf16 %v4391_v34, %v4390_v57 }
 0xf5f   :  { %6173 = vmatprep.subr.bf16.mxu0 %v6172_v4  ;;  %6203 = vmatpush3.bf16.msra.mxu1 %v6202_v26  ;;  %v4408_v4 = vld [vmem:[%s7576_s8 + $0x1f0] sm:$0xff]  ;;  %s6666_s8 = smov [#allocation17]  }
 0xf60   :  { %6205 = vmatprep.subr.bf16.mxu1 %v6204_v32  ;;  %v6208_v43 = vpack.c.bf16 %v4409_v29, %v4408_v4 }
 0xf62   :  { %6175 = vmatpush3.bf16.msra.mxu0 %v6174_v0  ;;  %v6210_v0 = vpack.c.bf16 %v4393_v50, %v4392_v6 }
 0xf63   :  { %6177 = vmatprep.subr.bf16.mxu0 %v6176_v10  ;;  %6207 = vmatpush3.bf16.msra.mxu1 %v6206_v13  ;;  %v4648_v10 = vld [vmem:[#allocation14 + $0x5] ss:$0 sm:$0xff] }
 0xf64   :  { %6209 = vmatprep.subr.bf16.mxu1 %v6208_v43 }
 0xf66   :  { %6179 = vmatpush3.bf16.msra.mxu0 %v6178_v35  ;;  %v3708_v35 = vadd.f32 %v7296_v39, %v4648_v10 }
 0xf67   :  { %6211 = vmatpush3.bf16.msra.mxu1 %v6210_v0 }
 0xf69   :  { %4482 = vmatmul.mubr.f32.vlgmr.msra.gmra.mrb[36].mxu0 %v4338_v62  ;;  %v3703_v62 = vadd.f32 %v4648_v10, %v7298_v24 }
0x100d   :  { %v5155_v49 = vpop.f32.mrb[34].mxu1 }
0x100e   :  { %v4303_v51 = vadd.f32 %v5155_v49, %v4668_v18  ;;  %v4297_v48 = vpop.f32.mrb[35].mxu1 }
0x100f   :  { %v4298_v1 = vadd.f32 %v4668_v18, %v4297_v48 }
0x1010   :  { %v6334_v54 = vpack.i.bf16 %v3708_v35, %v4303_v51 }
0x1011   :  { %v6324_v28 = vpack.i.bf16 %v3703_v62, %v4298_v1 }
0x1012   :  { %6335 = vrot.lane.b32.xlu1 %v6334_v54, %s6659_s27 }
0x1013   :  { %6325 = vrot.lane.b32.xlu0 %v6324_v28, %s6659_s27 }
0x1017   :  { %6330 = vrot.lane.b32.xlu0 %v6329_v20, %s6659_s27  ;;  %s4575_s27 = sshll.u32 %s6666_s8, 4  ;;  %s4576_s27 = int_to_ptr.vmem [resolvable:$true] %s4575_s27 }
0x1018   :  { %s6614_s12 = scalar_lea.vmem %s4576_s27, 256  ;;  %p6619_p3 = scmp.lt.s32.totalorder %s4576_s27, %s4576_s27 }
0x1019   :  { %p6615_p2 = scmp.ne.s32.totalorder %s4576_s27, %s6614_s12  ;;  %p6620_p4 = scmp.lt.s32.totalorder %s6614_s12, %s6614_s12 }
0x101b   :  { %p6621_p5 = por %p6620_p4, %p6619_p3 }
0x101c   :  { %v5122_v5 = vpop.f32.mrb[34].mxu0 }
0x101d   :  { %v3995_v42 = vpop.f32.mrb[35].mxu0  ;;  %v4001_v21 = vadd.f32 %v5122_v5, %v4658_v11  ;;  %p6622_p6 = pnand %p6621_p5, %p6615_p2 }
0x101e   :  { %v3996_v22 = vadd.f32 %v4658_v11, %v3995_v42 }
0x103c   :  { %v4848_v56 = vpop.f32.mrb[36].mxu0 }
0x103d   :  { %v4849_v39 = vpop.f32.mrb[37].mxu0 }
0x103e   :  { %v4850_v37 = vadd.f32 %v4849_v39, %v4848_v56 }
0x1040   :  { %v4484_v27 = vadd.f32 %v4850_v37, %v4671_v58 }
0x1084   :  { %v6336_v24 = vpop.permute.xlu1 %6335 }
0x1085   :  { %v6326_v60 = vpop.permute.xlu0 %6325  ;;  %v6337_v61 = vunpack.i.l.bf16 %v6336_v24  ;;  %v6338_v53 = vunpack.i.h.bf16 %v6336_v24 }
0x1086   :  { %v6328_v7 = vunpack.i.h.bf16 %v6326_v60  ;;  %v6327_v9 = vunpack.i.l.bf16 %v6326_v60 }
0x1087   :  { %v4345_v16 = vsel %vm1924_vm0, %v4001_v21, %v6337_v61  ;;  %v4343_v38 = vsel %vm1924_vm0, %v3406_v3, %v6338_v53 }
0x1088   :  { %v4344_v30 = vsel %vm1924_vm0, %v3996_v22, %v6327_v9  ;;  %v4342_v41 = vsel %vm1924_vm0, %v3401_v31, %v6328_v7 }
0x1089   :  { %v6331_v20 = vpop.permute.xlu0 %6330  ;;  %4556 = vmatprep.mubr.f32.mxu1 %v4344_v30 }
0x108a   :  { %v6333_v23 = vunpack.i.h.bf16 %v6331_v20  ;;  %v6332_v12 = vunpack.i.l.bf16 %v6331_v20  ;;  %4557 = vmatmul.mubr.f32.vlgmr.msra.gmra.mrb[36].mxu1 %v4342_v41 }
0x108b   :  { %4561 = vmatprep.mubr.f32.mxu1 %v4345_v16 }
0x108c   :  { %v4341_v2 = vsel %vm1924_vm0, %v7229_v59, %v6332_v12  ;;  %v4339_v36 = vsel %vm1924_vm0, %v7147_v52, %v6333_v23 }
0x108d   :  { %4486 = vmatprep.mubr.f32.mxu0 %v4341_v2 }
0x108e   :  { %4487 = vmatmul.mubr.f32.gmra.mrb[38].mxu0 %v4339_v36  ;;  %4562 = vmatmul.mubr.f32.gmra.mrb[38].mxu1 %v4343_v38 }
0x115d   :  { %v4886_v14 = vpop.f32.mrb[36].mxu1 }
0x115e   :  { %v4887_v46 = vpop.f32.mrb[37].mxu1 }
0x115f   :  { %v4888_v15 = vadd.f32 %v4887_v46, %v4886_v14 }
0x1161   :  { %v4559_v45 = vadd.f32 %v4888_v15, %v4484_v27  ;;  %v4851_v55 = vpop.f32.mrb[38].mxu0  ;;  %v4889_v8 = vpop.f32.mrb[38].mxu1 }
0x1162   :  { %v4852_v63 = vpop.f32.mrb[39].mxu0  ;;  %v4890_v25 = vpop.f32.mrb[39].mxu1 }
0x1163   :  { %4567 = vst.msk [vmem:[#allocation17] sm:$0xff] %vm1924_vm0, %v4559_v45  ;;  %v4853_v59 = vadd.f32 %v4852_v63, %v4851_v55  ;;  %v4891_v19 = vadd.f32 %v4890_v25, %v4889_v8 }
0x1165   :  { %v4489_v52 = vadd.f32 %v4853_v59, %v4671_v58 }
0x1167   :  { %v4564_v33 = vadd.f32 %v4891_v19, %v4489_v52 }
0x1169   :  { %4569 = vst.msk [vmem:[#allocation17 + $0x8] sm:$0x3] %vm4568_vm7, %v4564_v33 }
0x116a   :  { %6625 = shalt.err (!%p6622_p6)
}
0x116b   :  { %s6626_s30 = scalar_lea.hbm %s7578_s10, 256 }
0x116c   :  { %p6627_p7 = scmp.ne.s32.totalorder %s7578_s10, %s6626_s30  ;;  %p6630_p8 = scmp.lt.u32.totalorder %s6626_s30, %s7578_s10 }
0x116e   :  { %p6632_p9 = pnand %p6630_p8, %p6627_p7 }
0x1170   :  { %6635 = shalt.err (!%p6632_p9)
}
0x1171   :  { %4581 = dma.vmem_to_hbm [thread:$0]  %s4576_s27, 256, %s7578_s10, [#allocation4], %s6662_s4, %s6662_s4, %s6663_s25  }
0x1172   :  { %6646 = dma.done.wait [#allocation4], 256  }
0x1173   :  { %6647 = vsyncadd [#allocation4], 4294967040 }
0x1174   :  { %4585 = vsyncpa [#allocation3], 1 }
0x1175   :  { %4586 = vsyncpa [#allocation6], 1 }
0x1176   :  { %4587 = vsyncpa [#allocation9], 1 }
0x1177   :  { %4588 = vsyncpa [#allocation12], 1 }
0x1178   :  { %4589 = vsyncpa [#allocation15], 1 }
0x1179   :  { %4590 = vsyncpa [#allocation4], 1 }

</bundles_post_ra>
